<compile_context>
chip_gen: v7x
topology: tpu7x:2x2x1
jax: 0.10.0
libtpu: 0.0.40
codegen_flags: <defaults>
</compile_context>

<pallas_src>
import functools

import jax
import jax.numpy as jnp
from jax.experimental import pallas as pl
from jax.experimental.pallas import tpu as pltpu

BN_EPS = 1e-5
VMEM_LIMIT = 32 * 1024 * 1024  # modest explicit budget, portable to v7x (64 MiB VMEM)

# Static (never traced) architecture description: (cout, stride) per conv_bn.
CONV_CFG = [(32, 2), (64, 2), (64, 1), (64, 2),
            (128, 1), (128, 2), (128, 1), (128, 2)]


# ----------------------------------------------------------------------------
# Pallas kernel 1: fused  Y = relu?(X @ W + b)   (bf16 operands, f32 epilogue)
# ----------------------------------------------------------------------------
def _mm_bias_act_kernel(x_ref, w_ref, b_ref, o_ref, *, apply_relu):
    # bf16 x bf16 -> f32 accumulation on the MXU; bias + ReLU stay in f32
    # (v5e has no bf16 VPU arithmetic); downcast only at the final store.
    y = jnp.dot(x_ref[...], w_ref[...], preferred_element_type=jnp.float32)
    y = y + b_ref[...]
    if apply_relu:
        y = jnp.maximum(y, 0.0)
    o_ref[...] = y.astype(o_ref.dtype)


def fused_matmul(x, w, b, *, relu, out_dtype):
    """relu?(x @ w + b).  x:(M,K) bf16, w:(K,N) bf16, b:(1,N) f32 -> (M,N).
    Tiled over M with a "parallel" grid axis (pipelining + megacore split)."""
    M, K = x.shape
    K2, N = w.shape
    assert K == K2, (K, K2)
    tm = M
    for cand in (256, 128, 64, 32, 16, 8):
        if M % cand == 0:
            tm = cand
            break
    grid = (M // tm,)
    flops = 2 * M * K * N
    bytes_accessed = (x.size * x.dtype.itemsize + w.size * w.dtype.itemsize
                      + b.size * b.dtype.itemsize
                      + M * N * jnp.dtype(out_dtype).itemsize)
    return pl.pallas_call(
        functools.partial(_mm_bias_act_kernel, apply_relu=relu),
        out_shape=jax.ShapeDtypeStruct((M, N), out_dtype),
        grid=grid,
        in_specs=[
            pl.BlockSpec((tm, K), lambda i: (i, 0)),
            pl.BlockSpec((K, N), lambda i: (0, 0)),
            pl.BlockSpec((1, N), lambda i: (0, 0)),
        ],
        out_specs=pl.BlockSpec((tm, N), lambda i: (i, 0)),
        compiler_params=pltpu.CompilerParams(
            dimension_semantics=("parallel",),
            vmem_limit_bytes=VMEM_LIMIT),
        cost_estimate=pl.CostEstimate(flops=flops, transcendentals=0,
                                      bytes_accessed=bytes_accessed),
    )(x, w, b)


# ----------------------------------------------------------------------------
# Pallas kernel 2: fused MLP head
#   f0 = relu(flat0 @ W1 + b1); f1 = relu(flat1 @ W1 + b1)
#   h  = relu(f0 @ Wa + f1 @ Wb + b2)       (== Linear(concat([f0,f1])) )
#   y  = h @ W3 + b3                        (Dropout(0.2) == identity at eval)
# ----------------------------------------------------------------------------
def _head_kernel(f0_ref, f1_ref, w1_ref, b1_ref, wa_ref, wb_ref, b2_ref,
                 w3_ref, b3_ref, o_ref):
    f0 = jnp.dot(f0_ref[...], w1_ref[...], preferred_element_type=jnp.float32)
    f0 = jnp.maximum(f0 + b1_ref[...], 0.0)
    f1 = jnp.dot(f1_ref[...], w1_ref[...], preferred_element_type=jnp.float32)
    f1 = jnp.maximum(f1 + b1_ref[...], 0.0)
    h = (jnp.dot(f0.astype(jnp.bfloat16), wa_ref[...],
                 preferred_element_type=jnp.float32)
         + jnp.dot(f1.astype(jnp.bfloat16), wb_ref[...],
                   preferred_element_type=jnp.float32))
    h = jnp.maximum(h + b2_ref[...], 0.0)
    y = jnp.dot(h.astype(jnp.bfloat16), w3_ref[...],
                preferred_element_type=jnp.float32)
    o_ref[...] = (y + b3_ref[...]).astype(o_ref.dtype)


def fused_head(flat0, flat1, params):
    b_sz, fc_size = flat0.shape
    w1, b1 = params["fc1"]
    wa, wb, b2 = params["out1"]
    w3, b3 = params["out2"]
    out_dim = w3.shape[1]
    operands = (flat0, flat1, w1, b1, wa, wb, b2, w3, b3)
    flops = 2 * (2 * b_sz * fc_size * 256 + 2 * b_sz * 256 * 256
                 + b_sz * 256 * out_dim)
    bytes_accessed = (sum(a.size * a.dtype.itemsize for a in operands)
                      + b_sz * out_dim * 4)
    return pl.pallas_call(
        _head_kernel,
        out_shape=jax.ShapeDtypeStruct((b_sz, out_dim), jnp.float32),
        grid=(1,),
        in_specs=[pl.BlockSpec(a.shape, lambda i: (0, 0)) for a in operands],
        out_specs=pl.BlockSpec((b_sz, out_dim), lambda i: (0, 0)),
        compiler_params=pltpu.CompilerParams(
            dimension_semantics=("arbitrary",),
            vmem_limit_bytes=VMEM_LIMIT),
        cost_estimate=pl.CostEstimate(flops=flops, transcendentals=0,
                                      bytes_accessed=bytes_accessed),
    )(*operands)


# ----------------------------------------------------------------------------
# Host-side glue: im2col for a 3x3 / pad=1 conv (pure static slicing)
# ----------------------------------------------------------------------------
def im2col_3x3(x_nhwc, stride):
    """x: (N, H, W, C) -> ((N*Ho*Wo, 9*C), Ho, Wo); K order = (kh, kw, c)."""
    N, H, W, C = x_nhwc.shape
    xp = jnp.pad(x_nhwc, ((0, 0), (1, 1), (1, 1), (0, 0)))
    Ho = (H + 2 - 3) // stride + 1
    Wo = (W + 2 - 3) // stride + 1
    cols = []
    for kh in range(3):
        for kw in range(3):
            cols.append(xp[:, kh:kh + (Ho - 1) * stride + 1:stride,
                              kw:kw + (Wo - 1) * stride + 1:stride, :])
    patches = jnp.concatenate(cols, axis=-1)          # (N, Ho, Wo, 9*C)
    return patches.reshape(N * Ho * Wo, 9 * C), Ho, Wo


# ----------------------------------------------------------------------------
# Parameters (xavier_uniform weights, zero biases, eval-mode BN folded)
# ----------------------------------------------------------------------------
def xavier_uniform(key, shape, fan_in, fan_out):
    bound = (6.0 / (fan_in + fan_out)) ** 0.5
    return jax.random.uniform(key, shape, jnp.float32, -bound, bound)


def make_params(key, in_channels, h, w, out_dim):
    fc_size = 128 * (h // 32) * (w // 32)
    chans = [in_channels] + [c for c, _ in CONV_CFG]
    keys = jax.random.split(key, len(CONV_CFG) + 3)

    conv = []
    for i, (cout, _) in enumerate(CONV_CFG):
        cin = chans[i]
        # weight laid out (kh, kw, cin, cout) to match the im2col K ordering.
        wgt = xavier_uniform(keys[i], (3, 3, cin, cout), cin * 9, cout * 9)
        bias = jnp.zeros((cout,), jnp.float32)
        # Fold eval-mode BatchNorm (gamma=1, beta=0, mean=0, var=1, eps=1e-5).
        gamma = jnp.ones((cout,), jnp.float32)
        beta = jnp.zeros((cout,), jnp.float32)
        r_mean = jnp.zeros((cout,), jnp.float32)
        r_var = jnp.ones((cout,), jnp.float32)
        scale = gamma / jnp.sqrt(r_var + BN_EPS)
        w_fold = (wgt * scale).reshape(9 * cin, cout).astype(jnp.bfloat16)
        b_fold = ((bias - r_mean) * scale + beta).reshape(1, cout)
        conv.append((w_fold, b_fold.astype(jnp.float32)))

    # Linear layers stored as (in, out) == transposed PyTorch layout.
    fc1_w = xavier_uniform(keys[-3], (fc_size, 256), fc_size, 256)
    out1_w = xavier_uniform(keys[-2], (2 * 256, 256), 2 * 256, 256)
    out2_w = xavier_uniform(keys[-1], (256, out_dim), 256, out_dim)
    return dict(
        conv=conv,
        fc1=(fc1_w.astype(jnp.bfloat16), jnp.zeros((1, 256), jnp.float32)),
        out1=(out1_w[:256].astype(jnp.bfloat16),        # acts on f0
              out1_w[256:].astype(jnp.bfloat16),        # acts on f1
              jnp.zeros((1, 256), jnp.float32)),
        out2=(out2_w.astype(jnp.bfloat16), jnp.zeros((1, out_dim), jnp.float32)),
    )


# ----------------------------------------------------------------------------
# Forward pass
# ----------------------------------------------------------------------------
def features(x_nchw, params):
    """Shared conv tower.  x: (N, C, H, W) -> (N, fc_size) (bf16)."""
    n = x_nchw.shape[0]
    x = jnp.transpose(x_nchw, (0, 2, 3, 1)).astype(jnp.bfloat16)   # NHWC
    for (w_fold, b_fold), (cout, stride) in zip(params["conv"], CONV_CFG):
        cols, ho, wo = im2col_3x3(x, stride)
        y = fused_matmul(cols, w_fold, b_fold, relu=True, out_dtype=jnp.bfloat16)
        x = y.reshape(n, ho, wo, cout)
    # nn.Flatten on an NCHW tensor flattens in (C, H, W) order.
    return jnp.transpose(x, (0, 3, 1, 2)).reshape(n, -1)


def forward(x, params):
    """x: (B, 2, C, H, W) -> (B, out_dim)."""
    b = x.shape[0]
    # Siamese fusion: run the shared tower once on the stacked (2B, ...) batch.
    xs = jnp.concatenate([x[:, 0], x[:, 1]], axis=0)   # rows [x0 ; x1]
    flat = features(xs, params)                        # (2B, fc_size)
    return fused_head(flat[:b], flat[b:], params)      # (B, out_dim), f32


# ----------------------------------------------------------------------------
if __name__ == "__main__":
    B, C, H, W = 2, 4, 32, 32      # H, W must be multiples of 32 (module spec)
    OUT_DIM = 10

    key = jax.random.PRNGKey(0)
    k_param, k_input = jax.random.split(key)
    params = make_params(k_param, C, H, W, OUT_DIM)

    x = jax.random.normal(k_input, (B, 2, C, H, W), jnp.float32)

    y = jax.jit(forward)(x, params)
    y = jax.block_until_ready(y)
    assert y.shape == (B, OUT_DIM), y.shape
    assert bool(jnp.all(jnp.isfinite(y)))
    print("KERNEL_OK")
</pallas_src>

<mosaic_0001>
module attributes {stable_mosaic.version = 11 : i64} {
  func.func @_mm_bias_act_kernel(%arg0: i32, %arg1: memref<256x36xbf16, #tpu.memory_space<vmem>>, %arg2: memref<36x32xbf16, #tpu.memory_space<vmem>>, %arg3: memref<1x32xf32, #tpu.memory_space<vmem>>, %arg4: memref<256x32xbf16, #tpu.memory_space<vmem>>) attributes {dimension_semantics = [#tpu.dimension_semantics<parallel>], iteration_bounds = array<i64: 4>, scalar_prefetch = 0 : i64, scratch_operands = 0 : i64, tpu.core_type = #tpu.core_type<tc>, window_params = [{transform_indices = @transform_0, window_bounds = array<i64: 256, 36>}, {pipeline_mode = #tpu.pipeline_mode<synchronous>, transform_indices = @transform_1, window_bounds = array<i64: 36, 32>}, {pipeline_mode = #tpu.pipeline_mode<synchronous>, transform_indices = @transform_2, window_bounds = array<i64: 1, 32>}, {transform_indices = @transform_3, window_bounds = array<i64: 256, 32>}]} {
    %c0 = arith.constant 0 : index
    %c0_0 = arith.constant 0 : index
    %0 = vector.load %arg1[%c0, %c0_0] : memref<256x36xbf16, #tpu.memory_space<vmem>>, vector<256x36xbf16>
    %c0_1 = arith.constant 0 : index
    %c0_2 = arith.constant 0 : index
    %1 = vector.load %arg2[%c0_1, %c0_2] : memref<36x32xbf16, #tpu.memory_space<vmem>>, vector<36x32xbf16>
    %cst = arith.constant dense<0.000000e+00> : vector<256x32xf32>
    %2 = tpu.matmul %0, %1, %cst {dimension_numbers = #tpu.dot_dimension_numbers<[1], [0], [0], [1], [0, 0, 1, 1], [], []>} : vector<256x36xbf16>, vector<36x32xbf16>, vector<256x32xf32> -> vector<256x32xf32>
    %c0_3 = arith.constant 0 : index
    %c0_4 = arith.constant 0 : index
    %3 = vector.load %arg3[%c0_3, %c0_4] : memref<1x32xf32, #tpu.memory_space<vmem>>, vector<1x32xf32>
    %4 = vector.broadcast %3 : vector<1x32xf32> to vector<256x32xf32>
    %5 = arith.addf %2, %4 : vector<256x32xf32>
    %cst_5 = arith.constant 0.000000e+00 : f32
    %6 = vector.broadcast %cst_5 : f32 to vector<256x32xf32>
    %7 = arith.maximumf %5, %6 : vector<256x32xf32>
    %8 = arith.truncf %7 : vector<256x32xf32> to vector<256x32xbf16>
    %c0_6 = arith.constant 0 : index
    %c0_7 = arith.constant 0 : index
    %9 = vector.load %arg4[%c0_6, %c0_7] : memref<256x32xbf16, #tpu.memory_space<vmem>>, vector<256x32xbf16>
    tpu.vector_store %arg4[%c0_6, %c0_7], %8 {strides = array<i32>} : memref<256x32xbf16, #tpu.memory_space<vmem>>, vector<256x32xbf16>,
    return
  }
  func.func @transform_0(%arg0: i32) -> (i32, i32) {
    %c0_i32 = arith.constant 0 : i32
    %c0_i32_0 = arith.constant 0 : i32
    return %arg0, %c0_i32 : i32, i32
  }
  func.func @transform_1(%arg0: i32) -> (i32, i32) {
    %c0_i32 = arith.constant 0 : i32
    %c0_i32_0 = arith.constant 0 : i32
    %c0_i32_1 = arith.constant 0 : i32
    return %c0_i32, %c0_i32_0 : i32, i32
  }
  func.func @transform_2(%arg0: i32) -> (i32, i32) {
    %c0_i32 = arith.constant 0 : i32
    %c0_i32_0 = arith.constant 0 : i32
    %c0_i32_1 = arith.constant 0 : i32
    return %c0_i32, %c0_i32_0 : i32, i32
  }
  func.func @transform_3(%arg0: i32) -> (i32, i32) {
    %c0_i32 = arith.constant 0 : i32
    %c0_i32_0 = arith.constant 0 : i32
    return %arg0, %c0_i32 : i32, i32
  }
}

module attributes {stable_mosaic.version = 11 : i64} {
  func.func @_mm_bias_act_kernel(%arg0: i32, %arg1: memref<256x288xbf16, #tpu.memory_space<vmem>>, %arg2: memref<288x64xbf16, #tpu.memory_space<vmem>>, %arg3: memref<1x64xf32, #tpu.memory_space<vmem>>, %arg4: memref<256x64xbf16, #tpu.memory_space<vmem>>) attributes {dimension_semantics = [#tpu.dimension_semantics<parallel>], iteration_bounds = array<i64: 1>, scalar_prefetch = 0 : i64, scratch_operands = 0 : i64, tpu.core_type = #tpu.core_type<tc>, window_params = [{transform_indices = @transform_0, window_bounds = array<i64: 256, 288>}, {pipeline_mode = #tpu.pipeline_mode<synchronous>, transform_indices = @transform_1, window_bounds = array<i64: 288, 64>}, {pipeline_mode = #tpu.pipeline_mode<synchronous>, transform_indices = @transform_2, window_bounds = array<i64: 1, 64>}, {transform_indices = @transform_3, window_bounds = array<i64: 256, 64>}]} {
    %c0 = arith.constant 0 : index
    %c0_0 = arith.constant 0 : index
    %0 = vector.load %arg1[%c0, %c0_0] : memref<256x288xbf16, #tpu.memory_space<vmem>>, vector<256x288xbf16>
    %c0_1 = arith.constant 0 : index
    %c0_2 = arith.constant 0 : index
    %1 = vector.load %arg2[%c0_1, %c0_2] : memref<288x64xbf16, #tpu.memory_space<vmem>>, vector<288x64xbf16>
    %cst = arith.constant dense<0.000000e+00> : vector<256x64xf32>
    %2 = tpu.matmul %0, %1, %cst {dimension_numbers = #tpu.dot_dimension_numbers<[1], [0], [0], [1], [0, 0, 1, 1], [], []>} : vector<256x288xbf16>, vector<288x64xbf16>, vector<256x64xf32> -> vector<256x64xf32>
    %c0_3 = arith.constant 0 : index
    %c0_4 = arith.constant 0 : index
    %3 = vector.load %arg3[%c0_3, %c0_4] : memref<1x64xf32, #tpu.memory_space<vmem>>, vector<1x64xf32>
    %4 = vector.broadcast %3 : vector<1x64xf32> to vector<256x64xf32>
    %5 = arith.addf %2, %4 : vector<256x64xf32>
    %cst_5 = arith.constant 0.000000e+00 : f32
    %6 = vector.broadcast %cst_5 : f32 to vector<256x64xf32>
    %7 = arith.maximumf %5, %6 : vector<256x64xf32>
    %8 = arith.truncf %7 : vector<256x64xf32> to vector<256x64xbf16>
    %c0_6 = arith.constant 0 : index
    %c0_7 = arith.constant 0 : index
    %9 = vector.load %arg4[%c0_6, %c0_7] : memref<256x64xbf16, #tpu.memory_space<vmem>>, vector<256x64xbf16>
    tpu.vector_store %arg4[%c0_6, %c0_7], %8 {strides = array<i32>} : memref<256x64xbf16, #tpu.memory_space<vmem>>, vector<256x64xbf16>,
    return
  }
  func.func @transform_0(%arg0: i32) -> (i32, i32) {
    %c0_i32 = arith.constant 0 : i32
    %c0_i32_0 = arith.constant 0 : i32
    return %arg0, %c0_i32 : i32, i32
  }
  func.func @transform_1(%arg0: i32) -> (i32, i32) {
    %c0_i32 = arith.constant 0 : i32
    %c0_i32_0 = arith.constant 0 : i32
    %c0_i32_1 = arith.constant 0 : i32
    return %c0_i32, %c0_i32_0 : i32, i32
  }
  func.func @transform_2(%arg0: i32) -> (i32, i32) {
    %c0_i32 = arith.constant 0 : i32
    %c0_i32_0 = arith.constant 0 : i32
    %c0_i32_1 = arith.constant 0 : i32
    return %c0_i32, %c0_i32_0 : i32, i32
  }
  func.func @transform_3(%arg0: i32) -> (i32, i32) {
    %c0_i32 = arith.constant 0 : i32
    %c0_i32_0 = arith.constant 0 : i32
    return %arg0, %c0_i32 : i32, i32
  }
}

module attributes {stable_mosaic.version = 11 : i64} {
  func.func @_mm_bias_act_kernel(%arg0: i32, %arg1: memref<256x576xbf16, #tpu.memory_space<vmem>>, %arg2: memref<576x64xbf16, #tpu.memory_space<vmem>>, %arg3: memref<1x64xf32, #tpu.memory_space<vmem>>, %arg4: memref<256x64xbf16, #tpu.memory_space<vmem>>) attributes {dimension_semantics = [#tpu.dimension_semantics<parallel>], iteration_bounds = array<i64: 1>, scalar_prefetch = 0 : i64, scratch_operands = 0 : i64, tpu.core_type = #tpu.core_type<tc>, window_params = [{transform_indices = @transform_0, window_bounds = array<i64: 256, 576>}, {pipeline_mode = #tpu.pipeline_mode<synchronous>, transform_indices = @transform_1, window_bounds = array<i64: 576, 64>}, {pipeline_mode = #tpu.pipeline_mode<synchronous>, transform_indices = @transform_2, window_bounds = array<i64: 1, 64>}, {transform_indices = @transform_3, window_bounds = array<i64: 256, 64>}]} {
    %c0 = arith.constant 0 : index
    %c0_0 = arith.constant 0 : index
    %0 = vector.load %arg1[%c0, %c0_0] : memref<256x576xbf16, #tpu.memory_space<vmem>>, vector<256x576xbf16>
    %c0_1 = arith.constant 0 : index
    %c0_2 = arith.constant 0 : index
    %1 = vector.load %arg2[%c0_1, %c0_2] : memref<576x64xbf16, #tpu.memory_space<vmem>>, vector<576x64xbf16>
    %cst = arith.constant dense<0.000000e+00> : vector<256x64xf32>
    %2 = tpu.matmul %0, %1, %cst {dimension_numbers = #tpu.dot_dimension_numbers<[1], [0], [0], [1], [0, 0, 1, 1], [], []>} : vector<256x576xbf16>, vector<576x64xbf16>, vector<256x64xf32> -> vector<256x64xf32>
    %c0_3 = arith.constant 0 : index
    %c0_4 = arith.constant 0 : index
    %3 = vector.load %arg3[%c0_3, %c0_4] : memref<1x64xf32, #tpu.memory_space<vmem>>, vector<1x64xf32>
    %4 = vector.broadcast %3 : vector<1x64xf32> to vector<256x64xf32>
    %5 = arith.addf %2, %4 : vector<256x64xf32>
    %cst_5 = arith.constant 0.000000e+00 : f32
    %6 = vector.broadcast %cst_5 : f32 to vector<256x64xf32>
    %7 = arith.maximumf %5, %6 : vector<256x64xf32>
    %8 = arith.truncf %7 : vector<256x64xf32> to vector<256x64xbf16>
    %c0_6 = arith.constant 0 : index
    %c0_7 = arith.constant 0 : index
    %9 = vector.load %arg4[%c0_6, %c0_7] : memref<256x64xbf16, #tpu.memory_space<vmem>>, vector<256x64xbf16>
    tpu.vector_store %arg4[%c0_6, %c0_7], %8 {strides = array<i32>} : memref<256x64xbf16, #tpu.memory_space<vmem>>, vector<256x64xbf16>,
    return
  }
  func.func @transform_0(%arg0: i32) -> (i32, i32) {
    %c0_i32 = arith.constant 0 : i32
    %c0_i32_0 = arith.constant 0 : i32
    return %arg0, %c0_i32 : i32, i32
  }
  func.func @transform_1(%arg0: i32) -> (i32, i32) {
    %c0_i32 = arith.constant 0 : i32
    %c0_i32_0 = arith.constant 0 : i32
    %c0_i32_1 = arith.constant 0 : i32
    return %c0_i32, %c0_i32_0 : i32, i32
  }
  func.func @transform_2(%arg0: i32) -> (i32, i32) {
    %c0_i32 = arith.constant 0 : i32
    %c0_i32_0 = arith.constant 0 : i32
    %c0_i32_1 = arith.constant 0 : i32
    return %c0_i32, %c0_i32_0 : i32, i32
  }
  func.func @transform_3(%arg0: i32) -> (i32, i32) {
    %c0_i32 = arith.constant 0 : i32
    %c0_i32_0 = arith.constant 0 : i32
    return %arg0, %c0_i32 : i32, i32
  }
}

module attributes {stable_mosaic.version = 11 : i64} {
  func.func @_mm_bias_act_kernel(%arg0: i32, %arg1: memref<64x576xbf16, #tpu.memory_space<vmem>>, %arg2: memref<576x64xbf16, #tpu.memory_space<vmem>>, %arg3: memref<1x64xf32, #tpu.memory_space<vmem>>, %arg4: memref<64x64xbf16, #tpu.memory_space<vmem>>) attributes {dimension_semantics = [#tpu.dimension_semantics<parallel>], iteration_bounds = array<i64: 1>, scalar_prefetch = 0 : i64, scratch_operands = 0 : i64, tpu.core_type = #tpu.core_type<tc>, window_params = [{transform_indices = @transform_0, window_bounds = array<i64: 64, 576>}, {pipeline_mode = #tpu.pipeline_mode<synchronous>, transform_indices = @transform_1, window_bounds = array<i64: 576, 64>}, {pipeline_mode = #tpu.pipeline_mode<synchronous>, transform_indices = @transform_2, window_bounds = array<i64: 1, 64>}, {transform_indices = @transform_3, window_bounds = array<i64: 64, 64>}]} {
    %c0 = arith.constant 0 : index
    %c0_0 = arith.constant 0 : index
    %0 = vector.load %arg1[%c0, %c0_0] : memref<64x576xbf16, #tpu.memory_space<vmem>>, vector<64x576xbf16>
    %c0_1 = arith.constant 0 : index
    %c0_2 = arith.constant 0 : index
    %1 = vector.load %arg2[%c0_1, %c0_2] : memref<576x64xbf16, #tpu.memory_space<vmem>>, vector<576x64xbf16>
    %cst = arith.constant dense<0.000000e+00> : vector<64x64xf32>
    %2 = tpu.matmul %0, %1, %cst {dimension_numbers = #tpu.dot_dimension_numbers<[1], [0], [0], [1], [0, 0, 1, 1], [], []>} : vector<64x576xbf16>, vector<576x64xbf16>, vector<64x64xf32> -> vector<64x64xf32>
    %c0_3 = arith.constant 0 : index
    %c0_4 = arith.constant 0 : index
    %3 = vector.load %arg3[%c0_3, %c0_4] : memref<1x64xf32, #tpu.memory_space<vmem>>, vector<1x64xf32>
    %4 = vector.broadcast %3 : vector<1x64xf32> to vector<64x64xf32>
    %5 = arith.addf %2, %4 : vector<64x64xf32>
    %cst_5 = arith.constant 0.000000e+00 : f32
    %6 = vector.broadcast %cst_5 : f32 to vector<64x64xf32>
    %7 = arith.maximumf %5, %6 : vector<64x64xf32>
    %8 = arith.truncf %7 : vector<64x64xf32> to vector<64x64xbf16>
    %c0_6 = arith.constant 0 : index
    %c0_7 = arith.constant 0 : index
    %9 = vector.load %arg4[%c0_6, %c0_7] : memref<64x64xbf16, #tpu.memory_space<vmem>>, vector<64x64xbf16>
    tpu.vector_store %arg4[%c0_6, %c0_7], %8 {strides = array<i32>} : memref<64x64xbf16, #tpu.memory_space<vmem>>, vector<64x64xbf16>,
    return
  }
  func.func @transform_0(%arg0: i32) -> (i32, i32) {
    %c0_i32 = arith.constant 0 : i32
    %c0_i32_0 = arith.constant 0 : i32
    return %arg0, %c0_i32 : i32, i32
  }
  func.func @transform_1(%arg0: i32) -> (i32, i32) {
    %c0_i32 = arith.constant 0 : i32
    %c0_i32_0 = arith.constant 0 : i32
    %c0_i32_1 = arith.constant 0 : i32
    return %c0_i32, %c0_i32_0 : i32, i32
  }
  func.func @transform_2(%arg0: i32) -> (i32, i32) {
    %c0_i32 = arith.constant 0 : i32
    %c0_i32_0 = arith.constant 0 : i32
    %c0_i32_1 = arith.constant 0 : i32
    return %c0_i32, %c0_i32_0 : i32, i32
  }
  func.func @transform_3(%arg0: i32) -> (i32, i32) {
    %c0_i32 = arith.constant 0 : i32
    %c0_i32_0 = arith.constant 0 : i32
    return %arg0, %c0_i32 : i32, i32
  }
}

module attributes {stable_mosaic.version = 11 : i64} {
  func.func @_mm_bias_act_kernel(%arg0: i32, %arg1: memref<64x576xbf16, #tpu.memory_space<vmem>>, %arg2: memref<576x128xbf16, #tpu.memory_space<vmem>>, %arg3: memref<1x128xf32, #tpu.memory_space<vmem>>, %arg4: memref<64x128xbf16, #tpu.memory_space<vmem>>) attributes {dimension_semantics = [#tpu.dimension_semantics<parallel>], iteration_bounds = array<i64: 1>, scalar_prefetch = 0 : i64, scratch_operands = 0 : i64, tpu.core_type = #tpu.core_type<tc>, window_params = [{transform_indices = @transform_0, window_bounds = array<i64: 64, 576>}, {pipeline_mode = #tpu.pipeline_mode<synchronous>, transform_indices = @transform_1, window_bounds = array<i64: 576, 128>}, {pipeline_mode = #tpu.pipeline_mode<synchronous>, transform_indices = @transform_2, window_bounds = array<i64: 1, 128>}, {transform_indices = @transform_3, window_bounds = array<i64: 64, 128>}]} {
    %c0 = arith.constant 0 : index
    %c0_0 = arith.constant 0 : index
    %0 = vector.load %arg1[%c0, %c0_0] : memref<64x576xbf16, #tpu.memory_space<vmem>>, vector<64x576xbf16>
    %c0_1 = arith.constant 0 : index
    %c0_2 = arith.constant 0 : index
    %1 = vector.load %arg2[%c0_1, %c0_2] : memref<576x128xbf16, #tpu.memory_space<vmem>>, vector<576x128xbf16>
    %cst = arith.constant dense<0.000000e+00> : vector<64x128xf32>
    %2 = tpu.matmul %0, %1, %cst {dimension_numbers = #tpu.dot_dimension_numbers<[1], [0], [0], [1], [0, 0, 1, 1], [], []>} : vector<64x576xbf16>, vector<576x128xbf16>, vector<64x128xf32> -> vector<64x128xf32>
    %c0_3 = arith.constant 0 : index
    %c0_4 = arith.constant 0 : index
    %3 = vector.load %arg3[%c0_3, %c0_4] : memref<1x128xf32, #tpu.memory_space<vmem>>, vector<1x128xf32>
    %4 = vector.broadcast %3 : vector<1x128xf32> to vector<64x128xf32>
    %5 = arith.addf %2, %4 : vector<64x128xf32>
    %cst_5 = arith.constant 0.000000e+00 : f32
    %6 = vector.broadcast %cst_5 : f32 to vector<64x128xf32>
    %7 = arith.maximumf %5, %6 : vector<64x128xf32>
    %8 = arith.truncf %7 : vector<64x128xf32> to vector<64x128xbf16>
    %c0_6 = arith.constant 0 : index
    %c0_7 = arith.constant 0 : index
    %9 = vector.load %arg4[%c0_6, %c0_7] : memref<64x128xbf16, #tpu.memory_space<vmem>>, vector<64x128xbf16>
    tpu.vector_store %arg4[%c0_6, %c0_7], %8 {strides = array<i32>} : memref<64x128xbf16, #tpu.memory_space<vmem>>, vector<64x128xbf16>,
    return
  }
  func.func @transform_0(%arg0: i32) -> (i32, i32) {
    %c0_i32 = arith.constant 0 : i32
    %c0_i32_0 = arith.constant 0 : i32
    return %arg0, %c0_i32 : i32, i32
  }
  func.func @transform_1(%arg0: i32) -> (i32, i32) {
    %c0_i32 = arith.constant 0 : i32
    %c0_i32_0 = arith.constant 0 : i32
    %c0_i32_1 = arith.constant 0 : i32
    return %c0_i32, %c0_i32_0 : i32, i32
  }
  func.func @transform_2(%arg0: i32) -> (i32, i32) {
    %c0_i32 = arith.constant 0 : i32
    %c0_i32_0 = arith.constant 0 : i32
    %c0_i32_1 = arith.constant 0 : i32
    return %c0_i32, %c0_i32_0 : i32, i32
  }
  func.func @transform_3(%arg0: i32) -> (i32, i32) {
    %c0_i32 = arith.constant 0 : i32
    %c0_i32_0 = arith.constant 0 : i32
    return %arg0, %c0_i32 : i32, i32
  }
}

module attributes {stable_mosaic.version = 11 : i64} {
  func.func @_mm_bias_act_kernel(%arg0: i32, %arg1: memref<16x1152xbf16, #tpu.memory_space<vmem>>, %arg2: memref<1152x128xbf16, #tpu.memory_space<vmem>>, %arg3: memref<1x128xf32, #tpu.memory_space<vmem>>, %arg4: memref<16x128xbf16, #tpu.memory_space<vmem>>) attributes {dimension_semantics = [#tpu.dimension_semantics<parallel>], iteration_bounds = array<i64: 1>, scalar_prefetch = 0 : i64, scratch_operands = 0 : i64, tpu.core_type = #tpu.core_type<tc>, window_params = [{transform_indices = @transform_0, window_bounds = array<i64: 16, 1152>}, {pipeline_mode = #tpu.pipeline_mode<synchronous>, transform_indices = @transform_1, window_bounds = array<i64: 1152, 128>}, {pipeline_mode = #tpu.pipeline_mode<synchronous>, transform_indices = @transform_2, window_bounds = array<i64: 1, 128>}, {transform_indices = @transform_3, window_bounds = array<i64: 16, 128>}]} {
    %c0 = arith.constant 0 : index
    %c0_0 = arith.constant 0 : index
    %0 = vector.load %arg1[%c0, %c0_0] : memref<16x1152xbf16, #tpu.memory_space<vmem>>, vector<16x1152xbf16>
    %c0_1 = arith.constant 0 : index
    %c0_2 = arith.constant 0 : index
    %1 = vector.load %arg2[%c0_1, %c0_2] : memref<1152x128xbf16, #tpu.memory_space<vmem>>, vector<1152x128xbf16>
    %cst = arith.constant dense<0.000000e+00> : vector<16x128xf32>
    %2 = tpu.matmul %0, %1, %cst {dimension_numbers = #tpu.dot_dimension_numbers<[1], [0], [0], [1], [0, 0, 1, 1], [], []>} : vector<16x1152xbf16>, vector<1152x128xbf16>, vector<16x128xf32> -> vector<16x128xf32>
    %c0_3 = arith.constant 0 : index
    %c0_4 = arith.constant 0 : index
    %3 = vector.load %arg3[%c0_3, %c0_4] : memref<1x128xf32, #tpu.memory_space<vmem>>, vector<1x128xf32>
    %4 = vector.broadcast %3 : vector<1x128xf32> to vector<16x128xf32>
    %5 = arith.addf %2, %4 : vector<16x128xf32>
    %cst_5 = arith.constant 0.000000e+00 : f32
    %6 = vector.broadcast %cst_5 : f32 to vector<16x128xf32>
    %7 = arith.maximumf %5, %6 : vector<16x128xf32>
    %8 = arith.truncf %7 : vector<16x128xf32> to vector<16x128xbf16>
    %c0_6 = arith.constant 0 : index
    %c0_7 = arith.constant 0 : index
    %9 = vector.load %arg4[%c0_6, %c0_7] : memref<16x128xbf16, #tpu.memory_space<vmem>>, vector<16x128xbf16>
    tpu.vector_store %arg4[%c0_6, %c0_7], %8 {strides = array<i32>} : memref<16x128xbf16, #tpu.memory_space<vmem>>, vector<16x128xbf16>,
    return
  }
  func.func @transform_0(%arg0: i32) -> (i32, i32) {
    %c0_i32 = arith.constant 0 : i32
    %c0_i32_0 = arith.constant 0 : i32
    return %arg0, %c0_i32 : i32, i32
  }
  func.func @transform_1(%arg0: i32) -> (i32, i32) {
    %c0_i32 = arith.constant 0 : i32
    %c0_i32_0 = arith.constant 0 : i32
    %c0_i32_1 = arith.constant 0 : i32
    return %c0_i32, %c0_i32_0 : i32, i32
  }
  func.func @transform_2(%arg0: i32) -> (i32, i32) {
    %c0_i32 = arith.constant 0 : i32
    %c0_i32_0 = arith.constant 0 : i32
    %c0_i32_1 = arith.constant 0 : i32
    return %c0_i32, %c0_i32_0 : i32, i32
  }
  func.func @transform_3(%arg0: i32) -> (i32, i32) {
    %c0_i32 = arith.constant 0 : i32
    %c0_i32_0 = arith.constant 0 : i32
    return %arg0, %c0_i32 : i32, i32
  }
}

module attributes {stable_mosaic.version = 11 : i64} {
  func.func @_head_kernel(%arg0: i32, %arg1: memref<2x128xbf16, #tpu.memory_space<vmem>>, %arg2: memref<2x128xbf16, #tpu.memory_space<vmem>>, %arg3: memref<128x256xbf16, #tpu.memory_space<vmem>>, %arg4: memref<1x256xf32, #tpu.memory_space<vmem>>, %arg5: memref<256x256xbf16, #tpu.memory_space<vmem>>, %arg6: memref<256x256xbf16, #tpu.memory_space<vmem>>, %arg7: memref<1x256xf32, #tpu.memory_space<vmem>>, %arg8: memref<256x10xbf16, #tpu.memory_space<vmem>>, %arg9: memref<1x10xf32, #tpu.memory_space<vmem>>, %arg10: memref<2x10xf32, #tpu.memory_space<vmem>>) attributes {dimension_semantics = [#tpu.dimension_semantics<arbitrary>], iteration_bounds = array<i64: 1>, scalar_prefetch = 0 : i64, scratch_operands = 0 : i64, tpu.core_type = #tpu.core_type<tc>, window_params = [{pipeline_mode = #tpu.pipeline_mode<synchronous>, transform_indices = @transform_0, window_bounds = array<i64: 2, 128>}, {pipeline_mode = #tpu.pipeline_mode<synchronous>, transform_indices = @transform_1, window_bounds = array<i64: 2, 128>}, {pipeline_mode = #tpu.pipeline_mode<synchronous>, transform_indices = @transform_2, window_bounds = array<i64: 128, 256>}, {pipeline_mode = #tpu.pipeline_mode<synchronous>, transform_indices = @transform_3, window_bounds = array<i64: 1, 256>}, {pipeline_mode = #tpu.pipeline_mode<synchronous>, transform_indices = @transform_4, window_bounds = array<i64: 256, 256>}, {pipeline_mode = #tpu.pipeline_mode<synchronous>, transform_indices = @transform_5, window_bounds = array<i64: 256, 256>}, {pipeline_mode = #tpu.pipeline_mode<synchronous>, transform_indices = @transform_6, window_bounds = array<i64: 1, 256>}, {pipeline_mode = #tpu.pipeline_mode<synchronous>, transform_indices = @transform_7, window_bounds = array<i64: 256, 10>}, {pipeline_mode = #tpu.pipeline_mode<synchronous>, transform_indices = @transform_8, window_bounds = array<i64: 1, 10>}, {pipeline_mode = #tpu.pipeline_mode<synchronous>, transform_indices = @transform_9, window_bounds = array<i64: 2, 10>}]} {
    %c0 = arith.constant 0 : index
    %c0_0 = arith.constant 0 : index
    %0 = vector.load %arg1[%c0, %c0_0] : memref<2x128xbf16, #tpu.memory_space<vmem>>, vector<2x128xbf16>
    %c0_1 = arith.constant 0 : index
    %c0_2 = arith.constant 0 : index
    %1 = vector.load %arg3[%c0_1, %c0_2] : memref<128x256xbf16, #tpu.memory_space<vmem>>, vector<128x256xbf16>
    %cst = arith.constant dense<0.000000e+00> : vector<2x256xf32>
    %2 = tpu.matmul %0, %1, %cst {dimension_numbers = #tpu.dot_dimension_numbers<[1], [0], [0], [1], [0, 0, 1, 1], [], []>} : vector<2x128xbf16>, vector<128x256xbf16>, vector<2x256xf32> -> vector<2x256xf32>
    %c0_3 = arith.constant 0 : index
    %c0_4 = arith.constant 0 : index
    %3 = vector.load %arg4[%c0_3, %c0_4] : memref<1x256xf32, #tpu.memory_space<vmem>>, vector<1x256xf32>
    %4 = vector.broadcast %3 : vector<1x256xf32> to vector<2x256xf32>
    %5 = arith.addf %2, %4 : vector<2x256xf32>
    %cst_5 = arith.constant 0.000000e+00 : f32
    %6 = vector.broadcast %cst_5 : f32 to vector<2x256xf32>
    %7 = arith.maximumf %5, %6 : vector<2x256xf32>
    %c0_6 = arith.constant 0 : index
    %c0_7 = arith.constant 0 : index
    %8 = vector.load %arg2[%c0_6, %c0_7] : memref<2x128xbf16, #tpu.memory_space<vmem>>, vector<2x128xbf16>
    %c0_8 = arith.constant 0 : index
    %c0_9 = arith.constant 0 : index
    %9 = vector.load %arg3[%c0_8, %c0_9] : memref<128x256xbf16, #tpu.memory_space<vmem>>, vector<128x256xbf16>
    %cst_10 = arith.constant dense<0.000000e+00> : vector<2x256xf32>
    %10 = tpu.matmul %8, %9, %cst_10 {dimension_numbers = #tpu.dot_dimension_numbers<[1], [0], [0], [1], [0, 0, 1, 1], [], []>} : vector<2x128xbf16>, vector<128x256xbf16>, vector<2x256xf32> -> vector<2x256xf32>
    %c0_11 = arith.constant 0 : index
    %c0_12 = arith.constant 0 : index
    %11 = vector.load %arg4[%c0_11, %c0_12] : memref<1x256xf32, #tpu.memory_space<vmem>>, vector<1x256xf32>
    %12 = vector.broadcast %11 : vector<1x256xf32> to vector<2x256xf32>
    %13 = arith.addf %10, %12 : vector<2x256xf32>
    %cst_13 = arith.constant 0.000000e+00 : f32
    %14 = vector.broadcast %cst_13 : f32 to vector<2x256xf32>
    %15 = arith.maximumf %13, %14 : vector<2x256xf32>
    %16 = arith.truncf %7 : vector<2x256xf32> to vector<2x256xbf16>
    %c0_14 = arith.constant 0 : index
    %c0_15 = arith.constant 0 : index
    %17 = vector.load %arg5[%c0_14, %c0_15] : memref<256x256xbf16, #tpu.memory_space<vmem>>, vector<256x256xbf16>
    %cst_16 = arith.constant dense<0.000000e+00> : vector<2x256xf32>
    %18 = tpu.matmul %16, %17, %cst_16 {dimension_numbers = #tpu.dot_dimension_numbers<[1], [0], [0], [1], [0, 0, 1, 1], [], []>} : vector<2x256xbf16>, vector<256x256xbf16>, vector<2x256xf32> -> vector<2x256xf32>
    %19 = arith.truncf %15 : vector<2x256xf32> to vector<2x256xbf16>
    %c0_17 = arith.constant 0 : index
    %c0_18 = arith.constant 0 : index
    %20 = vector.load %arg6[%c0_17, %c0_18] : memref<256x256xbf16, #tpu.memory_space<vmem>>, vector<256x256xbf16>
    %cst_19 = arith.constant dense<0.000000e+00> : vector<2x256xf32>
    %21 = tpu.matmul %19, %20, %cst_19 {dimension_numbers = #tpu.dot_dimension_numbers<[1], [0], [0], [1], [0, 0, 1, 1], [], []>} : vector<2x256xbf16>, vector<256x256xbf16>, vector<2x256xf32> -> vector<2x256xf32>
    %22 = arith.addf %18, %21 : vector<2x256xf32>
    %c0_20 = arith.constant 0 : index
    %c0_21 = arith.constant 0 : index
    %23 = vector.load %arg7[%c0_20, %c0_21] : memref<1x256xf32, #tpu.memory_space<vmem>>, vector<1x256xf32>
    %24 = vector.broadcast %23 : vector<1x256xf32> to vector<2x256xf32>
    %25 = arith.addf %22, %24 : vector<2x256xf32>
    %cst_22 = arith.constant 0.000000e+00 : f32
    %26 = vector.broadcast %cst_22 : f32 to vector<2x256xf32>
    %27 = arith.maximumf %25, %26 : vector<2x256xf32>
    %28 = arith.truncf %27 : vector<2x256xf32> to vector<2x256xbf16>
    %c0_23 = arith.constant 0 : index
    %c0_24 = arith.constant 0 : index
    %29 = vector.load %arg8[%c0_23, %c0_24] : memref<256x10xbf16, #tpu.memory_space<vmem>>, vector<256x10xbf16>
    %cst_25 = arith.constant dense<0.000000e+00> : vector<2x10xf32>
    %30 = tpu.matmul %28, %29, %cst_25 {dimension_numbers = #tpu.dot_dimension_numbers<[1], [0], [0], [1], [0, 0, 1, 1], [], []>} : vector<2x256xbf16>, vector<256x10xbf16>, vector<2x10xf32> -> vector<2x10xf32>
    %c0_26 = arith.constant 0 : index
    %c0_27 = arith.constant 0 : index
    %31 = vector.load %arg9[%c0_26, %c0_27] : memref<1x10xf32, #tpu.memory_space<vmem>>, vector<1x10xf32>
    %32 = vector.broadcast %31 : vector<1x10xf32> to vector<2x10xf32>
    %33 = arith.addf %30, %32 : vector<2x10xf32>
    %c0_28 = arith.constant 0 : index
    %c0_29 = arith.constant 0 : index
    %34 = vector.load %arg10[%c0_28, %c0_29] : memref<2x10xf32, #tpu.memory_space<vmem>>, vector<2x10xf32>
    tpu.vector_store %arg10[%c0_28, %c0_29], %33 {strides = array<i32>} : memref<2x10xf32, #tpu.memory_space<vmem>>, vector<2x10xf32>,
    return
  }
  func.func @transform_0(%arg0: i32) -> (i32, i32) {
    %c0_i32 = arith.constant 0 : i32
    %c0_i32_0 = arith.constant 0 : i32
    %c0_i32_1 = arith.constant 0 : i32
    return %c0_i32, %c0_i32_0 : i32, i32
  }
  func.func @transform_1(%arg0: i32) -> (i32, i32) {
    %c0_i32 = arith.constant 0 : i32
    %c0_i32_0 = arith.constant 0 : i32
    %c0_i32_1 = arith.constant 0 : i32
    return %c0_i32, %c0_i32_0 : i32, i32
  }
  func.func @transform_2(%arg0: i32) -> (i32, i32) {
    %c0_i32 = arith.constant 0 : i32
    %c0_i32_0 = arith.constant 0 : i32
    %c0_i32_1 = arith.constant 0 : i32
    return %c0_i32, %c0_i32_0 : i32, i32
  }
  func.func @transform_3(%arg0: i32) -> (i32, i32) {
    %c0_i32 = arith.constant 0 : i32
    %c0_i32_0 = arith.constant 0 : i32
    %c0_i32_1 = arith.constant 0 : i32
    return %c0_i32, %c0_i32_0 : i32, i32
  }
  func.func @transform_4(%arg0: i32) -> (i32, i32) {
    %c0_i32 = arith.constant 0 : i32
    %c0_i32_0 = arith.constant 0 : i32
    %c0_i32_1 = arith.constant 0 : i32
    return %c0_i32, %c0_i32_0 : i32, i32
  }
  func.func @transform_5(%arg0: i32) -> (i32, i32) {
    %c0_i32 = arith.constant 0 : i32
    %c0_i32_0 = arith.constant 0 : i32
    %c0_i32_1 = arith.constant 0 : i32
    return %c0_i32, %c0_i32_0 : i32, i32
  }
  func.func @transform_6(%arg0: i32) -> (i32, i32) {
    %c0_i32 = arith.constant 0 : i32
    %c0_i32_0 = arith.constant 0 : i32
    %c0_i32_1 = arith.constant 0 : i32
    return %c0_i32, %c0_i32_0 : i32, i32
  }
  func.func @transform_7(%arg0: i32) -> (i32, i32) {
    %c0_i32 = arith.constant 0 : i32
    %c0_i32_0 = arith.constant 0 : i32
    %c0_i32_1 = arith.constant 0 : i32
    return %c0_i32, %c0_i32_0 : i32, i32
  }
  func.func @transform_8(%arg0: i32) -> (i32, i32) {
    %c0_i32 = arith.constant 0 : i32
    %c0_i32_0 = arith.constant 0 : i32
    %c0_i32_1 = arith.constant 0 : i32
    return %c0_i32, %c0_i32_0 : i32, i32
  }
  func.func @transform_9(%arg0: i32) -> (i32, i32) {
    %c0_i32 = arith.constant 0 : i32
    %c0_i32_0 = arith.constant 0 : i32
    %c0_i32_1 = arith.constant 0 : i32
    return %c0_i32, %c0_i32_0 : i32, i32
  }
}

module attributes {stable_mosaic.version = 11 : i64} {
  func.func @_mm_bias_act_kernel(%arg0: i32, %arg1: memref<4x1152xbf16, #tpu.memory_space<vmem>>, %arg2: memref<1152x128xbf16, #tpu.memory_space<vmem>>, %arg3: memref<1x128xf32, #tpu.memory_space<vmem>>, %arg4: memref<4x128xbf16, #tpu.memory_space<vmem>>) attributes {dimension_semantics = [#tpu.dimension_semantics<parallel>], iteration_bounds = array<i64: 1>, scalar_prefetch = 0 : i64, scratch_operands = 0 : i64, tpu.core_type = #tpu.core_type<tc>, window_params = [{transform_indices = @transform_0, window_bounds = array<i64: 4, 1152>}, {pipeline_mode = #tpu.pipeline_mode<synchronous>, transform_indices = @transform_1, window_bounds = array<i64: 1152, 128>}, {pipeline_mode = #tpu.pipeline_mode<synchronous>, transform_indices = @transform_2, window_bounds = array<i64: 1, 128>}, {transform_indices = @transform_3, window_bounds = array<i64: 4, 128>}]} {
    %c0 = arith.constant 0 : index
    %c0_0 = arith.constant 0 : index
    %0 = vector.load %arg1[%c0, %c0_0] : memref<4x1152xbf16, #tpu.memory_space<vmem>>, vector<4x1152xbf16>
    %c0_1 = arith.constant 0 : index
    %c0_2 = arith.constant 0 : index
    %1 = vector.load %arg2[%c0_1, %c0_2] : memref<1152x128xbf16, #tpu.memory_space<vmem>>, vector<1152x128xbf16>
    %cst = arith.constant dense<0.000000e+00> : vector<4x128xf32>
    %2 = tpu.matmul %0, %1, %cst {dimension_numbers = #tpu.dot_dimension_numbers<[1], [0], [0], [1], [0, 0, 1, 1], [], []>} : vector<4x1152xbf16>, vector<1152x128xbf16>, vector<4x128xf32> -> vector<4x128xf32>
    %c0_3 = arith.constant 0 : index
    %c0_4 = arith.constant 0 : index
    %3 = vector.load %arg3[%c0_3, %c0_4] : memref<1x128xf32, #tpu.memory_space<vmem>>, vector<1x128xf32>
    %4 = vector.broadcast %3 : vector<1x128xf32> to vector<4x128xf32>
    %5 = arith.addf %2, %4 : vector<4x128xf32>
    %cst_5 = arith.constant 0.000000e+00 : f32
    %6 = vector.broadcast %cst_5 : f32 to vector<4x128xf32>
    %7 = arith.maximumf %5, %6 : vector<4x128xf32>
    %8 = arith.truncf %7 : vector<4x128xf32> to vector<4x128xbf16>
    %c0_6 = arith.constant 0 : index
    %c0_7 = arith.constant 0 : index
    %9 = vector.load %arg4[%c0_6, %c0_7] : memref<4x128xbf16, #tpu.memory_space<vmem>>, vector<4x128xbf16>
    tpu.vector_store %arg4[%c0_6, %c0_7], %8 {strides = array<i32>} : memref<4x128xbf16, #tpu.memory_space<vmem>>, vector<4x128xbf16>,
    return
  }
  func.func @transform_0(%arg0: i32) -> (i32, i32) {
    %c0_i32 = arith.constant 0 : i32
    %c0_i32_0 = arith.constant 0 : i32
    return %arg0, %c0_i32 : i32, i32
  }
  func.func @transform_1(%arg0: i32) -> (i32, i32) {
    %c0_i32 = arith.constant 0 : i32
    %c0_i32_0 = arith.constant 0 : i32
    %c0_i32_1 = arith.constant 0 : i32
    return %c0_i32, %c0_i32_0 : i32, i32
  }
  func.func @transform_2(%arg0: i32) -> (i32, i32) {
    %c0_i32 = arith.constant 0 : i32
    %c0_i32_0 = arith.constant 0 : i32
    %c0_i32_1 = arith.constant 0 : i32
    return %c0_i32, %c0_i32_0 : i32, i32
  }
  func.func @transform_3(%arg0: i32) -> (i32, i32) {
    %c0_i32 = arith.constant 0 : i32
    %c0_i32_0 = arith.constant 0 : i32
    return %arg0, %c0_i32 : i32, i32
  }
}

</mosaic_0001>

<bundles_post_ra>
// kernel: forward.9
= control target key start
LH: loop header
LB: loop body
LE: loop exit
PB: predicated region body
PF: predicated region fallthrough
CT: control target
= control target key end

     0   :  { %s1008_s12 = smov 0   ;;  %s1178_s0 = inlined_call_operand.vmem [shape: bf16[1024,36], index: 0, kind: input, shape index: {}]   ;;  %s1179_s1 = inlined_call_operand.vmem [shape: bf16[36,32], index: 1, kind: input, shape index: {}]   ;;  %s1180_s2 = inlined_call_operand.vmem [shape: f32[1,32], index: 2, kind: input, shape index: {}]   ;;  %s1181_s3 = inlined_call_operand.vmem [shape: bf16[1024,32], index: 3, kind: output, shape index: {}]  }
   0x1 LB: > { %s777_s13 = sadd.s32 4294967295, %s986_s12   ;;  %p781_p0 = scmp.ge.s32.totalorder %s986_s12, 1  ;;  %s986_s12 = sphi %s1008_s12, %s13_s12  }
   0x2   : > { %p138_p1 = scmp.lt.s32.totalorder %s986_s12, 5 }
   0x4   : > { %p139_p2 = pnand %p781_p0, %p138_p1 }
   0x5   : > { %v961_v0 = vld [vmem:[%s1179_s1] sm:$0xff] (!%p139_p2)   ;;  %v962_v1 = vld [vmem:[%s1179_s1 + $0x8] sm:$0xff] (!%p139_p2)   ;;  %s782_s18 = sshll.u32 (!%p139_p2), %s777_s13, 5  ;;  %v963_v2 = vld [vmem:[%s1179_s1 + $0x10] ss:$0 sps:$4 sm:$0x33] (!%p139_p2)  }
   0x6   : > { %142 = sbr.rel (%p139_p2) target bundleno = 265 (0x109), region = 32  ;;  %907 = vmatprep.subr.bf16.mxu0 (!%p139_p2), %v961_v0  ;;  %945 = vmatprep.subr.bf16.mxu1 (!%p139_p2), %v961_v0  ;;  %p163_p3 = scmp.lt.s32.totalorder (!%p139_p2), %s782_s18, 127  ;;  %vm363_vm0 = vcmask (!%p139_p2), 1041408   ;;  %vm314_vm1 = vcmask (!%p139_p2), 293888   ;;  %v1070_v20 = vld [vmem:[%s1180_s2] ss:$0 sm:$0xff] (!%p139_p2) }
   0x7   : > { %908 = vmatpush3.bf16.msra.mxu0 (!%p139_p2), %v961_v0  ;;  %948 = vmatpush3.bf16.msra.mxu1 (!%p139_p2), %v961_v0  ;;  %v365_v3 = vsel (!%p139_p2), %vm363_vm0, %v963_v2, 0  ;;  %vm688_vm2 = vcmask (!%p139_p2), 257024  }
   0x8   : > { %909 = vmatprep.subr.bf16.mxu0 (!%p139_p2), %v962_v1  ;;  %946 = vmatprep.subr.bf16.mxu1 (!%p139_p2), %v962_v1 }
   0xb   : > { %910 = vmatpush3.bf16.msra.mxu0 (!%p139_p2), %v962_v1  ;;  %949 = vmatpush3.bf16.msra.mxu1 (!%p139_p2), %v962_v1 }
   0xc   : > { %951 = vmatprep.subr.msk.bf16.mxu0 (!%p139_p2), %vm363_vm0, %v963_v2  ;;  %952 = vmatprep.subr.msk.bf16.mxu1 (!%p139_p2), %vm363_vm0, %v963_v2 }
   0xd   : > { %s1183_s18 = smov (!%p163_p3, %s782_s18), 127 }
   0xe   : > { %s783_s21 = sshll.u32 %s1183_s18, 2 }
   0xf   : > { %s1033_s24 = scalar_lea.vmem %s1178_s0, %s783_s21  ;;  %912 = vmatpush3.bf16.msra.mxu0 %v365_v3  ;;  %950 = vmatpush3.bf16.msra.mxu1 %v365_v3  ;;  %s1083_s29 = scalar_lea.vmem %s1181_s3, %s783_s21 }
  0x10   : > { %v964_v4 = vld [vmem:[%s1033_s24] sm:$0xff]   ;;  %v966_v6 = vld [vmem:[%s1033_s24 + $0x8] sm:$0xff]   ;;  %v968_v8 = vld [vmem:[%s1033_s24 + $0x10] sm:$0xff]  }
  0x11   : > { %v965_v5 = vld [vmem:[%s1033_s24 + $0x40] sm:$0xff]   ;;  %913 = vmatprep.mubr.msk.bf16.mxu0 %vm314_vm1, %v964_v4  ;;  %v967_v7 = vld [vmem:[%s1033_s24 + $0x48] sm:$0xff]   ;;  %v969_v9 = vld [vmem:[%s1033_s24 + $0x50] sm:$0xff]  }
  0x12   : > { %929 = vmatprep.mubr.msk.bf16.mxu1 %vm314_vm1, %v965_v5  ;;  %914 = vmatmul.mubr.msk.bf16.vlgmr.msra.gmra.mrb[0].mxu0 %vm314_vm1, %v966_v6  ;;  %v970_v10 = vld [vmem:[%s1033_s24 + $0x18] sm:$0xff]   ;;  %v972_v12 = vld [vmem:[%s1033_s24 + $0x20] sm:$0xff]   ;;  %v974_v14 = vld [vmem:[%s1033_s24 + $0x28] sm:$0xff]  }
  0x13   : > { %930 = vmatmul.mubr.msk.bf16.vlgmr.msra.gmra.mrb[0].mxu1 %vm314_vm1, %v967_v7  ;;  %917 = vmatprep.mubr.msk.bf16.mxu0 %vm314_vm1, %v968_v8  ;;  %v971_v11 = vld [vmem:[%s1033_s24 + $0x58] sm:$0xff]   ;;  %v973_v13 = vld [vmem:[%s1033_s24 + $0x60] sm:$0xff]   ;;  %v975_v15 = vld [vmem:[%s1033_s24 + $0x68] sm:$0xff]  }
  0x14   : > { %933 = vmatprep.mubr.msk.bf16.mxu1 %vm314_vm1, %v969_v9  ;;  %v976_v16 = vld [vmem:[%s1033_s24 + $0x30] sm:$0xff]   ;;  %v978_v18 = vld [vmem:[%s1033_s24 + $0x38] sm:$0xff]  }
  0x15   : > { %v977_v17 = vld [vmem:[%s1033_s24 + $0x70] sm:$0xff]   ;;  %v979_v19 = vld [vmem:[%s1033_s24 + $0x78] sm:$0xff]  }
  0x1a   : > { %918 = vmatmul.mubr.msk.bf16.gmra.mrb[4].mxu0 %vm314_vm1, %v970_v10 }
  0x1b   : > { %934 = vmatmul.mubr.msk.bf16.gmra.mrb[4].mxu1 %vm314_vm1, %v971_v11  ;;  %921 = vmatprep.mubr.msk.bf16.mxu0 %vm314_vm1, %v972_v12 }
  0x1c   : > { %937 = vmatprep.mubr.msk.bf16.mxu1 %vm314_vm1, %v973_v13 }
  0x22   : > { %922 = vmatmul.mubr.msk.bf16.gmra.mrb[8].mxu0 %vm314_vm1, %v974_v14 }
  0x23   : > { %938 = vmatmul.mubr.msk.bf16.gmra.mrb[8].mxu1 %vm314_vm1, %v975_v15  ;;  %925 = vmatprep.mubr.msk.bf16.mxu0 %vm314_vm1, %v976_v16 }
  0x24   : > { %941 = vmatprep.mubr.msk.bf16.mxu1 %vm314_vm1, %v977_v17 }
  0x2a   : > { %926 = vmatmul.mubr.msk.bf16.gmra.mrb[12].mxu0 %vm314_vm1, %v978_v18 }
  0x2b   : > { %942 = vmatmul.mubr.msk.bf16.gmra.mrb[12].mxu1 %vm314_vm1, %v979_v19 }
  0xe5   : > { %v915_v21 = vpop.f32.mrb[0].mxu0 }
  0xe6   : > { %v931_v22 = vpop.f32.mrb[0].mxu1  ;;  %v410_v23 = vadd.f32 %v915_v21, %v1070_v20  ;;  %v401_v25 = vpop.f32.mrb[1].mxu0 }
  0xe7   : > { %v474_v24 = vadd.f32 %v931_v22, %v1070_v20  ;;  %v465_v26 = vpop.f32.mrb[1].mxu1  ;;  %v402_v27 = vadd.f32 %v1070_v20, %v401_v25  ;;  %v916_v29 = vpop.f32.mrb[2].mxu0 }
  0xe8   : > { %v466_v28 = vadd.f32 %v1070_v20, %v465_v26  ;;  %v932_v30 = vpop.f32.mrb[2].mxu1  ;;  %v530_v31 = vmax.f32 %v410_v23, 0.0  ;;  %v413_v33 = vadd.f32 %v916_v29, %v1070_v20  ;;  %v404_v35 = vpop.f32.mrb[3].mxu0 }
  0xe9   : > { %v546_v32 = vmax.f32 %v474_v24, 0.0  ;;  %v477_v34 = vadd.f32 %v932_v30, %v1070_v20  ;;  %v468_v36 = vpop.f32.mrb[3].mxu1  ;;  %v528_v37 = vmax.f32 %v402_v27, 0.0  ;;  %v405_v39 = vadd.f32 %v1070_v20, %v404_v35 }
  0xea   : > { %v544_v38 = vmax.f32 %v466_v28, 0.0  ;;  %v469_v40 = vadd.f32 %v1070_v20, %v468_v36  ;;  %v858_v41 = vpack.c.bf16 %v530_v31, %v530_v31  ;;  %v531_v43 = vmax.f32 %v413_v33, 0.0 }
  0xeb   : > { %v874_v42 = vpack.c.bf16 %v546_v32, %v546_v32  ;;  %v547_v44 = vmax.f32 %v477_v34, 0.0  ;;  %v856_v45 = vpack.c.bf16 %v528_v37, %v528_v37  ;;  %v529_v47 = vmax.f32 %v405_v39, 0.0 }
  0xec   : > { %v872_v46 = vpack.c.bf16 %v544_v38, %v544_v38  ;;  %v545_v48 = vmax.f32 %v469_v40, 0.0  ;;  %691 = vst.msk [vmem:[%s1083_s29 + $0x8] sm:$0xf] %vm688_vm2, %v858_v41  ;;  %v859_v49 = vpack.c.bf16 %v531_v43, %v531_v43 }
  0xed   : > { %707 = vst.msk [vmem:[%s1083_s29 + $0x48] sm:$0xf] %vm688_vm2, %v874_v42  ;;  %v875_v50 = vpack.c.bf16 %v547_v44, %v547_v44  ;;  %689 = vst.msk [vmem:[%s1083_s29] sm:$0xf] %vm688_vm2, %v856_v45  ;;  %v857_v51 = vpack.c.bf16 %v529_v47, %v529_v47  ;;  %v919_v53 = vpop.f32.mrb[4].mxu0 }
  0xee   : > { %705 = vst.msk [vmem:[%s1083_s29 + $0x40] sm:$0xf] %vm688_vm2, %v872_v46  ;;  %v873_v52 = vpack.c.bf16 %v545_v48, %v545_v48  ;;  %v935_v54 = vpop.f32.mrb[4].mxu1  ;;  %692 = vst.msk [vmem:[%s1083_s29 + $0xc] sm:$0xf] %vm688_vm2, %v859_v49  ;;  %v426_v55 = vadd.f32 %v919_v53, %v1070_v20  ;;  %v417_v57 = vpop.f32.mrb[5].mxu0 }
  0xef   : > { %708 = vst.msk [vmem:[%s1083_s29 + $0x4c] sm:$0xf] %vm688_vm2, %v875_v50  ;;  %v490_v56 = vadd.f32 %v935_v54, %v1070_v20  ;;  %v481_v58 = vpop.f32.mrb[5].mxu1  ;;  %690 = vst.msk [vmem:[%s1083_s29 + $0x4] sm:$0xf] %vm688_vm2, %v857_v51  ;;  %v418_v59 = vadd.f32 %v1070_v20, %v417_v57  ;;  %v920_v61 = vpop.f32.mrb[6].mxu0 }
  0xf0   : > { %706 = vst.msk [vmem:[%s1083_s29 + $0x44] sm:$0xf] %vm688_vm2, %v873_v52  ;;  %v482_v60 = vadd.f32 %v1070_v20, %v481_v58  ;;  %v936_v62 = vpop.f32.mrb[6].mxu1  ;;  %v534_v63 = vmax.f32 %v426_v55, 0.0  ;;  %v429_v1 = vadd.f32 %v920_v61, %v1070_v20  ;;  %v420_v3 = vpop.f32.mrb[7].mxu0 }
  0xf1   : > { %v550_v0 = vmax.f32 %v490_v56, 0.0  ;;  %v493_v2 = vadd.f32 %v936_v62, %v1070_v20  ;;  %v484_v4 = vpop.f32.mrb[7].mxu1  ;;  %v532_v5 = vmax.f32 %v418_v59, 0.0  ;;  %v421_v7 = vadd.f32 %v1070_v20, %v420_v3 }
  0xf2   : > { %v548_v6 = vmax.f32 %v482_v60, 0.0  ;;  %v485_v8 = vadd.f32 %v1070_v20, %v484_v4  ;;  %v862_v9 = vpack.c.bf16 %v534_v63, %v534_v63  ;;  %v535_v11 = vmax.f32 %v429_v1, 0.0 }
  0xf3   : > { %v878_v10 = vpack.c.bf16 %v550_v0, %v550_v0  ;;  %v551_v12 = vmax.f32 %v493_v2, 0.0  ;;  %v860_v13 = vpack.c.bf16 %v532_v5, %v532_v5  ;;  %v533_v15 = vmax.f32 %v421_v7, 0.0 }
  0xf4   : > { %v876_v14 = vpack.c.bf16 %v548_v6, %v548_v6  ;;  %v549_v16 = vmax.f32 %v485_v8, 0.0  ;;  %695 = vst.msk [vmem:[%s1083_s29 + $0x18] sm:$0xf] %vm688_vm2, %v862_v9  ;;  %v863_v17 = vpack.c.bf16 %v535_v11, %v535_v11 }
  0xf5   : > { %711 = vst.msk [vmem:[%s1083_s29 + $0x58] sm:$0xf] %vm688_vm2, %v878_v10  ;;  %v879_v18 = vpack.c.bf16 %v551_v12, %v551_v12  ;;  %693 = vst.msk [vmem:[%s1083_s29 + $0x10] sm:$0xf] %vm688_vm2, %v860_v13  ;;  %v861_v19 = vpack.c.bf16 %v533_v15, %v533_v15  ;;  %v923_v22 = vpop.f32.mrb[8].mxu0 }
  0xf6   : > { %709 = vst.msk [vmem:[%s1083_s29 + $0x50] sm:$0xf] %vm688_vm2, %v876_v14  ;;  %v877_v21 = vpack.c.bf16 %v549_v16, %v549_v16  ;;  %v939_v23 = vpop.f32.mrb[8].mxu1  ;;  %696 = vst.msk [vmem:[%s1083_s29 + $0x1c] sm:$0xf] %vm688_vm2, %v863_v17  ;;  %v442_v24 = vadd.f32 %v923_v22, %v1070_v20  ;;  %v433_v26 = vpop.f32.mrb[9].mxu0 }
  0xf7   : > { %712 = vst.msk [vmem:[%s1083_s29 + $0x5c] sm:$0xf] %vm688_vm2, %v879_v18  ;;  %v506_v25 = vadd.f32 %v939_v23, %v1070_v20  ;;  %v497_v27 = vpop.f32.mrb[9].mxu1  ;;  %694 = vst.msk [vmem:[%s1083_s29 + $0x14] sm:$0xf] %vm688_vm2, %v861_v19  ;;  %v434_v28 = vadd.f32 %v1070_v20, %v433_v26  ;;  %v924_v30 = vpop.f32.mrb[10].mxu0 }
  0xf8   : > { %710 = vst.msk [vmem:[%s1083_s29 + $0x54] sm:$0xf] %vm688_vm2, %v877_v21  ;;  %v498_v29 = vadd.f32 %v1070_v20, %v497_v27  ;;  %v940_v31 = vpop.f32.mrb[10].mxu1  ;;  %v538_v32 = vmax.f32 %v442_v24, 0.0  ;;  %v445_v34 = vadd.f32 %v924_v30, %v1070_v20  ;;  %v436_v36 = vpop.f32.mrb[11].mxu0 }
  0xf9   : > { %v554_v33 = vmax.f32 %v506_v25, 0.0  ;;  %v509_v35 = vadd.f32 %v940_v31, %v1070_v20  ;;  %v500_v37 = vpop.f32.mrb[11].mxu1  ;;  %v536_v38 = vmax.f32 %v434_v28, 0.0  ;;  %v437_v40 = vadd.f32 %v1070_v20, %v436_v36 }
  0xfa   : > { %v552_v39 = vmax.f32 %v498_v29, 0.0  ;;  %v501_v41 = vadd.f32 %v1070_v20, %v500_v37  ;;  %v866_v42 = vpack.c.bf16 %v538_v32, %v538_v32  ;;  %v539_v44 = vmax.f32 %v445_v34, 0.0 }
  0xfb   : > { %v882_v43 = vpack.c.bf16 %v554_v33, %v554_v33  ;;  %v555_v45 = vmax.f32 %v509_v35, 0.0  ;;  %v864_v46 = vpack.c.bf16 %v536_v38, %v536_v38  ;;  %v537_v48 = vmax.f32 %v437_v40, 0.0 }
  0xfc   : > { %v880_v47 = vpack.c.bf16 %v552_v39, %v552_v39  ;;  %v553_v49 = vmax.f32 %v501_v41, 0.0  ;;  %699 = vst.msk [vmem:[%s1083_s29 + $0x28] sm:$0xf] %vm688_vm2, %v866_v42  ;;  %v867_v50 = vpack.c.bf16 %v539_v44, %v539_v44 }
  0xfd   : > { %715 = vst.msk [vmem:[%s1083_s29 + $0x68] sm:$0xf] %vm688_vm2, %v882_v43  ;;  %v883_v51 = vpack.c.bf16 %v555_v45, %v555_v45  ;;  %697 = vst.msk [vmem:[%s1083_s29 + $0x20] sm:$0xf] %vm688_vm2, %v864_v46  ;;  %v865_v52 = vpack.c.bf16 %v537_v48, %v537_v48  ;;  %v927_v54 = vpop.f32.mrb[12].mxu0 }
  0xfe   : > { %713 = vst.msk [vmem:[%s1083_s29 + $0x60] sm:$0xf] %vm688_vm2, %v880_v47  ;;  %v881_v53 = vpack.c.bf16 %v553_v49, %v553_v49  ;;  %v943_v55 = vpop.f32.mrb[12].mxu1  ;;  %700 = vst.msk [vmem:[%s1083_s29 + $0x2c] sm:$0xf] %vm688_vm2, %v867_v50  ;;  %v458_v56 = vadd.f32 %v927_v54, %v1070_v20  ;;  %v449_v58 = vpop.f32.mrb[13].mxu0 }
  0xff   : > { %716 = vst.msk [vmem:[%s1083_s29 + $0x6c] sm:$0xf] %vm688_vm2, %v883_v51  ;;  %v522_v57 = vadd.f32 %v943_v55, %v1070_v20  ;;  %v513_v59 = vpop.f32.mrb[13].mxu1  ;;  %698 = vst.msk [vmem:[%s1083_s29 + $0x24] sm:$0xf] %vm688_vm2, %v865_v52  ;;  %v450_v60 = vadd.f32 %v1070_v20, %v449_v58  ;;  %v928_v62 = vpop.f32.mrb[14].mxu0 }
 0x100   : > { %714 = vst.msk [vmem:[%s1083_s29 + $0x64] sm:$0xf] %vm688_vm2, %v881_v53  ;;  %v514_v61 = vadd.f32 %v1070_v20, %v513_v59  ;;  %v944_v63 = vpop.f32.mrb[14].mxu1  ;;  %v542_v0 = vmax.f32 %v458_v56, 0.0  ;;  %v461_v2 = vadd.f32 %v928_v62, %v1070_v20  ;;  %v452_v4 = vpop.f32.mrb[15].mxu0 }
 0x101   : > { %v558_v1 = vmax.f32 %v522_v57, 0.0  ;;  %v525_v3 = vadd.f32 %v944_v63, %v1070_v20  ;;  %v516_v5 = vpop.f32.mrb[15].mxu1  ;;  %v540_v6 = vmax.f32 %v450_v60, 0.0  ;;  %v453_v8 = vadd.f32 %v1070_v20, %v452_v4 }
 0x102   : > { %v556_v7 = vmax.f32 %v514_v61, 0.0  ;;  %v517_v9 = vadd.f32 %v1070_v20, %v516_v5  ;;  %v870_v10 = vpack.c.bf16 %v542_v0, %v542_v0  ;;  %v543_v12 = vmax.f32 %v461_v2, 0.0 }
 0x103   : > { %v886_v11 = vpack.c.bf16 %v558_v1, %v558_v1  ;;  %v559_v13 = vmax.f32 %v525_v3, 0.0  ;;  %v868_v14 = vpack.c.bf16 %v540_v6, %v540_v6  ;;  %v541_v16 = vmax.f32 %v453_v8, 0.0 }
 0x104   : > { %v884_v15 = vpack.c.bf16 %v556_v7, %v556_v7  ;;  %v557_v17 = vmax.f32 %v517_v9, 0.0  ;;  %703 = vst.msk [vmem:[%s1083_s29 + $0x38] sm:$0xf] %vm688_vm2, %v870_v10  ;;  %v871_v18 = vpack.c.bf16 %v543_v12, %v543_v12 }
 0x105   : > { %719 = vst.msk [vmem:[%s1083_s29 + $0x78] sm:$0xf] %vm688_vm2, %v886_v11  ;;  %v887_v19 = vpack.c.bf16 %v559_v13, %v559_v13  ;;  %701 = vst.msk [vmem:[%s1083_s29 + $0x30] sm:$0xf] %vm688_vm2, %v868_v14  ;;  %v869_v20 = vpack.c.bf16 %v541_v16, %v541_v16 }
 0x106   : > { %717 = vst.msk [vmem:[%s1083_s29 + $0x70] sm:$0xf] %vm688_vm2, %v884_v15  ;;  %v885_v21 = vpack.c.bf16 %v557_v17, %v557_v17  ;;  %704 = vst.msk [vmem:[%s1083_s29 + $0x3c] sm:$0xf] %vm688_vm2, %v871_v18 }
 0x107   : > { %720 = vst.msk [vmem:[%s1083_s29 + $0x7c] sm:$0xf] %vm688_vm2, %v887_v19  ;;  %702 = vst.msk [vmem:[%s1083_s29 + $0x34] sm:$0xf] %vm688_vm2, %v869_v20 }
 0x108   : > { %718 = vst.msk [vmem:[%s1083_s29 + $0x74] sm:$0xf] %vm688_vm2, %v885_v21 }
 0x109 PF: > { %s13_s12 = sadd.s32 1, %s986_s12  }
 0x10a   : > { %p10_p4 = scmp.ge.s32.totalorder %s13_s12, 6  }
 0x10c   :  { %12 = sbr.rel (!%p10_p4) target bundleno = 1 (0x1), region = 62 }

// kernel: forward.10
= control target key start
LH: loop header
LB: loop body
LE: loop exit
PB: predicated region body
PF: predicated region fallthrough
CT: control target
= control target key end

     0   :  { %vm470_vm0 = vcmask 261120   ;;  %vm1001_vm1 = vcmask 519168   ;;  %s1878_s1 = inlined_call_operand.vmem [shape: bf16[288,64], index: 1, kind: input, shape index: {}]   ;;  %s1879_s0 = inlined_call_operand.vmem [shape: bf16[256,288], index: 0, kind: input, shape index: {}]   ;;  %s1880_s2 = inlined_call_operand.vmem [shape: f32[1,64], index: 2, kind: input, shape index: {}]   ;;  %s1881_s3 = inlined_call_operand.vmem [shape: bf16[256,64], index: 3, kind: output, shape index: {}]  }
   0x1   :  { %v1367_v0 = vld [vmem:[%s1878_s1 + $0x40] sm:$0xff]   ;;  %v1369_v2 = vld [vmem:[%s1878_s1 + $0x48] sm:$0xff]   ;;  %v1371_v4 = vld [vmem:[%s1878_s1 + $0x50] sm:$0xff]  }
   0x2   :  { %v1368_v1 = vld [vmem:[%s1878_s1] sm:$0xff]   ;;  %1185 = vmatprep.subr.bf16.mxu0 %v1367_v0  ;;  %1351 = vmatprep.subr.bf16.mxu1 %v1367_v0  ;;  %v1370_v3 = vld [vmem:[%s1878_s1 + $0x8] sm:$0xff]   ;;  %v1372_v5 = vld [vmem:[%s1878_s1 + $0x10] sm:$0xff]  }
   0x3   :  { %1186 = vmatpush3.bf16.msra.mxu0 %v1368_v1  ;;  %1359 = vmatpush3.bf16.msra.mxu1 %v1368_v1  ;;  %v1373_v6 = vld [vmem:[%s1878_s1 + $0x58] sm:$0xff]   ;;  %v1375_v8 = vld [vmem:[%s1878_s1 + $0x60] sm:$0xff]   ;;  %v1377_v10 = vld [vmem:[%s1878_s1 + $0x68] sm:$0xff]  }
   0x4   :  { %1187 = vmatprep.subr.bf16.mxu0 %v1369_v2  ;;  %1352 = vmatprep.subr.bf16.mxu1 %v1369_v2  ;;  %v1374_v7 = vld [vmem:[%s1878_s1 + $0x18] sm:$0xff]   ;;  %v1376_v9 = vld [vmem:[%s1878_s1 + $0x20] sm:$0xff]   ;;  %v1378_v13 = vld [vmem:[%s1878_s1 + $0x28] sm:$0xff]  }
   0x5   :  { %v1385_v11 = vld [vmem:[%s1879_s0 + $0x4] ss:$12 sps:$4 sm:$0xff]   ;;  %v1381_v16 = vld [vmem:[%s1878_s1 + $0x78] sm:$0xff]   ;;  %v1383_v19 = vld [vmem:[%s1879_s0] ss:$12 sps:$4 sm:$0xff]  }
   0x6   :  { %v1388_v12 = vld [vmem:[%s1879_s0 + $0x124] ss:$12 sps:$4 sm:$0xff]   ;;  %551 = vmatprep.mubr.bf16.mxu0 %v1385_v11  ;;  %v1382_v17 = vld [vmem:[%s1878_s1 + $0x38] sm:$0xff]   ;;  %v1386_v20 = vld [vmem:[%s1879_s0 + $0x120] ss:$12 sps:$4 sm:$0xff]  }
   0x7   :  { %1188 = vmatpush3.bf16.msra.mxu0 %v1370_v3  ;;  %1360 = vmatpush3.bf16.msra.mxu1 %v1370_v3  ;;  %v1379_v14 = vld [vmem:[%s1878_s1 + $0x70] sm:$0xff]   ;;  %v1389_v18 = vld [vmem:[%s1878_s1 + $0x80] sm:$0xff]   ;;  %v1390_v21 = vld [vmem:[%s1879_s0 + $0x1c] ss:$12 sps:$4 sm:$0xff]  }
   0x8   :  { %1189 = vmatprep.subr.bf16.mxu0 %v1371_v4  ;;  %1353 = vmatprep.subr.bf16.mxu1 %v1371_v4  ;;  %v1380_v15 = vld [vmem:[%s1878_s1 + $0x30] sm:$0xff]   ;;  %v1392_v22 = vld [vmem:[%s1879_s0 + $0x13c] ss:$12 sps:$4 sm:$0xff]   ;;  %v1394_v24 = vld [vmem:[%s1879_s0 + $0x18] ss:$12 sps:$4 sm:$0xff]  }
   0x9   :  { %647 = vmatprep.mubr.bf16.mxu1 %v1388_v12  ;;  %v1402_v23 = vld [vmem:[%s1878_s1 + $0x88] sm:$0xff]   ;;  %v1395_v25 = vld [vmem:[%s1879_s0 + $0x138] ss:$12 sps:$4 sm:$0xff]   ;;  %v1396_v26 = vld [vmem:[%s1879_s0 + $0x34] ss:$12 sps:$4 sm:$0xff]  }
   0xa   :  { %v1398_v27 = vld [vmem:[%s1879_s0 + $0x154] ss:$12 sps:$4 sm:$0xff]   ;;  %v1400_v28 = vld [vmem:[%s1879_s0 + $0x30] ss:$12 sps:$4 sm:$0xff]   ;;  %v1403_v30 = vld [vmem:[%s1879_s0 + $0x4c] ss:$12 sps:$4 sm:$0xff]  }
   0xb   :  { %1190 = vmatpush3.bf16.msra.mxu0 %v1372_v5  ;;  %1361 = vmatpush3.bf16.msra.mxu1 %v1372_v5  ;;  %v1401_v29 = vld [vmem:[%s1879_s0 + $0x150] ss:$12 sps:$4 sm:$0xff]   ;;  %v1405_v31 = vld [vmem:[%s1879_s0 + $0x16c] ss:$12 sps:$4 sm:$0xff]   ;;  %v1407_v32 = vld [vmem:[%s1879_s0 + $0x48] ss:$12 sps:$4 sm:$0xff]  }
   0xc   :  { %1191 = vmatprep.subr.bf16.mxu0 %v1373_v6  ;;  %1354 = vmatprep.subr.bf16.mxu1 %v1373_v6  ;;  %v1408_v33 = vld [vmem:[%s1879_s0 + $0x168] ss:$12 sps:$4 sm:$0xff]   ;;  %v1409_v34 = vld [vmem:[%s1879_s0 + $0x64] ss:$12 sps:$4 sm:$0xff]   ;;  %v1412_v36 = vld [vmem:[%s1879_s0 + $0x60] ss:$12 sps:$4 sm:$0xff]  }
   0xd   :  { %v1411_v35 = vld [vmem:[%s1879_s0 + $0x8] ss:$12 sps:$4 sm:$0xff]   ;;  %v1413_v37 = vld [vmem:[%s1879_s0 + $0x20] ss:$12 sps:$4 sm:$0xff]   ;;  %v1416_v39 = vld [vmem:[%s1879_s0 + $0x38] ss:$12 sps:$4 sm:$0xff]  }
   0xe   :  { %v1414_v38 = vld [vmem:[%s1879_s0 + $0x7c] ss:$12 sps:$4 sm:$0xff]   ;;  %v1417_v40 = vld [vmem:[%s1879_s0 + $0x78] ss:$12 sps:$4 sm:$0xff]   ;;  %v1419_v42 = vld [vmem:[%s1879_s0 + $0x94] ss:$12 sps:$4 sm:$0xff]  }
   0xf   :  { %1192 = vmatpush3.bf16.msra.mxu0 %v1374_v7  ;;  %1362 = vmatpush3.bf16.msra.mxu1 %v1374_v7  ;;  %v1418_v41 = vld [vmem:[%s1879_s0 + $0x50] ss:$12 sps:$4 sm:$0xff]   ;;  %v1421_v43 = vld [vmem:[%s1879_s0 + $0x68] ss:$12 sps:$4 sm:$0xff]   ;;  %v1423_v45 = vld [vmem:[%s1879_s0 + $0x80] ss:$12 sps:$4 sm:$0xff]  }
  0x10   :  { %1193 = vmatprep.subr.bf16.mxu0 %v1375_v8  ;;  %1355 = vmatprep.subr.bf16.mxu1 %v1375_v8  ;;  %v1422_v44 = vld [vmem:[%s1879_s0 + $0x90] ss:$12 sps:$4 sm:$0xff]   ;;  %v1424_v46 = vld [vmem:[%s1879_s0 + $0xac] ss:$12 sps:$4 sm:$0xff]   ;;  %v1427_v48 = vld [vmem:[%s1879_s0 + $0xa8] ss:$12 sps:$4 sm:$0xff]  }
  0x11   :  { %v1426_v47 = vld [vmem:[%s1879_s0 + $0x98] ss:$12 sps:$4 sm:$0xff]   ;;  %v1428_v49 = vld [vmem:[%s1879_s0 + $0xb0] ss:$12 sps:$4 sm:$0xff]   ;;  %v1431_v51 = vld [vmem:[%s1879_s0 + $0xc8] ss:$12 sps:$4 sm:$0xff]  }
  0x12   :  { %v1429_v50 = vld [vmem:[%s1879_s0 + $0xc4] ss:$12 sps:$4 sm:$0xff]   ;;  %v1432_v52 = vld [vmem:[%s1879_s0 + $0xc0] ss:$12 sps:$4 sm:$0xff]   ;;  %v1434_v54 = vld [vmem:[%s1879_s0 + $0xdc] ss:$12 sps:$4 sm:$0xff]  }
  0x13   :  { %1194 = vmatpush3.bf16.msra.mxu0 %v1376_v9  ;;  %1363 = vmatpush3.bf16.msra.mxu1 %v1376_v9  ;;  %v1433_v53 = vld [vmem:[%s1879_s0 + $0xe0] ss:$12 sps:$4 sm:$0xff]   ;;  %v1436_v55 = vld [vmem:[%s1879_s0 + $0xf8] ss:$12 sps:$4 sm:$0xff]   ;;  %v1438_v57 = vld [vmem:[%s1879_s0 + $0x110] ss:$12 sps:$4 sm:$0xff]  }
  0x14   :  { %1195 = vmatprep.subr.bf16.mxu0 %v1377_v10  ;;  %1356 = vmatprep.subr.bf16.mxu1 %v1377_v10  ;;  %v1437_v56 = vld [vmem:[%s1879_s0 + $0xd8] ss:$12 sps:$4 sm:$0xff]   ;;  %v1439_v58 = vld [vmem:[%s1879_s0 + $0xf4] ss:$12 sps:$4 sm:$0xff]   ;;  %v1442_v60 = vld [vmem:[%s1879_s0 + $0xf0] ss:$12 sps:$4 sm:$0xff]  }
  0x15   :  { %v1441_v59 = vld [vmem:[%s1879_s0 + $0x128] ss:$12 sps:$4 sm:$0xff]   ;;  %v1443_v61 = vld [vmem:[%s1879_s0 + $0x140] ss:$12 sps:$4 sm:$0xff]   ;;  %v1446_v63 = vld [vmem:[%s1879_s0 + $0x158] ss:$12 sps:$4 sm:$0xff]  }
  0x16   :  { %v1444_v62 = vld [vmem:[%s1879_s0 + $0x10c] ss:$12 sps:$4 sm:$0xff]   ;;  %v1447_v0 = vld [vmem:[%s1879_s0 + $0x108] ss:$12 sps:$4 sm:$0xff]   ;;  %v1448_v1 = vld [vmem:[%s1879_s0 + $0x170] ss:$12 sps:$4 sm:$0xff]  }
  0x17   :  { %1196 = vmatpush3.bf16.msra.mxu0 %v1378_v13  ;;  %1364 = vmatpush3.bf16.msra.mxu1 %v1378_v13 }
  0x18   :  { %1197 = vmatprep.subr.bf16.mxu0 %v1379_v14  ;;  %1357 = vmatprep.subr.bf16.mxu1 %v1379_v14 }
  0x1b   :  { %1198 = vmatpush3.bf16.msra.mxu0 %v1380_v15  ;;  %1365 = vmatpush3.bf16.msra.mxu1 %v1380_v15 }
  0x1c   :  { %1199 = vmatprep.subr.bf16.mxu0 %v1381_v16  ;;  %1358 = vmatprep.subr.bf16.mxu1 %v1381_v16 }
  0x1f   :  { %1200 = vmatpush3.bf16.msra.mxu0 %v1382_v17  ;;  %1366 = vmatpush3.bf16.msra.mxu1 %v1382_v17 }
  0x20   :  { %1315 = vmatprep.subr.bf16.mxu1 %v1389_v18 }
  0x22   :  { %552 = vmatmul.mubr.bf16.vlgmr.msra.gmra.mrb[0].mxu0 %v1383_v19  ;;  %648 = vmatmul.mubr.bf16.vlgmr.msra.gmra.mrb[0].mxu1 %v1386_v20 }
  0x23   :  { %1316 = vmatpush3.bf16.msra.mxu1 %v1389_v18  ;;  %559 = vmatprep.mubr.bf16.mxu0 %v1390_v21 }
  0x24   :  { %655 = vmatprep.mubr.bf16.mxu1 %v1392_v22  ;;  %1317 = vmatprep.subr.bf16.mxu1 %v1402_v23 }
  0x27   :  { %1318 = vmatpush3.bf16.msra.mxu1 %v1402_v23 }
  0x2a   :  { %560 = vmatmul.mubr.bf16.gmra.mrb[4].mxu0 %v1394_v24  ;;  %656 = vmatmul.mubr.bf16.gmra.mrb[4].mxu1 %v1395_v25 }
  0x2b   :  { %567 = vmatprep.mubr.bf16.mxu0 %v1396_v26  ;;  %663 = vmatprep.mubr.bf16.mxu1 %v1398_v27 }
  0x32   :  { %568 = vmatmul.mubr.bf16.gmra.mrb[8].mxu0 %v1400_v28  ;;  %664 = vmatmul.mubr.bf16.gmra.mrb[8].mxu1 %v1401_v29 }
  0x33   :  { %575 = vmatprep.mubr.bf16.mxu0 %v1403_v30  ;;  %671 = vmatprep.mubr.bf16.mxu1 %v1405_v31 }
  0x3a   :  { %576 = vmatmul.mubr.bf16.gmra.mrb[12].mxu0 %v1407_v32  ;;  %672 = vmatmul.mubr.bf16.gmra.mrb[12].mxu1 %v1408_v33 }
  0x3b   :  { %583 = vmatprep.mubr.bf16.mxu0 %v1409_v34  ;;  %1319 = vmatprep.mubr.msk.bf16.mxu1 %vm470_vm0, %v1411_v35 }
  0x42   :  { %584 = vmatmul.mubr.bf16.gmra.mrb[16].mxu0 %v1412_v36  ;;  %1320 = vmatmul.mubr.msk.bf16.vlgmr.msra.gmra.mrb[16].mxu1 %vm470_vm0, %v1413_v37 }
  0x43   :  { %591 = vmatprep.mubr.bf16.mxu0 %v1414_v38  ;;  %1323 = vmatprep.mubr.msk.bf16.mxu1 %vm470_vm0, %v1416_v39 }
  0x4a   :  { %592 = vmatmul.mubr.bf16.gmra.mrb[20].mxu0 %v1417_v40  ;;  %1324 = vmatmul.mubr.msk.bf16.gmra.mrb[20].mxu1 %vm470_vm0, %v1418_v41 }
  0x4b   :  { %599 = vmatprep.mubr.bf16.mxu0 %v1419_v42  ;;  %1327 = vmatprep.mubr.msk.bf16.mxu1 %vm470_vm0, %v1421_v43 }
  0x52   :  { %600 = vmatmul.mubr.bf16.gmra.mrb[24].mxu0 %v1422_v44  ;;  %1328 = vmatmul.mubr.msk.bf16.gmra.mrb[24].mxu1 %vm470_vm0, %v1423_v45 }
  0x53   :  { %607 = vmatprep.mubr.bf16.mxu0 %v1424_v46  ;;  %1331 = vmatprep.mubr.msk.bf16.mxu1 %vm470_vm0, %v1426_v47 }
  0x5a   :  { %608 = vmatmul.mubr.bf16.gmra.mrb[28].mxu0 %v1427_v48  ;;  %1332 = vmatmul.mubr.msk.bf16.gmra.mrb[28].mxu1 %vm470_vm0, %v1428_v49 }
  0x5b   :  { %615 = vmatprep.mubr.bf16.mxu0 %v1429_v50  ;;  %1335 = vmatprep.mubr.msk.bf16.mxu1 %vm470_vm0, %v1431_v51  ;;  %v1702_v50 = vld [vmem:[%s1880_s2] ss:$0 sm:$0xff] }
  0x62   :  { %616 = vmatmul.mubr.bf16.gmra.mrb[32].mxu0 %v1432_v52  ;;  %1336 = vmatmul.mubr.msk.bf16.gmra.mrb[32].mxu1 %vm470_vm0, %v1433_v53 }
  0x63   :  { %623 = vmatprep.mubr.bf16.mxu0 %v1434_v54  ;;  %1339 = vmatprep.mubr.msk.bf16.mxu1 %vm470_vm0, %v1436_v55 }
  0x6a   :  { %624 = vmatmul.mubr.bf16.gmra.mrb[36].mxu0 %v1437_v56  ;;  %1340 = vmatmul.mubr.msk.bf16.gmra.mrb[36].mxu1 %vm470_vm0, %v1438_v57 }
  0x6b   :  { %631 = vmatprep.mubr.bf16.mxu0 %v1439_v58  ;;  %1343 = vmatprep.mubr.msk.bf16.mxu1 %vm470_vm0, %v1441_v59 }
  0x72   :  { %632 = vmatmul.mubr.bf16.gmra.mrb[40].mxu0 %v1442_v60  ;;  %1344 = vmatmul.mubr.msk.bf16.gmra.mrb[40].mxu1 %vm470_vm0, %v1443_v61 }
  0x73   :  { %639 = vmatprep.mubr.bf16.mxu0 %v1444_v62  ;;  %1347 = vmatprep.mubr.msk.bf16.mxu1 %vm470_vm0, %v1446_v63 }
  0x7a   :  { %640 = vmatmul.mubr.bf16.gmra.mrb[44].mxu0 %v1447_v0  ;;  %1348 = vmatmul.mubr.msk.bf16.gmra.mrb[44].mxu1 %vm470_vm0, %v1448_v1 }
  0xf5   :  { %v1201_v2 = vpop.f32.mrb[0].mxu0  ;;  %v1273_v3 = vpop.f32.mrb[0].mxu1 }
  0xf6   :  { %v1202_v4 = vpop.f32.mrb[1].mxu0  ;;  %v1274_v5 = vpop.f32.mrb[1].mxu1 }
  0xf7   :  { %v1203_v6 = vadd.f32 %v1202_v4, %v1201_v2  ;;  %v1204_v7 = vpop.f32.mrb[2].mxu0  ;;  %v1683_v8 = vadd.f32 %v1274_v5, %v1273_v3  ;;  %v1276_v9 = vpop.f32.mrb[2].mxu1 }
  0xf8   :  { %v1205_v10 = vpop.f32.mrb[3].mxu0  ;;  %v1277_v11 = vpop.f32.mrb[3].mxu1 }
  0xf9   :  { %v1206_v12 = vadd.f32 %v1205_v10, %v1204_v7  ;;  %v1685_v13 = vadd.f32 %v1277_v11, %v1276_v9  ;;  %v554_v54 = vadd.f32 %v1203_v6, %v1702_v50 }
  0xfb   :  { %v557_v63 = vadd.f32 %v1206_v12, %v1702_v50 }
  0xfd   :  { %v1207_v14 = vpop.f32.mrb[4].mxu0  ;;  %v1279_v15 = vpop.f32.mrb[4].mxu1 }
  0xfe   :  { %v1208_v16 = vpop.f32.mrb[5].mxu0  ;;  %v1280_v17 = vpop.f32.mrb[5].mxu1 }
  0xff   :  { %v1209_v18 = vadd.f32 %v1208_v16, %v1207_v14  ;;  %v1210_v19 = vpop.f32.mrb[6].mxu0  ;;  %v1687_v20 = vadd.f32 %v1280_v17, %v1279_v15  ;;  %v1282_v21 = vpop.f32.mrb[6].mxu1 }
 0x100   :  { %v1211_v22 = vpop.f32.mrb[7].mxu0  ;;  %v1283_v23 = vpop.f32.mrb[7].mxu1 }
 0x101   :  { %v1212_v24 = vadd.f32 %v1211_v22, %v1210_v19  ;;  %v1689_v25 = vadd.f32 %v1283_v23, %v1282_v21  ;;  %v562_v51 = vadd.f32 %v1209_v18, %v1702_v50 }
 0x103   :  { %v565_v58 = vadd.f32 %v1212_v24, %v1702_v50 }
 0x105   :  { %v1213_v26 = vpop.f32.mrb[8].mxu0  ;;  %v1285_v27 = vpop.f32.mrb[8].mxu1 }
 0x106   :  { %v1214_v28 = vpop.f32.mrb[9].mxu0  ;;  %v1286_v29 = vpop.f32.mrb[9].mxu1 }
 0x107   :  { %v1215_v30 = vadd.f32 %v1214_v28, %v1213_v26  ;;  %v1216_v31 = vpop.f32.mrb[10].mxu0  ;;  %v1691_v32 = vadd.f32 %v1286_v29, %v1285_v27  ;;  %v1288_v33 = vpop.f32.mrb[10].mxu1 }
 0x108   :  { %v1217_v34 = vpop.f32.mrb[11].mxu0  ;;  %v1289_v35 = vpop.f32.mrb[11].mxu1 }
 0x109   :  { %v1218_v36 = vadd.f32 %v1217_v34, %v1216_v31  ;;  %v1693_v37 = vadd.f32 %v1289_v35, %v1288_v33  ;;  %v570_v18 = vadd.f32 %v1215_v30, %v1702_v50 }
 0x10b   :  { %v573_v29 = vadd.f32 %v1218_v36, %v1702_v50 }
 0x10d   :  { %v1219_v38 = vpop.f32.mrb[12].mxu0  ;;  %v1291_v39 = vpop.f32.mrb[12].mxu1 }
 0x10e   :  { %v1220_v40 = vpop.f32.mrb[13].mxu0  ;;  %v1292_v41 = vpop.f32.mrb[13].mxu1 }
 0x10f   :  { %v1221_v42 = vadd.f32 %v1220_v40, %v1219_v38  ;;  %v1222_v43 = vpop.f32.mrb[14].mxu0  ;;  %v1695_v44 = vadd.f32 %v1292_v41, %v1291_v39  ;;  %v1294_v45 = vpop.f32.mrb[14].mxu1 }
 0x110   :  { %v1223_v46 = vpop.f32.mrb[15].mxu0  ;;  %v1295_v47 = vpop.f32.mrb[15].mxu1 }
 0x111   :  { %v1224_v48 = vadd.f32 %v1223_v46, %v1222_v43  ;;  %v1697_v49 = vadd.f32 %v1295_v47, %v1294_v45  ;;  %v578_v12 = vadd.f32 %v1221_v42, %v1702_v50 }
 0x113   :  { %v581_v23 = vadd.f32 %v1224_v48, %v1702_v50 }
 0x115   :  { %v1225_v52 = vpop.f32.mrb[16].mxu0  ;;  %v1321_v53 = vpop.f32.mrb[16].mxu1 }
 0x116   :  { %v723_v55 = vadd.f32 %v1321_v53, %v562_v51  ;;  %v1226_v56 = vpop.f32.mrb[17].mxu0  ;;  %v714_v57 = vpop.f32.mrb[17].mxu1 }
 0x117   :  { %v1227_v59 = vadd.f32 %v1226_v56, %v1225_v52  ;;  %v715_v60 = vadd.f32 %v714_v57, %v554_v54  ;;  %v1228_v61 = vpop.f32.mrb[18].mxu0  ;;  %v1322_v62 = vpop.f32.mrb[18].mxu1 }
 0x118   :  { %v843_v0 = vmax.f32 %v723_v55, 0.0  ;;  %v726_v1 = vadd.f32 %v1322_v62, %v565_v58  ;;  %v1229_v2 = vpop.f32.mrb[19].mxu0  ;;  %v717_v3 = vpop.f32.mrb[19].mxu1 }
 0x119   :  { %v841_v4 = vmax.f32 %v715_v60, 0.0  ;;  %v1230_v5 = vadd.f32 %v1229_v2, %v1228_v61  ;;  %v718_v7 = vadd.f32 %v717_v3, %v557_v63  ;;  %v586_v51 = vadd.f32 %v1227_v59, %v1702_v50 }
 0x11a   :  { %v1155_v6 = vpack.c.bf16 %v843_v0, %v843_v0  ;;  %v844_v9 = vmax.f32 %v726_v1, 0.0 }
 0x11b   :  { %v1153_v10 = vpack.c.bf16 %v841_v4, %v841_v4  ;;  %v842_v11 = vmax.f32 %v718_v7, 0.0  ;;  %v589_v59 = vadd.f32 %v1230_v5, %v1702_v50 }
 0x11c   :  { %1004 = vst.msk [vmem:[%s1881_s3 + $0x8] sm:$0xf] %vm1001_vm1, %v1155_v6  ;;  %v1156_v14 = vpack.c.bf16 %v844_v9, %v844_v9 }
 0x11d   :  { %1002 = vst.msk [vmem:[%s1881_s3] sm:$0xf] %vm1001_vm1, %v1153_v10  ;;  %v1154_v15 = vpack.c.bf16 %v842_v11, %v842_v11  ;;  %v1231_v16 = vpop.f32.mrb[20].mxu0  ;;  %v1325_v17 = vpop.f32.mrb[20].mxu1 }
 0x11e   :  { %1005 = vst.msk [vmem:[%s1881_s3 + $0xc] sm:$0xf] %vm1001_vm1, %v1156_v14  ;;  %v739_v19 = vadd.f32 %v1325_v17, %v578_v12  ;;  %v1232_v21 = vpop.f32.mrb[21].mxu0  ;;  %v730_v22 = vpop.f32.mrb[21].mxu1 }
 0x11f   :  { %1003 = vst.msk [vmem:[%s1881_s3 + $0x4] sm:$0xf] %vm1001_vm1, %v1154_v15  ;;  %v1233_v24 = vadd.f32 %v1232_v21, %v1231_v16  ;;  %v731_v26 = vadd.f32 %v730_v22, %v570_v18  ;;  %v1234_v27 = vpop.f32.mrb[22].mxu0  ;;  %v1326_v28 = vpop.f32.mrb[22].mxu1 }
 0x120   :  { %v847_v30 = vmax.f32 %v739_v19, 0.0  ;;  %v742_v31 = vadd.f32 %v1326_v28, %v581_v23  ;;  %v1235_v33 = vpop.f32.mrb[23].mxu0  ;;  %v733_v34 = vpop.f32.mrb[23].mxu1 }
 0x121   :  { %v845_v35 = vmax.f32 %v731_v26, 0.0  ;;  %v1236_v38 = vadd.f32 %v1235_v33, %v1234_v27  ;;  %v734_v39 = vadd.f32 %v733_v34, %v573_v29  ;;  %v594_v46 = vadd.f32 %v1233_v24, %v1702_v50 }
 0x122   :  { %v1159_v40 = vpack.c.bf16 %v847_v30, %v847_v30  ;;  %v848_v41 = vmax.f32 %v742_v31, 0.0 }
 0x123   :  { %v1157_v42 = vpack.c.bf16 %v845_v35, %v845_v35  ;;  %v846_v43 = vmax.f32 %v734_v39, 0.0  ;;  %v597_v55 = vadd.f32 %v1236_v38, %v1702_v50 }
 0x124   :  { %1008 = vst.msk [vmem:[%s1881_s3 + $0x18] sm:$0xf] %vm1001_vm1, %v1159_v40  ;;  %v1160_v45 = vpack.c.bf16 %v848_v41, %v848_v41 }
 0x125   :  { %1006 = vst.msk [vmem:[%s1881_s3 + $0x10] sm:$0xf] %vm1001_vm1, %v1157_v42  ;;  %v1158_v36 = vpack.c.bf16 %v846_v43, %v846_v43  ;;  %v1237_v47 = vpop.f32.mrb[24].mxu0  ;;  %v1329_v48 = vpop.f32.mrb[24].mxu1 }
 0x126   :  { %1009 = vst.msk [vmem:[%s1881_s3 + $0x1c] sm:$0xf] %vm1001_vm1, %v1160_v45  ;;  %v755_v52 = vadd.f32 %v1329_v48, %v594_v46  ;;  %v1238_v53 = vpop.f32.mrb[25].mxu0  ;;  %v746_v54 = vpop.f32.mrb[25].mxu1 }
 0x127   :  { %1007 = vst.msk [vmem:[%s1881_s3 + $0x14] sm:$0xf] %vm1001_vm1, %v1158_v36  ;;  %v1239_v56 = vadd.f32 %v1238_v53, %v1237_v47  ;;  %v747_v57 = vadd.f32 %v746_v54, %v586_v51  ;;  %v1240_v58 = vpop.f32.mrb[26].mxu0  ;;  %v1330_v60 = vpop.f32.mrb[26].mxu1 }
 0x128   :  { %v851_v61 = vmax.f32 %v755_v52, 0.0  ;;  %v758_v62 = vadd.f32 %v1330_v60, %v597_v55  ;;  %v1241_v63 = vpop.f32.mrb[27].mxu0  ;;  %v749_v0 = vpop.f32.mrb[27].mxu1 }
 0x129   :  { %v849_v1 = vmax.f32 %v747_v57, 0.0  ;;  %v1242_v2 = vadd.f32 %v1241_v63, %v1240_v58  ;;  %v750_v3 = vadd.f32 %v749_v0, %v589_v59  ;;  %v602_v12 = vadd.f32 %v1239_v56, %v1702_v50 }
 0x12a   :  { %v1163_v4 = vpack.c.bf16 %v851_v61, %v851_v61  ;;  %v852_v7 = vmax.f32 %v758_v62, 0.0 }
 0x12b   :  { %v1161_v6 = vpack.c.bf16 %v849_v1, %v849_v1  ;;  %v850_v9 = vmax.f32 %v750_v3, 0.0  ;;  %v605_v22 = vadd.f32 %v1242_v2, %v1702_v50 }
 0x12c   :  { %1012 = vst.msk [vmem:[%s1881_s3 + $0x28] sm:$0xf] %vm1001_vm1, %v1163_v4  ;;  %v1164_v10 = vpack.c.bf16 %v852_v7, %v852_v7 }
 0x12d   :  { %1010 = vst.msk [vmem:[%s1881_s3 + $0x20] sm:$0xf] %vm1001_vm1, %v1161_v6  ;;  %v1162_v5 = vpack.c.bf16 %v850_v9, %v850_v9  ;;  %v1243_v11 = vpop.f32.mrb[28].mxu0  ;;  %v1333_v14 = vpop.f32.mrb[28].mxu1 }
 0x12e   :  { %1013 = vst.msk [vmem:[%s1881_s3 + $0x2c] sm:$0xf] %vm1001_vm1, %v1164_v10  ;;  %v1244_v15 = vpop.f32.mrb[29].mxu0  ;;  %v762_v16 = vpop.f32.mrb[29].mxu1 }
 0x12f   :  { %1011 = vst.msk [vmem:[%s1881_s3 + $0x24] sm:$0xf] %vm1001_vm1, %v1162_v5  ;;  %v1245_v17 = vadd.f32 %v1244_v15, %v1243_v11  ;;  %v763_v18 = vadd.f32 %v762_v16, %v602_v12  ;;  %v1246_v19 = vpop.f32.mrb[30].mxu0  ;;  %v1334_v21 = vpop.f32.mrb[30].mxu1  ;;  %v658_v12 = vadd.f32 %v1687_v20, %v1702_v50 }
 0x130   :  { %v1247_v23 = vpop.f32.mrb[31].mxu0  ;;  %v765_v24 = vpop.f32.mrb[31].mxu1 }
 0x131   :  { %v610_v26 = vadd.f32 %v1245_v17, %v1702_v50  ;;  %v853_v27 = vmax.f32 %v763_v18, 0.0  ;;  %v1248_v28 = vadd.f32 %v1247_v23, %v1246_v19  ;;  %v766_v29 = vadd.f32 %v765_v24, %v605_v22 }
 0x132   :  { %v650_v19 = vadd.f32 %v1683_v8, %v1702_v50  ;;  %v661_v24 = vadd.f32 %v1689_v25, %v1702_v50 }
 0x133   :  { %v771_v30 = vadd.f32 %v1333_v14, %v610_v26  ;;  %v1165_v31 = vpack.c.bf16 %v853_v27, %v853_v27  ;;  %v613_v33 = vadd.f32 %v1248_v28, %v1702_v50  ;;  %v854_v34 = vmax.f32 %v766_v29, 0.0 }
 0x135   :  { %v855_v35 = vmax.f32 %v771_v30, 0.0  ;;  %1014 = vst.msk [vmem:[%s1881_s3 + $0x30] sm:$0xf] %vm1001_vm1, %v1165_v31  ;;  %v774_v38 = vadd.f32 %v1334_v21, %v613_v33  ;;  %v1166_v39 = vpack.c.bf16 %v854_v34, %v854_v34  ;;  %v1249_v40 = vpop.f32.mrb[32].mxu0  ;;  %v1337_v41 = vpop.f32.mrb[32].mxu1 }
 0x136   :  { %v1250_v42 = vpop.f32.mrb[33].mxu0  ;;  %v778_v43 = vpop.f32.mrb[33].mxu1 }
 0x137   :  { %v1167_v45 = vpack.c.bf16 %v855_v35, %v855_v35  ;;  %v856_v46 = vmax.f32 %v774_v38, 0.0  ;;  %1015 = vst.msk [vmem:[%s1881_s3 + $0x34] sm:$0xf] %vm1001_vm1, %v1166_v39  ;;  %v1251_v36 = vadd.f32 %v1250_v42, %v1249_v40  ;;  %v1252_v47 = vpop.f32.mrb[34].mxu0  ;;  %v1338_v48 = vpop.f32.mrb[34].mxu1  ;;  %v653_v35 = vadd.f32 %v1685_v13, %v1702_v50 }
 0x138   :  { %v1253_v51 = vpop.f32.mrb[35].mxu0  ;;  %v781_v52 = vpop.f32.mrb[35].mxu1 }
 0x139   :  { %1016 = vst.msk [vmem:[%s1881_s3 + $0x38] sm:$0xf] %vm1001_vm1, %v1167_v45  ;;  %v1168_v53 = vpack.c.bf16 %v856_v46, %v856_v46  ;;  %v618_v54 = vadd.f32 %v1251_v36, %v1702_v50  ;;  %v1254_v55 = vadd.f32 %v1253_v51, %v1252_v47 }
 0x13b   :  { %1017 = vst.msk [vmem:[%s1881_s3 + $0x3c] sm:$0xf] %vm1001_vm1, %v1168_v53  ;;  %v779_v56 = vadd.f32 %v778_v43, %v618_v54  ;;  %v621_v57 = vadd.f32 %v1254_v55, %v1702_v50  ;;  %v666_v55 = vadd.f32 %v1691_v32, %v1702_v50 }
 0x13d   :  { %v857_v58 = vmax.f32 %v779_v56, 0.0  ;;  %v782_v60 = vadd.f32 %v781_v52, %v621_v57  ;;  %v1255_v59 = vpop.f32.mrb[36].mxu0  ;;  %v1786_v61 = vpop.f32.mrb[36].mxu1 }
 0x13e   :  { %v1256_v62 = vpop.f32.mrb[37].mxu0  ;;  %v794_v63 = vpop.f32.mrb[37].mxu1 }
 0x13f   :  { %v1169_v0 = vpack.c.bf16 %v857_v58, %v857_v58  ;;  %v858_v1 = vmax.f32 %v782_v60, 0.0  ;;  %v1257_v2 = vadd.f32 %v1256_v62, %v1255_v59  ;;  %v1258_v3 = vpop.f32.mrb[38].mxu0  ;;  %v1788_v4 = vpop.f32.mrb[38].mxu1  ;;  %v677_v60 = vadd.f32 %v1697_v49, %v1702_v50 }
 0x140   :  { %v1259_v7 = vpop.f32.mrb[39].mxu0  ;;  %v797_v6 = vpop.f32.mrb[39].mxu1 }
 0x141   :  { %1018 = vst.msk [vmem:[%s1881_s3 + $0x40] sm:$0xf] %vm1001_vm1, %v1169_v0  ;;  %v1170_v9 = vpack.c.bf16 %v858_v1, %v858_v1  ;;  %v626_v10 = vadd.f32 %v1257_v2, %v1702_v50  ;;  %v1260_v5 = vadd.f32 %v1259_v7, %v1258_v3 }
 0x143   :  { %1019 = vst.msk [vmem:[%s1881_s3 + $0x44] sm:$0xf] %vm1001_vm1, %v1170_v9  ;;  %v787_v11 = vadd.f32 %v1337_v41, %v626_v10  ;;  %v629_v14 = vadd.f32 %v1260_v5, %v1702_v50 }
 0x145   :  { %v859_v15 = vmax.f32 %v787_v11, 0.0  ;;  %v790_v16 = vadd.f32 %v1338_v48, %v629_v14  ;;  %v1261_v17 = vpop.f32.mrb[40].mxu0  ;;  %v1345_v18 = vpop.f32.mrb[40].mxu1  ;;  %v674_v48 = vadd.f32 %v1695_v44, %v1702_v50 }
 0x146   :  { %v819_v21 = vadd.f32 %v1345_v18, %v658_v12  ;;  %v1262_v22 = vpop.f32.mrb[41].mxu0  ;;  %v810_v23 = vpop.f32.mrb[41].mxu1 }
 0x147   :  { %v1171_v26 = vpack.c.bf16 %v859_v15, %v859_v15  ;;  %v860_v27 = vmax.f32 %v790_v16, 0.0  ;;  %v1263_v28 = vadd.f32 %v1262_v22, %v1261_v17  ;;  %v811_v29 = vadd.f32 %v810_v23, %v650_v19  ;;  %v1264_v30 = vpop.f32.mrb[42].mxu0  ;;  %v1346_v31 = vpop.f32.mrb[42].mxu1 }
 0x148   :  { %v867_v20 = vmax.f32 %v819_v21, 0.0  ;;  %v822_v33 = vadd.f32 %v1346_v31, %v661_v24  ;;  %v1265_v34 = vpop.f32.mrb[43].mxu0  ;;  %v813_v38 = vpop.f32.mrb[43].mxu1 }
 0x149   :  { %1020 = vst.msk [vmem:[%s1881_s3 + $0x48] sm:$0xf] %vm1001_vm1, %v1171_v26  ;;  %v1172_v8 = vpack.c.bf16 %v860_v27, %v860_v27  ;;  %v634_v25 = vadd.f32 %v1263_v28, %v1702_v50  ;;  %v865_v39 = vmax.f32 %v811_v29, 0.0  ;;  %v1266_v40 = vadd.f32 %v1265_v34, %v1264_v30 }
 0x14a   :  { %v1179_v41 = vpack.c.bf16 %v867_v20, %v867_v20  ;;  %v868_v42 = vmax.f32 %v822_v33, 0.0  ;;  %v814_v43 = vadd.f32 %v813_v38, %v653_v35 }
 0x14b   :  { %1021 = vst.msk [vmem:[%s1881_s3 + $0x4c] sm:$0xf] %vm1001_vm1, %v1172_v8  ;;  %v795_v13 = vadd.f32 %v794_v63, %v634_v25  ;;  %v1177_v45 = vpack.c.bf16 %v865_v39, %v865_v39  ;;  %v637_v46 = vadd.f32 %v1266_v40, %v1702_v50 }
 0x14c   :  { %1028 = vst.msk [vmem:[%s1881_s3 + $0x68] sm:$0xf] %vm1001_vm1, %v1179_v41  ;;  %v1180_v36 = vpack.c.bf16 %v868_v42, %v868_v42  ;;  %v866_v47 = vmax.f32 %v814_v43, 0.0 }
 0x14d   :  { %v861_v51 = vmax.f32 %v795_v13, 0.0  ;;  %1026 = vst.msk [vmem:[%s1881_s3 + $0x60] sm:$0xf] %vm1001_vm1, %v1177_v45  ;;  %v798_v52 = vadd.f32 %v797_v6, %v637_v46  ;;  %v1267_v53 = vpop.f32.mrb[44].mxu0  ;;  %v1349_v54 = vpop.f32.mrb[44].mxu1  ;;  %v669_v6 = vadd.f32 %v1693_v37, %v1702_v50 }
 0x14e   :  { %1029 = vst.msk [vmem:[%s1881_s3 + $0x6c] sm:$0xf] %vm1001_vm1, %v1180_v36  ;;  %v1178_v56 = vpack.c.bf16 %v866_v47, %v866_v47  ;;  %v835_v57 = vadd.f32 %v1349_v54, %v674_v48  ;;  %v1268_v44 = vpop.f32.mrb[45].mxu0  ;;  %v826_v58 = vpop.f32.mrb[45].mxu1 }
 0x14f   :  { %v1173_v59 = vpack.c.bf16 %v861_v51, %v861_v51  ;;  %v862_v62 = vmax.f32 %v798_v52, 0.0  ;;  %v1269_v63 = vadd.f32 %v1268_v44, %v1267_v53  ;;  %v827_v0 = vadd.f32 %v826_v58, %v666_v55  ;;  %v1270_v1 = vpop.f32.mrb[46].mxu0  ;;  %v1350_v2 = vpop.f32.mrb[46].mxu1 }
 0x150   :  { %1027 = vst.msk [vmem:[%s1881_s3 + $0x64] sm:$0xf] %vm1001_vm1, %v1178_v56  ;;  %v871_v32 = vmax.f32 %v835_v57, 0.0  ;;  %v838_v3 = vadd.f32 %v1350_v2, %v677_v60  ;;  %v1271_v7 = vpop.f32.mrb[47].mxu0  ;;  %v829_v9 = vpop.f32.mrb[47].mxu1 }
 0x151   :  { %1022 = vst.msk [vmem:[%s1881_s3 + $0x50] sm:$0xf] %vm1001_vm1, %v1173_v59  ;;  %v1174_v49 = vpack.c.bf16 %v862_v62, %v862_v62  ;;  %v642_v10 = vadd.f32 %v1269_v63, %v1702_v50  ;;  %v869_v5 = vmax.f32 %v827_v0, 0.0  ;;  %v1272_v11 = vadd.f32 %v1271_v7, %v1270_v1 }
 0x152   :  { %v1183_v14 = vpack.c.bf16 %v871_v32, %v871_v32  ;;  %v872_v12 = vmax.f32 %v838_v3, 0.0  ;;  %v830_v15 = vadd.f32 %v829_v9, %v669_v6 }
 0x153   :  { %1023 = vst.msk [vmem:[%s1881_s3 + $0x54] sm:$0xf] %vm1001_vm1, %v1174_v49  ;;  %v803_v37 = vadd.f32 %v1786_v61, %v642_v10  ;;  %v1181_v16 = vpack.c.bf16 %v869_v5, %v869_v5  ;;  %v645_v17 = vadd.f32 %v1272_v11, %v1702_v50 }
 0x154   :  { %1032 = vst.msk [vmem:[%s1881_s3 + $0x78] sm:$0xf] %vm1001_vm1, %v1183_v14  ;;  %v1184_v18 = vpack.c.bf16 %v872_v12, %v872_v12  ;;  %v870_v19 = vmax.f32 %v830_v15, 0.0 }
 0x155   :  { %v863_v21 = vmax.f32 %v803_v37, 0.0  ;;  %1030 = vst.msk [vmem:[%s1881_s3 + $0x70] sm:$0xf] %vm1001_vm1, %v1181_v16  ;;  %v806_v22 = vadd.f32 %v1788_v4, %v645_v17 }
 0x156   :  { %1033 = vst.msk [vmem:[%s1881_s3 + $0x7c] sm:$0xf] %vm1001_vm1, %v1184_v18  ;;  %v1182_v50 = vpack.c.bf16 %v870_v19, %v870_v19 }
 0x157   :  { %v1175_v61 = vpack.c.bf16 %v863_v21, %v863_v21  ;;  %v864_v23 = vmax.f32 %v806_v22, 0.0 }
 0x158   :  { %1031 = vst.msk [vmem:[%s1881_s3 + $0x74] sm:$0xf] %vm1001_vm1, %v1182_v50 }
 0x159   :  { %1024 = vst.msk [vmem:[%s1881_s3 + $0x58] sm:$0xf] %vm1001_vm1, %v1175_v61  ;;  %v1176_v24 = vpack.c.bf16 %v864_v23, %v864_v23 }
 0x15b   :  { %1025 = vst.msk [vmem:[%s1881_s3 + $0x5c] sm:$0xf] %vm1001_vm1, %v1176_v24 }

// kernel: forward.11
= control target key start
LH: loop header
LB: loop body
LE: loop exit
PB: predicated region body
PF: predicated region fallthrough
CT: control target
= control target key end

     0   :  { %vm806_vm0 = vcmask 523264   ;;  %vm1498_vm1 = vcmask 519168   ;;  %s2837_s1 = inlined_call_operand.vmem [shape: bf16[576,64], index: 1, kind: input, shape index: {}]   ;;  %s2838_s0 = inlined_call_operand.vmem [shape: bf16[256,576], index: 0, kind: input, shape index: {}]   ;;  %s2839_s2 = inlined_call_operand.vmem [shape: f32[1,64], index: 2, kind: input, shape index: {}]   ;;  %s2840_s3 = inlined_call_operand.vmem [shape: bf16[256,64], index: 3, kind: output, shape index: {}]  }
   0x1   :  { %v2032_v0 = vld [vmem:[%s2837_s1 + $0x40] sm:$0xff]   ;;  %v2034_v2 = vld [vmem:[%s2837_s1 + $0x48] sm:$0xff]   ;;  %v2036_v4 = vld [vmem:[%s2837_s1 + $0x50] sm:$0xff]  }
   0x2   :  { %v2033_v1 = vld [vmem:[%s2837_s1] sm:$0xff]   ;;  %1732 = vmatprep.subr.bf16.mxu0 %v2032_v0  ;;  %2016 = vmatprep.subr.bf16.mxu1 %v2032_v0  ;;  %v2035_v3 = vld [vmem:[%s2837_s1 + $0x8] sm:$0xff]   ;;  %v2037_v5 = vld [vmem:[%s2837_s1 + $0x10] sm:$0xff]  }
   0x3   :  { %1733 = vmatpush3.bf16.msra.mxu0 %v2033_v1  ;;  %2024 = vmatpush3.bf16.msra.mxu1 %v2033_v1  ;;  %v2038_v6 = vld [vmem:[%s2837_s1 + $0x58] sm:$0xff]   ;;  %v2040_v8 = vld [vmem:[%s2837_s1 + $0x60] sm:$0xff]   ;;  %v2042_v10 = vld [vmem:[%s2837_s1 + $0x68] sm:$0xff]  }
   0x4   :  { %1734 = vmatprep.subr.bf16.mxu0 %v2034_v2  ;;  %2017 = vmatprep.subr.bf16.mxu1 %v2034_v2  ;;  %v2039_v7 = vld [vmem:[%s2837_s1 + $0x18] sm:$0xff]   ;;  %v2041_v9 = vld [vmem:[%s2837_s1 + $0x20] sm:$0xff]   ;;  %v2043_v13 = vld [vmem:[%s2837_s1 + $0x28] sm:$0xff]  }
   0x5   :  { %v2050_v11 = vld [vmem:[%s2838_s0 + $0x4] ss:$20 sps:$4 sm:$0xff]   ;;  %v2044_v14 = vld [vmem:[%s2837_s1 + $0x70] sm:$0xff]   ;;  %v2056_v23 = vld [vmem:[%s2837_s1 + $0xc8] sm:$0xff]  }
   0x6   :  { %v2053_v12 = vld [vmem:[%s2838_s0 + $0x1e4] ss:$20 sps:$4 sm:$0xff]   ;;  %887 = vmatprep.mubr.bf16.mxu0 %v2050_v11  ;;  %v2045_v15 = vld [vmem:[%s2837_s1 + $0x30] sm:$0xff]   ;;  %v2059_v24 = vld [vmem:[%s2838_s0 + $0x2c] ss:$20 sps:$4 sm:$0xff]  }
   0x7   :  { %1735 = vmatpush3.bf16.msra.mxu0 %v2035_v3  ;;  %2025 = vmatpush3.bf16.msra.mxu1 %v2035_v3  ;;  %v2046_v16 = vld [vmem:[%s2837_s1 + $0x78] sm:$0xff]   ;;  %v2054_v18 = vld [vmem:[%s2837_s1 + $0xc0] sm:$0xff]   ;;  %v2058_v26 = vld [vmem:[%s2837_s1 + $0x88] sm:$0xff]  }
   0x8   :  { %1736 = vmatprep.subr.bf16.mxu0 %v2036_v4  ;;  %2018 = vmatprep.subr.bf16.mxu1 %v2036_v4  ;;  %v2047_v17 = vld [vmem:[%s2837_s1 + $0x38] sm:$0xff]   ;;  %v2057_v19 = vld [vmem:[%s2837_s1 + $0x100] sm:$0xff]   ;;  %v2065_v28 = vld [vmem:[%s2837_s1 + $0xd0] sm:$0xff]  }
   0x9   :  { %983 = vmatprep.mubr.bf16.mxu1 %v2053_v12  ;;  %v2048_v20 = vld [vmem:[%s2838_s0] ss:$20 sps:$4 sm:$0xff]   ;;  %v2063_v27 = vld [vmem:[%s2838_s0 + $0x28] ss:$20 sps:$4 sm:$0xff]   ;;  %v2073_v36 = vld [vmem:[%s2838_s0 + $0x50] ss:$20 sps:$4 sm:$0xff]  }
   0xa   :  { %v2051_v21 = vld [vmem:[%s2838_s0 + $0x1e0] ss:$20 sps:$4 sm:$0xff]   ;;  %v2064_v29 = vld [vmem:[%s2838_s0 + $0x208] ss:$20 sps:$4 sm:$0xff]   ;;  %v2074_v38 = vld [vmem:[%s2838_s0 + $0x230] ss:$20 sps:$4 sm:$0xff]  }
   0xb   :  { %1737 = vmatpush3.bf16.msra.mxu0 %v2037_v5  ;;  %2026 = vmatpush3.bf16.msra.mxu1 %v2037_v5  ;;  %v2055_v22 = vld [vmem:[%s2837_s1 + $0x80] sm:$0xff]   ;;  %v2066_v30 = vld [vmem:[%s2837_s1 + $0x90] sm:$0xff]   ;;  %v2067_v31 = vld [vmem:[%s2837_s1 + $0xd8] sm:$0xff]  }
   0xc   :  { %1738 = vmatprep.subr.bf16.mxu0 %v2038_v6  ;;  %2019 = vmatprep.subr.bf16.mxu1 %v2038_v6  ;;  %v2061_v25 = vld [vmem:[%s2838_s0 + $0x20c] ss:$20 sps:$4 sm:$0xff]   ;;  %v2069_v32 = vld [vmem:[%s2838_s0 + $0x54] ss:$20 sps:$4 sm:$0xff]   ;;  %v2068_v34 = vld [vmem:[%s2837_s1 + $0x98] sm:$0xff]  }
   0xd   :  { %v2071_v33 = vld [vmem:[%s2838_s0 + $0x234] ss:$20 sps:$4 sm:$0xff]   ;;  %v2075_v37 = vld [vmem:[%s2837_s1 + $0xe0] sm:$0xff]   ;;  %v2079_v41 = vld [vmem:[%s2838_s0 + $0x7c] ss:$20 sps:$4 sm:$0xff]  }
   0xe   :  { %v2088_v35 = vld [vmem:[%s2837_s1 + $0x108] sm:$0xff]   ;;  %v2076_v39 = vld [vmem:[%s2837_s1 + $0xa0] sm:$0xff]   ;;  %v2081_v42 = vld [vmem:[%s2838_s0 + $0x25c] ss:$20 sps:$4 sm:$0xff]  }
   0xf   :  { %1739 = vmatpush3.bf16.msra.mxu0 %v2039_v7  ;;  %2027 = vmatpush3.bf16.msra.mxu1 %v2039_v7  ;;  %v2077_v40 = vld [vmem:[%s2837_s1 + $0xe8] sm:$0xff]   ;;  %v2085_v46 = vld [vmem:[%s2837_s1 + $0xf0] sm:$0xff]   ;;  %v2087_v49 = vld [vmem:[%s2837_s1 + $0xf8] sm:$0xff]  }
  0x10   :  { %1740 = vmatprep.subr.bf16.mxu0 %v2040_v8  ;;  %2020 = vmatprep.subr.bf16.mxu1 %v2040_v8  ;;  %v2078_v43 = vld [vmem:[%s2837_s1 + $0xa8] sm:$0xff]   ;;  %v2108_v47 = vld [vmem:[%s2837_s1 + $0x110] sm:$0xff]   ;;  %v2090_v50 = vld [vmem:[%s2838_s0 + $0xa4] ss:$20 sps:$4 sm:$0xff]  }
  0x11   :  { %v2083_v44 = vld [vmem:[%s2838_s0 + $0x78] ss:$20 sps:$4 sm:$0xff]   ;;  %v2086_v48 = vld [vmem:[%s2837_s1 + $0xb0] sm:$0xff]   ;;  %v2092_v53 = vld [vmem:[%s2838_s0 + $0x8] ss:$20 sps:$4 sm:$0xff]  }
  0x12   :  { %v2084_v45 = vld [vmem:[%s2838_s0 + $0x258] ss:$20 sps:$4 sm:$0xff]   ;;  %v2095_v54 = vld [vmem:[%s2838_s0 + $0xa0] ss:$20 sps:$4 sm:$0xff]   ;;  %v2100_v58 = vld [vmem:[%s2838_s0 + $0xc8] ss:$20 sps:$4 sm:$0xff]  }
  0x13   :  { %1741 = vmatpush3.bf16.msra.mxu0 %v2041_v9  ;;  %2028 = vmatpush3.bf16.msra.mxu1 %v2041_v9  ;;  %v2094_v51 = vld [vmem:[%s2838_s0 + $0xc] ss:$20 sps:$4 sm:$0xff]   ;;  %v2089_v52 = vld [vmem:[%s2837_s1 + $0xb8] sm:$0xff]   ;;  %v2098_v57 = vld [vmem:[%s2838_s0 + $0x34] ss:$20 sps:$4 sm:$0xff]  }
  0x14   :  { %1742 = vmatprep.subr.bf16.mxu0 %v2042_v10  ;;  %2021 = vmatprep.subr.bf16.mxu1 %v2042_v10  ;;  %v2096_v55 = vld [vmem:[%s2838_s0 + $0xcc] ss:$20 sps:$4 sm:$0xff]   ;;  %v2127_v56 = vld [vmem:[%s2837_s1 + $0x118] sm:$0xff]   ;;  %v2101_v59 = vld [vmem:[%s2838_s0 + $0x30] ss:$20 sps:$4 sm:$0xff]  }
  0x15   :  { %v2102_v60 = vld [vmem:[%s2838_s0 + $0xf4] ss:$20 sps:$4 sm:$0xff]   ;;  %v2104_v61 = vld [vmem:[%s2838_s0 + $0x5c] ss:$20 sps:$4 sm:$0xff]   ;;  %v2107_v63 = vld [vmem:[%s2838_s0 + $0x58] ss:$20 sps:$4 sm:$0xff]  }
  0x16   :  { %v2106_v62 = vld [vmem:[%s2838_s0 + $0xf0] ss:$20 sps:$4 sm:$0xff]   ;;  %v2113_v2 = vld [vmem:[%s2838_s0 + $0x118] ss:$20 sps:$4 sm:$0xff]   ;;  %v2114_v3 = vld [vmem:[%s2838_s0 + $0x80] ss:$20 sps:$4 sm:$0xff]  }
  0x17   :  { %1743 = vmatpush3.bf16.msra.mxu0 %v2043_v13  ;;  %2029 = vmatpush3.bf16.msra.mxu1 %v2043_v13  ;;  %v2109_v0 = vld [vmem:[%s2838_s0 + $0x11c] ss:$20 sps:$4 sm:$0xff]   ;;  %v2111_v1 = vld [vmem:[%s2838_s0 + $0x84] ss:$20 sps:$4 sm:$0xff]   ;;  %v2117_v5 = vld [vmem:[%s2838_s0 + $0xac] ss:$20 sps:$4 sm:$0xff]  }
  0x18   :  { %1744 = vmatprep.subr.bf16.mxu0 %v2044_v14  ;;  %2022 = vmatprep.subr.bf16.mxu1 %v2044_v14  ;;  %v2115_v4 = vld [vmem:[%s2838_s0 + $0x144] ss:$20 sps:$4 sm:$0xff]   ;;  %v2119_v6 = vld [vmem:[%s2838_s0 + $0x140] ss:$20 sps:$4 sm:$0xff]   ;;  %v2120_v7 = vld [vmem:[%s2838_s0 + $0xa8] ss:$20 sps:$4 sm:$0xff]  }
  0x19   :  { %v2121_v8 = vld [vmem:[%s2838_s0 + $0x16c] ss:$20 sps:$4 sm:$0xff]   ;;  %v2123_v9 = vld [vmem:[%s2838_s0 + $0xd4] ss:$20 sps:$4 sm:$0xff]   ;;  %v2126_v11 = vld [vmem:[%s2838_s0 + $0xd0] ss:$20 sps:$4 sm:$0xff]  }
  0x1a   :  { %v2125_v10 = vld [vmem:[%s2838_s0 + $0x168] ss:$20 sps:$4 sm:$0xff]   ;;  %v2132_v14 = vld [vmem:[%s2838_s0 + $0x190] ss:$20 sps:$4 sm:$0xff]  }
  0x1b   :  { %1745 = vmatpush3.bf16.msra.mxu0 %v2045_v15  ;;  %2030 = vmatpush3.bf16.msra.mxu1 %v2045_v15  ;;  %v2128_v12 = vld [vmem:[%s2838_s0 + $0x194] ss:$20 sps:$4 sm:$0xff]   ;;  %v2130_v13 = vld [vmem:[%s2838_s0 + $0xfc] ss:$20 sps:$4 sm:$0xff]   ;;  %v2133_v15 = vld [vmem:[%s2838_s0 + $0xf8] ss:$20 sps:$4 sm:$0xff]  }
  0x1c   :  { %1746 = vmatprep.subr.bf16.mxu0 %v2046_v16  ;;  %2023 = vmatprep.subr.bf16.mxu1 %v2046_v16  ;;  %v2134_v16 = vld [vmem:[%s2838_s0 + $0x1bc] ss:$20 sps:$4 sm:$0xff]  }
  0x1f   :  { %1747 = vmatpush3.bf16.msra.mxu0 %v2047_v17  ;;  %2031 = vmatpush3.bf16.msra.mxu1 %v2047_v17  ;;  %v2136_v17 = vld [vmem:[%s2838_s0 + $0x124] ss:$20 sps:$4 sm:$0xff]  }
  0x20   :  { %1844 = vmatprep.subr.bf16.mxu1 %v2054_v18  ;;  %1976 = vmatprep.subr.bf16.mxu0 %v2057_v19  ;;  %v2138_v18 = vld [vmem:[%s2838_s0 + $0x1b8] ss:$20 sps:$4 sm:$0xff]  }
  0x22   :  { %888 = vmatmul.mubr.bf16.vlgmr.msra.gmra.mrb[0].mxu0 %v2048_v20  ;;  %984 = vmatmul.mubr.bf16.vlgmr.msra.gmra.mrb[0].mxu1 %v2051_v21  ;;  %v2140_v20 = vld [vmem:[%s2838_s0 + $0x14c] ss:$20 sps:$4 sm:$0xff]   ;;  %v2142_v21 = vld [vmem:[%s2838_s0 + $0x10] ss:$20 sps:$4 sm:$0xff]  }
  0x23   :  { %1845 = vmatpush3.bf16.msra.mxu1 %v2055_v22  ;;  %1977 = vmatpush3.bf16.msra.mxu0 %v2057_v19  ;;  %v2139_v19 = vld [vmem:[%s2838_s0 + $0x120] ss:$20 sps:$4 sm:$0xff]   ;;  %v2143_v22 = vld [vmem:[%s2838_s0 + $0x148] ss:$20 sps:$4 sm:$0xff]  }
  0x24   :  { %1846 = vmatprep.subr.bf16.mxu1 %v2056_v23  ;;  %895 = vmatprep.mubr.bf16.mxu0 %v2059_v24  ;;  %v2144_v23 = vld [vmem:[%s2838_s0 + $0x38] ss:$20 sps:$4 sm:$0xff]   ;;  %v2145_v24 = vld [vmem:[%s2838_s0 + $0x174] ss:$20 sps:$4 sm:$0xff]  }
  0x25   :  { %991 = vmatprep.mubr.bf16.mxu1 %v2061_v25  ;;  %1978 = vmatprep.subr.bf16.mxu0 %v2088_v35  ;;  %v2147_v25 = vld [vmem:[%s2838_s0 + $0x60] ss:$20 sps:$4 sm:$0xff]  }
  0x27   :  { %1847 = vmatpush3.bf16.msra.mxu1 %v2058_v26  ;;  %1979 = vmatpush3.bf16.msra.mxu0 %v2088_v35  ;;  %v2148_v26 = vld [vmem:[%s2838_s0 + $0x170] ss:$20 sps:$4 sm:$0xff]   ;;  %v2159_v35 = vld [vmem:[%s2838_s0 + $0x128] ss:$20 sps:$4 sm:$0xff]  }
  0x28   :  { %1848 = vmatprep.subr.bf16.mxu1 %v2065_v28  ;;  %1980 = vmatprep.subr.bf16.mxu0 %v2108_v47  ;;  %v2150_v28 = vld [vmem:[%s2838_s0 + $0x19c] ss:$20 sps:$4 sm:$0xff]  }
  0x2a   :  { %896 = vmatmul.mubr.bf16.gmra.mrb[4].mxu0 %v2063_v27  ;;  %992 = vmatmul.mubr.bf16.gmra.mrb[4].mxu1 %v2064_v29  ;;  %v2149_v27 = vld [vmem:[%s2838_s0 + $0x88] ss:$20 sps:$4 sm:$0xff]   ;;  %v2152_v29 = vld [vmem:[%s2838_s0 + $0xb0] ss:$20 sps:$4 sm:$0xff]  }
  0x2b   :  { %1849 = vmatpush3.bf16.msra.mxu1 %v2066_v30  ;;  %903 = vmatprep.mubr.bf16.mxu0 %v2069_v32  ;;  %v2153_v30 = vld [vmem:[%s2838_s0 + $0x198] ss:$20 sps:$4 sm:$0xff]  }
  0x2c   :  { %1850 = vmatprep.subr.bf16.mxu1 %v2067_v31  ;;  %999 = vmatprep.mubr.bf16.mxu1 %v2071_v33  ;;  %v2154_v31 = vld [vmem:[%s2838_s0 + $0xd8] ss:$20 sps:$4 sm:$0xff]   ;;  %v2157_v33 = vld [vmem:[%s2838_s0 + $0x100] ss:$20 sps:$4 sm:$0xff]  }
  0x2d   :  { %1981 = vmatpush3.bf16.msra.mxu0 %v2108_v47  ;;  %v2155_v32 = vld [vmem:[%s2838_s0 + $0x1c4] ss:$20 sps:$4 sm:$0xff]  }
  0x2e   :  { %1982 = vmatprep.subr.bf16.mxu0 %v2127_v56  ;;  %v2174_v47 = vld [vmem:[%s2838_s0 + $0x218] ss:$20 sps:$4 sm:$0xff]  }
  0x2f   :  { %1851 = vmatpush3.bf16.msra.mxu1 %v2068_v34  ;;  %v2158_v34 = vld [vmem:[%s2838_s0 + $0x1c0] ss:$20 sps:$4 sm:$0xff]  }
  0x30   :  { %1852 = vmatprep.subr.bf16.mxu1 %v2075_v37  ;;  %v2162_v37 = vld [vmem:[%s2838_s0 + $0x150] ss:$20 sps:$4 sm:$0xff]  }
  0x31   :  { %1983 = vmatpush3.bf16.msra.mxu0 %v2127_v56 }
  0x32   :  { %904 = vmatmul.mubr.bf16.gmra.mrb[8].mxu0 %v2073_v36  ;;  %1000 = vmatmul.mubr.bf16.gmra.mrb[8].mxu1 %v2074_v38  ;;  %v2160_v36 = vld [vmem:[%s2838_s0 + $0x1ec] ss:$20 sps:$4 sm:$0xff]   ;;  %v2163_v38 = vld [vmem:[%s2838_s0 + $0x1e8] ss:$20 sps:$4 sm:$0xff]  }
  0x33   :  { %1853 = vmatpush3.bf16.msra.mxu1 %v2076_v39  ;;  %911 = vmatprep.mubr.bf16.mxu0 %v2079_v41  ;;  %v2164_v39 = vld [vmem:[%s2838_s0 + $0x178] ss:$20 sps:$4 sm:$0xff]   ;;  %v2167_v41 = vld [vmem:[%s2838_s0 + $0x1a0] ss:$20 sps:$4 sm:$0xff]  }
  0x34   :  { %1854 = vmatprep.subr.bf16.mxu1 %v2077_v40  ;;  %1007 = vmatprep.mubr.bf16.mxu1 %v2081_v42  ;;  %v2165_v40 = vld [vmem:[%s2838_s0 + $0x214] ss:$20 sps:$4 sm:$0xff]   ;;  %v2168_v42 = vld [vmem:[%s2838_s0 + $0x210] ss:$20 sps:$4 sm:$0xff]  }
  0x37   :  { %1855 = vmatpush3.bf16.msra.mxu1 %v2078_v43  ;;  %v2169_v43 = vld [vmem:[%s2838_s0 + $0x1c8] ss:$20 sps:$4 sm:$0xff]  }
  0x38   :  { %1856 = vmatprep.subr.bf16.mxu1 %v2085_v46  ;;  %v2173_v46 = vld [vmem:[%s2838_s0 + $0x238] ss:$20 sps:$4 sm:$0xff]  }
  0x3a   :  { %912 = vmatmul.mubr.bf16.gmra.mrb[12].mxu0 %v2083_v44  ;;  %1008 = vmatmul.mubr.bf16.gmra.mrb[12].mxu1 %v2084_v45  ;;  %v2170_v44 = vld [vmem:[%s2838_s0 + $0x23c] ss:$20 sps:$4 sm:$0xff]  }
  0x3b   :  { %1857 = vmatpush3.bf16.msra.mxu1 %v2086_v48  ;;  %919 = vmatprep.mubr.bf16.mxu0 %v2090_v50  ;;  %v2172_v45 = vld [vmem:[%s2838_s0 + $0x1f0] ss:$20 sps:$4 sm:$0xff]   ;;  %v2178_v50 = vld [vmem:[%s2838_s0 + $0x260] ss:$20 sps:$4 sm:$0xff]  }
  0x3c   :  { %1858 = vmatprep.subr.bf16.mxu1 %v2087_v49  ;;  %1048 = vmatprep.mubr.bf16.mxu1 %v2094_v51  ;;  %v2175_v48 = vld [vmem:[%s2838_s0 + $0x264] ss:$20 sps:$4 sm:$0xff]   ;;  %v2177_v49 = vld [vmem:[%s2838_s0 + $0x240] ss:$20 sps:$4 sm:$0xff]   ;;  %v2179_v51 = vld [vmem:[%s2838_s0 + $0x268] ss:$20 sps:$4 sm:$0xff]  }
  0x3f   :  { %1859 = vmatpush3.bf16.msra.mxu1 %v2089_v52 }
  0x42   :  { %920 = vmatmul.mubr.bf16.gmra.mrb[16].mxu0 %v2095_v54  ;;  %1049 = vmatmul.mubr.bf16.vlgmr.msra.gmra.mrb[16].mxu1 %v2092_v53 }
  0x43   :  { %927 = vmatprep.mubr.bf16.mxu0 %v2096_v55  ;;  %1056 = vmatprep.mubr.bf16.mxu1 %v2098_v57 }
  0x4a   :  { %928 = vmatmul.mubr.bf16.gmra.mrb[20].mxu0 %v2100_v58  ;;  %1057 = vmatmul.mubr.bf16.gmra.mrb[20].mxu1 %v2101_v59 }
  0x4b   :  { %935 = vmatprep.mubr.bf16.mxu0 %v2102_v60  ;;  %1064 = vmatprep.mubr.bf16.mxu1 %v2104_v61 }
  0x52   :  { %936 = vmatmul.mubr.bf16.gmra.mrb[24].mxu0 %v2106_v62  ;;  %1065 = vmatmul.mubr.bf16.gmra.mrb[24].mxu1 %v2107_v63 }
  0x53   :  { %943 = vmatprep.mubr.bf16.mxu0 %v2109_v0  ;;  %1072 = vmatprep.mubr.bf16.mxu1 %v2111_v1 }
  0x5a   :  { %944 = vmatmul.mubr.bf16.gmra.mrb[28].mxu0 %v2113_v2  ;;  %1073 = vmatmul.mubr.bf16.gmra.mrb[28].mxu1 %v2114_v3 }
  0x5b   :  { %951 = vmatprep.mubr.bf16.mxu0 %v2115_v4  ;;  %1080 = vmatprep.mubr.bf16.mxu1 %v2117_v5 }
  0x62   :  { %952 = vmatmul.mubr.bf16.gmra.mrb[32].mxu0 %v2119_v6  ;;  %1081 = vmatmul.mubr.bf16.gmra.mrb[32].mxu1 %v2120_v7 }
  0x63   :  { %959 = vmatprep.mubr.bf16.mxu0 %v2121_v8  ;;  %1088 = vmatprep.mubr.bf16.mxu1 %v2123_v9 }
  0x6a   :  { %960 = vmatmul.mubr.bf16.gmra.mrb[36].mxu0 %v2125_v10  ;;  %1089 = vmatmul.mubr.bf16.gmra.mrb[36].mxu1 %v2126_v11 }
  0x6b   :  { %967 = vmatprep.mubr.bf16.mxu0 %v2128_v12  ;;  %1096 = vmatprep.mubr.bf16.mxu1 %v2130_v13 }
  0x72   :  { %968 = vmatmul.mubr.bf16.gmra.mrb[40].mxu0 %v2132_v14  ;;  %1097 = vmatmul.mubr.bf16.gmra.mrb[40].mxu1 %v2133_v15 }
  0x73   :  { %975 = vmatprep.mubr.bf16.mxu0 %v2134_v16  ;;  %1104 = vmatprep.mubr.bf16.mxu1 %v2136_v17 }
  0x7a   :  { %976 = vmatmul.mubr.bf16.gmra.mrb[44].mxu0 %v2138_v18  ;;  %1105 = vmatmul.mubr.bf16.gmra.mrb[44].mxu1 %v2139_v19 }
  0x7b   :  { %1112 = vmatprep.mubr.bf16.mxu1 %v2140_v20  ;;  %1984 = vmatprep.mubr.msk.bf16.mxu0 %vm806_vm0, %v2142_v21 }
  0x82   :  { %1113 = vmatmul.mubr.bf16.gmra.mrb[48].mxu1 %v2143_v22  ;;  %1985 = vmatmul.mubr.msk.bf16.vlgmr.msra.gmra.mrb[48].mxu0 %vm806_vm0, %v2144_v23 }
  0x83   :  { %1120 = vmatprep.mubr.bf16.mxu1 %v2145_v24  ;;  %1988 = vmatprep.mubr.msk.bf16.mxu0 %vm806_vm0, %v2147_v25 }
  0x8a   :  { %1121 = vmatmul.mubr.bf16.gmra.mrb[52].mxu1 %v2148_v26  ;;  %1989 = vmatmul.mubr.msk.bf16.gmra.mrb[52].mxu0 %vm806_vm0, %v2149_v27 }
  0x8b   :  { %1128 = vmatprep.mubr.bf16.mxu1 %v2150_v28  ;;  %1992 = vmatprep.mubr.msk.bf16.mxu0 %vm806_vm0, %v2152_v29 }
  0x92   :  { %1129 = vmatmul.mubr.bf16.gmra.mrb[56].mxu1 %v2153_v30  ;;  %1993 = vmatmul.mubr.msk.bf16.gmra.mrb[56].mxu0 %vm806_vm0, %v2154_v31 }
  0x93   :  { %1136 = vmatprep.mubr.bf16.mxu1 %v2155_v32  ;;  %1996 = vmatprep.mubr.msk.bf16.mxu0 %vm806_vm0, %v2157_v33 }
  0x9a   :  { %1137 = vmatmul.mubr.bf16.gmra.mrb[60].mxu1 %v2158_v34  ;;  %1997 = vmatmul.mubr.msk.bf16.gmra.mrb[60].mxu0 %vm806_vm0, %v2159_v35 }
  0x9b   :  { %1144 = vmatprep.mubr.bf16.mxu1 %v2160_v36  ;;  %2000 = vmatprep.mubr.msk.bf16.mxu0 %vm806_vm0, %v2162_v37 }
  0xa2   :  { %1145 = vmatmul.mubr.bf16.gmra.mrb[64].mxu1 %v2163_v38  ;;  %2001 = vmatmul.mubr.msk.bf16.gmra.mrb[64].mxu0 %vm806_vm0, %v2164_v39  ;;  %v2583_v38 = vld [vmem:[%s2839_s2] ss:$0 sm:$0xff] }
  0xa3   :  { %1152 = vmatprep.mubr.bf16.mxu1 %v2165_v40  ;;  %2004 = vmatprep.mubr.msk.bf16.mxu0 %vm806_vm0, %v2167_v41 }
  0xaa   :  { %1153 = vmatmul.mubr.bf16.gmra.mrb[68].mxu1 %v2168_v42  ;;  %2005 = vmatmul.mubr.msk.bf16.gmra.mrb[68].mxu0 %vm806_vm0, %v2169_v43 }
  0xab   :  { %1160 = vmatprep.mubr.bf16.mxu1 %v2170_v44  ;;  %2008 = vmatprep.mubr.msk.bf16.mxu0 %vm806_vm0, %v2172_v45 }
  0xb2   :  { %1161 = vmatmul.mubr.bf16.gmra.mrb[72].mxu1 %v2173_v46  ;;  %2009 = vmatmul.mubr.msk.bf16.gmra.mrb[72].mxu0 %vm806_vm0, %v2174_v47 }
  0xb3   :  { %1168 = vmatprep.mubr.bf16.mxu1 %v2175_v48  ;;  %2012 = vmatprep.mubr.msk.bf16.mxu0 %vm806_vm0, %v2177_v49 }
  0xba   :  { %1169 = vmatmul.mubr.bf16.gmra.mrb[76].mxu1 %v2178_v50  ;;  %2013 = vmatmul.mubr.msk.bf16.gmra.mrb[76].mxu0 %vm806_vm0, %v2179_v51 }
  0xf5   :  { %v1820_v52 = vpop.f32.mrb[0].mxu1  ;;  %v1748_v53 = vpop.f32.mrb[0].mxu0 }
  0xf6   :  { %v1821_v54 = vpop.f32.mrb[1].mxu1  ;;  %v1749_v55 = vpop.f32.mrb[1].mxu0 }
  0xf7   :  { %v2564_v56 = vadd.f32 %v1821_v54, %v1820_v52  ;;  %v1823_v57 = vpop.f32.mrb[2].mxu1  ;;  %v1750_v58 = vadd.f32 %v1749_v55, %v1748_v53  ;;  %v1751_v59 = vpop.f32.mrb[2].mxu0 }
  0xf8   :  { %v1824_v60 = vpop.f32.mrb[3].mxu1  ;;  %v1752_v61 = vpop.f32.mrb[3].mxu0 }
  0xf9   :  { %v2566_v62 = vadd.f32 %v1824_v60, %v1823_v57  ;;  %v1753_v63 = vadd.f32 %v1752_v61, %v1751_v59  ;;  %v890_v41 = vadd.f32 %v1750_v58, %v2583_v38 }
  0xfb   :  { %v893_v48 = vadd.f32 %v1753_v63, %v2583_v38 }
  0xfd   :  { %v1826_v0 = vpop.f32.mrb[4].mxu1  ;;  %v1754_v1 = vpop.f32.mrb[4].mxu0 }
  0xfe   :  { %v1827_v2 = vpop.f32.mrb[5].mxu1  ;;  %v1755_v3 = vpop.f32.mrb[5].mxu0 }
  0xff   :  { %v2568_v4 = vadd.f32 %v1827_v2, %v1826_v0  ;;  %v1829_v5 = vpop.f32.mrb[6].mxu1  ;;  %v1756_v6 = vadd.f32 %v1755_v3, %v1754_v1  ;;  %v1757_v7 = vpop.f32.mrb[6].mxu0 }
 0x100   :  { %v1830_v8 = vpop.f32.mrb[7].mxu1  ;;  %v1758_v9 = vpop.f32.mrb[7].mxu0 }
 0x101   :  { %v2570_v10 = vadd.f32 %v1830_v8, %v1829_v5  ;;  %v1759_v11 = vadd.f32 %v1758_v9, %v1757_v7  ;;  %v898_v58 = vadd.f32 %v1756_v6, %v2583_v38 }
 0x103   :  { %v901_v63 = vadd.f32 %v1759_v11, %v2583_v38 }
 0x105   :  { %v1832_v12 = vpop.f32.mrb[8].mxu1  ;;  %v1760_v13 = vpop.f32.mrb[8].mxu0 }
 0x106   :  { %v1833_v14 = vpop.f32.mrb[9].mxu1  ;;  %v1761_v15 = vpop.f32.mrb[9].mxu0 }
 0x107   :  { %v2572_v16 = vadd.f32 %v1833_v14, %v1832_v12  ;;  %v1835_v17 = vpop.f32.mrb[10].mxu1  ;;  %v1762_v18 = vadd.f32 %v1761_v15, %v1760_v13  ;;  %v1763_v19 = vpop.f32.mrb[10].mxu0 }
 0x108   :  { %v1836_v20 = vpop.f32.mrb[11].mxu1  ;;  %v1764_v21 = vpop.f32.mrb[11].mxu0 }
 0x109   :  { %v2574_v22 = vadd.f32 %v1836_v20, %v1835_v17  ;;  %v1765_v23 = vadd.f32 %v1764_v21, %v1763_v19  ;;  %v906_v6 = vadd.f32 %v1762_v18, %v2583_v38 }
 0x10b   :  { %v909_v11 = vadd.f32 %v1765_v23, %v2583_v38 }
 0x10d   :  { %v1838_v24 = vpop.f32.mrb[12].mxu1  ;;  %v1766_v25 = vpop.f32.mrb[12].mxu0 }
 0x10e   :  { %v1839_v26 = vpop.f32.mrb[13].mxu1  ;;  %v1767_v27 = vpop.f32.mrb[13].mxu0 }
 0x10f   :  { %v2576_v28 = vadd.f32 %v1839_v26, %v1838_v24  ;;  %v1841_v29 = vpop.f32.mrb[14].mxu1  ;;  %v1768_v30 = vadd.f32 %v1767_v27, %v1766_v25  ;;  %v1769_v31 = vpop.f32.mrb[14].mxu0 }
 0x110   :  { %v1842_v32 = vpop.f32.mrb[15].mxu1  ;;  %v1770_v33 = vpop.f32.mrb[15].mxu0 }
 0x111   :  { %v2578_v34 = vadd.f32 %v1842_v32, %v1841_v29  ;;  %v1771_v35 = vadd.f32 %v1770_v33, %v1769_v31  ;;  %v914_v18 = vadd.f32 %v1768_v30, %v2583_v38 }
 0x113   :  { %v917_v23 = vadd.f32 %v1771_v35, %v2583_v38 }
 0x115   :  { %v1860_v36 = vpop.f32.mrb[16].mxu1  ;;  %v1772_v37 = vpop.f32.mrb[16].mxu0 }
 0x116   :  { %v1861_v39 = vpop.f32.mrb[17].mxu1  ;;  %v1773_v40 = vpop.f32.mrb[17].mxu0 }
 0x117   :  { %v1862_v42 = vadd.f32 %v1861_v39, %v1860_v36  ;;  %v1863_v43 = vpop.f32.mrb[18].mxu1  ;;  %v1774_v44 = vadd.f32 %v1773_v40, %v1772_v37  ;;  %v1775_v45 = vpop.f32.mrb[18].mxu0 }
 0x118   :  { %v1864_v46 = vpop.f32.mrb[19].mxu1  ;;  %v1776_v47 = vpop.f32.mrb[19].mxu0 }
 0x119   :  { %v1865_v49 = vadd.f32 %v1864_v46, %v1863_v43  ;;  %v1777_v50 = vadd.f32 %v1776_v47, %v1775_v45  ;;  %v2587_v51 = vadd.f32 %v1862_v42, %v890_v41  ;;  %v922_v30 = vadd.f32 %v1774_v44, %v2583_v38 }
 0x11b   :  { %v2589_v52 = vadd.f32 %v1865_v49, %v893_v48  ;;  %v925_v35 = vadd.f32 %v1777_v50, %v2583_v38 }
 0x11d   :  { %v1866_v53 = vpop.f32.mrb[20].mxu1  ;;  %v1778_v54 = vpop.f32.mrb[20].mxu0 }
 0x11e   :  { %v1867_v55 = vpop.f32.mrb[21].mxu1  ;;  %v1779_v57 = vpop.f32.mrb[21].mxu0 }
 0x11f   :  { %v1868_v59 = vadd.f32 %v1867_v55, %v1866_v53  ;;  %v1869_v60 = vpop.f32.mrb[22].mxu1  ;;  %v1780_v61 = vadd.f32 %v1779_v57, %v1778_v54  ;;  %v1781_v0 = vpop.f32.mrb[22].mxu0 }
 0x120   :  { %v1870_v1 = vpop.f32.mrb[23].mxu1  ;;  %v1782_v2 = vpop.f32.mrb[23].mxu0 }
 0x121   :  { %v1871_v3 = vadd.f32 %v1870_v1, %v1869_v60  ;;  %v1783_v5 = vadd.f32 %v1782_v2, %v1781_v0  ;;  %v2593_v7 = vadd.f32 %v1868_v59, %v898_v58  ;;  %v930_v44 = vadd.f32 %v1780_v61, %v2583_v38 }
 0x123   :  { %v2595_v8 = vadd.f32 %v1871_v3, %v901_v63  ;;  %v933_v50 = vadd.f32 %v1783_v5, %v2583_v38 }
 0x125   :  { %v1872_v9 = vpop.f32.mrb[24].mxu1  ;;  %v1784_v12 = vpop.f32.mrb[24].mxu0 }
 0x126   :  { %v1873_v13 = vpop.f32.mrb[25].mxu1  ;;  %v1785_v14 = vpop.f32.mrb[25].mxu0 }
 0x127   :  { %v1874_v15 = vadd.f32 %v1873_v13, %v1872_v9  ;;  %v1875_v17 = vpop.f32.mrb[26].mxu1  ;;  %v1786_v19 = vadd.f32 %v1785_v14, %v1784_v12  ;;  %v1787_v20 = vpop.f32.mrb[26].mxu0 }
 0x128   :  { %v1876_v21 = vpop.f32.mrb[27].mxu1  ;;  %v1788_v24 = vpop.f32.mrb[27].mxu0 }
 0x129   :  { %v1877_v25 = vadd.f32 %v1876_v21, %v1875_v17  ;;  %v1789_v26 = vadd.f32 %v1788_v24, %v1787_v20  ;;  %v2599_v27 = vadd.f32 %v1874_v15, %v906_v6 }
 0x12b   :  { %v2601_v29 = vadd.f32 %v1877_v25, %v909_v11 }
 0x12d   :  { %v1878_v31 = vpop.f32.mrb[28].mxu1  ;;  %v1790_v32 = vpop.f32.mrb[28].mxu0 }
 0x12e   :  { %v1879_v33 = vpop.f32.mrb[29].mxu1  ;;  %v1791_v36 = vpop.f32.mrb[29].mxu0 }
 0x12f   :  { %v1880_v37 = vadd.f32 %v1879_v33, %v1878_v31  ;;  %v1881_v39 = vpop.f32.mrb[30].mxu1  ;;  %v1792_v40 = vadd.f32 %v1791_v36, %v1790_v32  ;;  %v1793_v41 = vpop.f32.mrb[30].mxu0 }
 0x130   :  { %v1882_v42 = vpop.f32.mrb[31].mxu1  ;;  %v1794_v43 = vpop.f32.mrb[31].mxu0 }
 0x131   :  { %v1883_v45 = vadd.f32 %v1882_v42, %v1881_v39  ;;  %v1795_v46 = vadd.f32 %v1794_v43, %v1793_v41  ;;  %v2605_v47 = vadd.f32 %v1880_v37, %v914_v18  ;;  %v938_v39 = vadd.f32 %v1786_v19, %v2583_v38 }
 0x133   :  { %v2607_v48 = vadd.f32 %v1883_v45, %v917_v23 }
 0x135   :  { %v1884_v49 = vpop.f32.mrb[32].mxu1  ;;  %v1796_v53 = vpop.f32.mrb[32].mxu0 }
 0x136   :  { %v1885_v54 = vpop.f32.mrb[33].mxu1  ;;  %v1797_v55 = vpop.f32.mrb[33].mxu0 }
 0x137   :  { %v1886_v57 = vadd.f32 %v1885_v54, %v1884_v49  ;;  %v1887_v58 = vpop.f32.mrb[34].mxu1  ;;  %v1798_v59 = vadd.f32 %v1797_v55, %v1796_v53  ;;  %v1799_v60 = vpop.f32.mrb[34].mxu0  ;;  %v941_v49 = vadd.f32 %v1789_v26, %v2583_v38 }
 0x138   :  { %v1888_v0 = vpop.f32.mrb[35].mxu1  ;;  %v1800_v1 = vpop.f32.mrb[35].mxu0 }
 0x139   :  { %v1889_v2 = vadd.f32 %v1888_v0, %v1887_v58  ;;  %v1801_v63 = vadd.f32 %v1800_v1, %v1799_v60  ;;  %v2611_v3 = vadd.f32 %v1886_v57, %v922_v30  ;;  %v946_v0 = vadd.f32 %v1792_v40, %v2583_v38 }
 0x13b   :  { %v2613_v9 = vadd.f32 %v1889_v2, %v925_v35 }
 0x13d   :  { %v1890_v12 = vpop.f32.mrb[36].mxu1  ;;  %v1802_v13 = vpop.f32.mrb[36].mxu0 }
 0x13e   :  { %v1891_v14 = vpop.f32.mrb[37].mxu1  ;;  %v1803_v6 = vpop.f32.mrb[37].mxu0 }
 0x13f   :  { %v1892_v15 = vadd.f32 %v1891_v14, %v1890_v12  ;;  %v1893_v17 = vpop.f32.mrb[38].mxu1  ;;  %v2616_v20 = vadd.f32 %v1803_v6, %v1802_v13  ;;  %v1805_v21 = vpop.f32.mrb[38].mxu0  ;;  %v949_v14 = vadd.f32 %v1795_v46, %v2583_v38 }
 0x140   :  { %v1894_v24 = vpop.f32.mrb[39].mxu1  ;;  %v1806_v11 = vpop.f32.mrb[39].mxu0 }
 0x141   :  { %v1895_v25 = vadd.f32 %v1894_v24, %v1893_v17  ;;  %v2619_v31 = vadd.f32 %v1806_v11, %v1805_v21  ;;  %v2621_v32 = vadd.f32 %v1892_v15, %v930_v44 }
 0x143   :  { %v2623_v33 = vadd.f32 %v1895_v25, %v933_v50  ;;  %v954_v25 = vadd.f32 %v1798_v59, %v2583_v38 }
 0x145   :  { %v1896_v36 = vpop.f32.mrb[40].mxu1  ;;  %v1808_v18 = vpop.f32.mrb[40].mxu0 }
 0x146   :  { %v1897_v37 = vpop.f32.mrb[41].mxu1  ;;  %v1809_v61 = vpop.f32.mrb[41].mxu0 }
 0x147   :  { %v1898_v41 = vadd.f32 %v1897_v37, %v1896_v36  ;;  %v1899_v42 = vpop.f32.mrb[42].mxu1  ;;  %v2626_v43 = vadd.f32 %v1809_v61, %v1808_v18  ;;  %v1811_v23 = vpop.f32.mrb[42].mxu0  ;;  %v957_v61 = vadd.f32 %v1801_v63, %v2583_v38 }
 0x148   :  { %v1900_v45 = vpop.f32.mrb[43].mxu1  ;;  %v1812_v5 = vpop.f32.mrb[43].mxu0 }
 0x149   :  { %v1901_v53 = vadd.f32 %v1900_v45, %v1899_v42  ;;  %v2629_v54 = vadd.f32 %v1812_v5, %v1811_v23  ;;  %v2631_v55 = vadd.f32 %v1898_v41, %v938_v39 }
 0x14b   :  { %v2633_v30 = vadd.f32 %v1901_v53, %v941_v49 }
 0x14d   :  { %v1902_v57 = vpop.f32.mrb[44].mxu1  ;;  %v1814_v58 = vpop.f32.mrb[44].mxu0 }
 0x14e   :  { %v1903_v60 = vpop.f32.mrb[45].mxu1  ;;  %v1815_v19 = vpop.f32.mrb[45].mxu0 }
 0x14f   :  { %v1904_v1 = vadd.f32 %v1903_v60, %v1902_v57  ;;  %v1905_v35 = vpop.f32.mrb[46].mxu1  ;;  %v2636_v2 = vadd.f32 %v1815_v19, %v1814_v58  ;;  %v1817_v12 = vpop.f32.mrb[46].mxu0 }
 0x150   :  { %v1906_v13 = vpop.f32.mrb[47].mxu1  ;;  %v1818_v26 = vpop.f32.mrb[47].mxu0 }
 0x151   :  { %v1907_v6 = vadd.f32 %v1906_v13, %v1905_v35  ;;  %v2639_v44 = vadd.f32 %v1818_v26, %v1817_v12  ;;  %v2641_v15 = vadd.f32 %v1904_v1, %v946_v0  ;;  %v962_v35 = vadd.f32 %v2616_v20, %v2583_v38 }
 0x153   :  { %v2643_v17 = vadd.f32 %v1907_v6, %v949_v14  ;;  %v965_v6 = vadd.f32 %v2619_v31, %v2583_v38 }
 0x155   :  { %v1908_v21 = vpop.f32.mrb[48].mxu1  ;;  %v1986_v24 = vpop.f32.mrb[48].mxu0 }
 0x156   :  { %v1220_v40 = vadd.f32 %v1986_v24, %v2593_v7  ;;  %v1909_v11 = vpop.f32.mrb[49].mxu1  ;;  %v1211_v50 = vpop.f32.mrb[49].mxu0 }
 0x157   :  { %v1910_v36 = vadd.f32 %v1909_v11, %v1908_v21  ;;  %v1212_v18 = vadd.f32 %v1211_v50, %v2587_v51  ;;  %v1911_v37 = vpop.f32.mrb[50].mxu1  ;;  %v1987_v46 = vpop.f32.mrb[50].mxu0 }
 0x158   :  { %v1340_v39 = vmax.f32 %v1220_v40, 0.0  ;;  %v1223_v41 = vadd.f32 %v1987_v46, %v2595_v8  ;;  %v1912_v42 = vpop.f32.mrb[51].mxu1  ;;  %v1214_v23 = vpop.f32.mrb[51].mxu0 }
 0x159   :  { %v1338_v45 = vmax.f32 %v1212_v18, 0.0  ;;  %v1913_v5 = vadd.f32 %v1912_v42, %v1911_v37  ;;  %v1215_v7 = vadd.f32 %v1214_v23, %v2589_v52  ;;  %v2651_v49 = vadd.f32 %v1910_v36, %v954_v25 }
 0x15a   :  { %v1702_v59 = vpack.c.bf16 %v1340_v39, %v1340_v39  ;;  %v1341_v53 = vmax.f32 %v1223_v41, 0.0  ;;  %v970_v23 = vadd.f32 %v2626_v43, %v2583_v38 }
 0x15b   :  { %v1700_v57 = vpack.c.bf16 %v1338_v45, %v1338_v45  ;;  %v1339_v51 = vmax.f32 %v1215_v7, 0.0  ;;  %v2653_v58 = vadd.f32 %v1913_v5, %v957_v61 }
 0x15c   :  { %1501 = vst.msk [vmem:[%s2840_s3 + $0x8] sm:$0xf] %vm1498_vm1, %v1702_v59  ;;  %v1703_v8 = vpack.c.bf16 %v1341_v53, %v1341_v53  ;;  %v973_v53 = vadd.f32 %v2629_v54, %v2583_v38 }
 0x15d   :  { %1499 = vst.msk [vmem:[%s2840_s3] sm:$0xf] %vm1498_vm1, %v1700_v57  ;;  %v1701_v52 = vpack.c.bf16 %v1339_v51, %v1339_v51  ;;  %v1914_v63 = vpop.f32.mrb[52].mxu1  ;;  %v1990_v60 = vpop.f32.mrb[52].mxu0 }
 0x15e   :  { %1502 = vst.msk [vmem:[%s2840_s3 + $0xc] sm:$0xf] %vm1498_vm1, %v1703_v8  ;;  %v1236_v19 = vadd.f32 %v1990_v60, %v2605_v47  ;;  %v1915_v0 = vpop.f32.mrb[53].mxu1  ;;  %v1227_v1 = vpop.f32.mrb[53].mxu0 }
 0x15f   :  { %1500 = vst.msk [vmem:[%s2840_s3 + $0x4] sm:$0xf] %vm1498_vm1, %v1701_v52  ;;  %v1916_v12 = vadd.f32 %v1915_v0, %v1914_v63  ;;  %v1228_v13 = vadd.f32 %v1227_v1, %v2599_v27  ;;  %v1917_v26 = vpop.f32.mrb[54].mxu1  ;;  %v1991_v14 = vpop.f32.mrb[54].mxu0 }
 0x160   :  { %v1344_v21 = vmax.f32 %v1236_v19, 0.0  ;;  %v1239_v47 = vadd.f32 %v1991_v14, %v2607_v48  ;;  %v1918_v24 = vpop.f32.mrb[55].mxu1  ;;  %v1230_v40 = vpop.f32.mrb[55].mxu0 }
 0x161   :  { %v1342_v11 = vmax.f32 %v1228_v13, 0.0  ;;  %v1919_v20 = vadd.f32 %v1918_v24, %v1917_v26  ;;  %v1231_v50 = vadd.f32 %v1230_v40, %v2601_v29  ;;  %v2679_v25 = vadd.f32 %v1916_v12, %v962_v35 }
 0x162   :  { %v1706_v36 = vpack.c.bf16 %v1344_v21, %v1344_v21  ;;  %v1345_v18 = vmax.f32 %v1239_v47, 0.0 }
 0x163   :  { %v1704_v37 = vpack.c.bf16 %v1342_v11, %v1342_v11  ;;  %v1343_v27 = vmax.f32 %v1231_v50, 0.0  ;;  %v2681_v46 = vadd.f32 %v1919_v20, %v965_v6  ;;  %v978_v6 = vadd.f32 %v2636_v2, %v2583_v38 }
 0x164   :  { %1505 = vst.msk [vmem:[%s2840_s3 + $0x18] sm:$0xf] %vm1498_vm1, %v1706_v36  ;;  %v1707_v48 = vpack.c.bf16 %v1345_v18, %v1345_v18  ;;  %v981_v11 = vadd.f32 %v2639_v44, %v2583_v38 }
 0x165   :  { %1503 = vst.msk [vmem:[%s2840_s3 + $0x10] sm:$0xf] %vm1498_vm1, %v1704_v37  ;;  %v1705_v29 = vpack.c.bf16 %v1343_v27, %v1343_v27  ;;  %v1920_v31 = vpop.f32.mrb[56].mxu1  ;;  %v1994_v61 = vpop.f32.mrb[56].mxu0 }
 0x166   :  { %1506 = vst.msk [vmem:[%s2840_s3 + $0x1c] sm:$0xf] %vm1498_vm1, %v1707_v48  ;;  %v1252_v39 = vadd.f32 %v1994_v61, %v2621_v32  ;;  %v1921_v41 = vpop.f32.mrb[57].mxu1  ;;  %v1243_v42 = vpop.f32.mrb[57].mxu0 }
 0x167   :  { %1504 = vst.msk [vmem:[%s2840_s3 + $0x14] sm:$0xf] %vm1498_vm1, %v1705_v29  ;;  %v1922_v45 = vadd.f32 %v1921_v41, %v1920_v31  ;;  %v1244_v5 = vadd.f32 %v1243_v42, %v2611_v3  ;;  %v1923_v7 = vpop.f32.mrb[58].mxu1  ;;  %v1995_v59 = vpop.f32.mrb[58].mxu0 }
 0x168   :  { %v1348_v57 = vmax.f32 %v1252_v39, 0.0  ;;  %v1255_v32 = vadd.f32 %v1995_v59, %v2623_v33  ;;  %v1924_v51 = vpop.f32.mrb[59].mxu1  ;;  %v1246_v8 = vpop.f32.mrb[59].mxu0 }
 0x169   :  { %v1346_v52 = vmax.f32 %v1244_v5, 0.0  ;;  %v1925_v43 = vadd.f32 %v1924_v51, %v1923_v7  ;;  %v1247_v63 = vadd.f32 %v1246_v8, %v2613_v9  ;;  %v2707_v60 = vadd.f32 %v1922_v45, %v970_v23 }
 0x16a   :  { %v1710_v19 = vpack.c.bf16 %v1348_v57, %v1348_v57  ;;  %v1349_v0 = vmax.f32 %v1255_v32, 0.0  ;;  %v986_v45 = vadd.f32 %v2564_v56, %v2583_v38  ;;  %v989_v57 = vadd.f32 %v2566_v62, %v2583_v38 }
 0x16b   :  { %v1708_v1 = vpack.c.bf16 %v1346_v52, %v1346_v52  ;;  %v1347_v3 = vmax.f32 %v1247_v63, 0.0  ;;  %v2709_v35 = vadd.f32 %v1925_v43, %v973_v53 }
 0x16c   :  { %1509 = vst.msk [vmem:[%s2840_s3 + $0x28] sm:$0xf] %vm1498_vm1, %v1710_v19  ;;  %v1711_v33 = vpack.c.bf16 %v1349_v0, %v1349_v0 }
 0x16d   :  { %1507 = vst.msk [vmem:[%s2840_s3 + $0x20] sm:$0xf] %vm1498_vm1, %v1708_v1  ;;  %v1709_v9 = vpack.c.bf16 %v1347_v3, %v1347_v3  ;;  %v1926_v54 = vpop.f32.mrb[60].mxu1  ;;  %v1998_v12 = vpop.f32.mrb[60].mxu0 }
 0x16e   :  { %1510 = vst.msk [vmem:[%s2840_s3 + $0x2c] sm:$0xf] %vm1498_vm1, %v1711_v33  ;;  %v1268_v13 = vadd.f32 %v1998_v12, %v2641_v15  ;;  %v1927_v26 = vpop.f32.mrb[61].mxu1  ;;  %v1259_v14 = vpop.f32.mrb[61].mxu0 }
 0x16f   :  { %1508 = vst.msk [vmem:[%s2840_s3 + $0x24] sm:$0xf] %vm1498_vm1, %v1709_v9  ;;  %v1928_v21 = vadd.f32 %v1927_v26, %v1926_v54  ;;  %v1260_v47 = vadd.f32 %v1259_v14, %v2631_v55  ;;  %v1929_v24 = vpop.f32.mrb[62].mxu1  ;;  %v1999_v40 = vpop.f32.mrb[62].mxu0 }
 0x170   :  { %v1352_v20 = vmax.f32 %v1268_v13, 0.0  ;;  %v1271_v15 = vadd.f32 %v1999_v40, %v2643_v17  ;;  %v1930_v50 = vpop.f32.mrb[63].mxu1  ;;  %v1262_v36 = vpop.f32.mrb[63].mxu0  ;;  %v994_v13 = vadd.f32 %v2568_v4, %v2583_v38 }
 0x171   :  { %v1350_v18 = vmax.f32 %v1260_v47, 0.0  ;;  %v1931_v2 = vadd.f32 %v1930_v50, %v1929_v24  ;;  %v1263_v37 = vadd.f32 %v1262_v36, %v2633_v30  ;;  %v1139_v27 = vadd.f32 %v1928_v21, %v978_v6 }
 0x172   :  { %v1714_v48 = vpack.c.bf16 %v1352_v20, %v1352_v20  ;;  %v1353_v29 = vmax.f32 %v1271_v15, 0.0  ;;  %v997_v47 = vadd.f32 %v2570_v10, %v2583_v38 }
 0x173   :  { %v1712_v31 = vpack.c.bf16 %v1350_v18, %v1350_v18  ;;  %v1351_v61 = vmax.f32 %v1263_v37, 0.0  ;;  %v1142_v55 = vadd.f32 %v1931_v2, %v981_v11 }
 0x174   :  { %1513 = vst.msk [vmem:[%s2840_s3 + $0x38] sm:$0xf] %vm1498_vm1, %v1714_v48  ;;  %v1715_v44 = vpack.c.bf16 %v1353_v29, %v1353_v29 }
 0x175   :  { %1511 = vst.msk [vmem:[%s2840_s3 + $0x30] sm:$0xf] %vm1498_vm1, %v1712_v31  ;;  %v1713_v17 = vpack.c.bf16 %v1351_v61, %v1351_v61  ;;  %v1932_v39 = vpop.f32.mrb[64].mxu1  ;;  %v2002_v30 = vpop.f32.mrb[64].mxu0 }
 0x176   :  { %1514 = vst.msk [vmem:[%s2840_s3 + $0x3c] sm:$0xf] %vm1498_vm1, %v1715_v44  ;;  %v1284_v41 = vadd.f32 %v2002_v30, %v2679_v25  ;;  %v1933_v42 = vpop.f32.mrb[65].mxu1  ;;  %v1275_v23 = vpop.f32.mrb[65].mxu0  ;;  %v1002_v44 = vadd.f32 %v2572_v16, %v2583_v38 }
 0x177   :  { %1512 = vst.msk [vmem:[%s2840_s3 + $0x34] sm:$0xf] %vm1498_vm1, %v1713_v17  ;;  %v1934_v5 = vadd.f32 %v1933_v42, %v1932_v39  ;;  %v1276_v7 = vadd.f32 %v1275_v23, %v2651_v49  ;;  %v1935_v59 = vpop.f32.mrb[66].mxu1  ;;  %v2003_v53 = vpop.f32.mrb[66].mxu0  ;;  %v1005_v42 = vadd.f32 %v2574_v22, %v2583_v38 }
 0x178   :  { %v1356_v32 = vmax.f32 %v1284_v41, 0.0  ;;  %v1287_v25 = vadd.f32 %v2003_v53, %v2681_v46  ;;  %v1936_v51 = vpop.f32.mrb[67].mxu1  ;;  %v1278_v8 = vpop.f32.mrb[67].mxu0 }
 0x179   :  { %v1354_v52 = vmax.f32 %v1276_v7, 0.0  ;;  %v1937_v56 = vadd.f32 %v1936_v51, %v1935_v59  ;;  %v1279_v43 = vadd.f32 %v1278_v8, %v2653_v58  ;;  %v1147_v63 = vadd.f32 %v1934_v5, %v986_v45 }
 0x17a   :  { %v1718_v19 = vpack.c.bf16 %v1356_v32, %v1356_v32  ;;  %v1357_v0 = vmax.f32 %v1287_v25, 0.0 }
 0x17b   :  { %v1716_v1 = vpack.c.bf16 %v1354_v52, %v1354_v52  ;;  %v1355_v3 = vmax.f32 %v1279_v43, 0.0  ;;  %v1150_v49 = vadd.f32 %v1937_v56, %v989_v57 }
 0x17c   :  { %1517 = vst.msk [vmem:[%s2840_s3 + $0x48] sm:$0xf] %vm1498_vm1, %v1718_v19  ;;  %v1719_v62 = vpack.c.bf16 %v1357_v0, %v1357_v0 }
 0x17d   :  { %1515 = vst.msk [vmem:[%s2840_s3 + $0x40] sm:$0xf] %vm1498_vm1, %v1716_v1  ;;  %v1717_v46 = vpack.c.bf16 %v1355_v3, %v1355_v3  ;;  %v1938_v33 = vpop.f32.mrb[68].mxu1  ;;  %v2006_v58 = vpop.f32.mrb[68].mxu0  ;;  %v1010_v1 = vadd.f32 %v2576_v28, %v2583_v38 }
 0x17e   :  { %1518 = vst.msk [vmem:[%s2840_s3 + $0x4c] sm:$0xf] %vm1498_vm1, %v1719_v62  ;;  %v1300_v9 = vadd.f32 %v2006_v58, %v1139_v27  ;;  %v1939_v54 = vpop.f32.mrb[69].mxu1  ;;  %v1291_v12 = vpop.f32.mrb[69].mxu0 }
 0x17f   :  { %1516 = vst.msk [vmem:[%s2840_s3 + $0x44] sm:$0xf] %vm1498_vm1, %v1717_v46  ;;  %v1940_v26 = vadd.f32 %v1939_v54, %v1938_v33  ;;  %v1292_v14 = vadd.f32 %v1291_v12, %v2707_v60  ;;  %v1941_v6 = vpop.f32.mrb[70].mxu1  ;;  %v2007_v21 = vpop.f32.mrb[70].mxu0  ;;  %v1013_v33 = vadd.f32 %v2578_v34, %v2583_v38 }
 0x180   :  { %v1360_v24 = vmax.f32 %v1300_v9, 0.0  ;;  %v1303_v40 = vadd.f32 %v2007_v21, %v1142_v55  ;;  %v1942_v11 = vpop.f32.mrb[71].mxu1  ;;  %v1294_v20 = vpop.f32.mrb[71].mxu0 }
 0x181   :  { %v1358_v15 = vmax.f32 %v1292_v14, 0.0  ;;  %v1943_v50 = vadd.f32 %v1942_v11, %v1941_v6  ;;  %v1295_v4 = vadd.f32 %v1294_v20, %v2709_v35  ;;  %v1155_v36 = vadd.f32 %v1940_v26, %v994_v13 }
 0x182   :  { %v1722_v18 = vpack.c.bf16 %v1360_v24, %v1360_v24  ;;  %v1361_v2 = vmax.f32 %v1303_v40, 0.0 }
 0x183   :  { %v1720_v37 = vpack.c.bf16 %v1358_v15, %v1358_v15  ;;  %v1359_v27 = vmax.f32 %v1295_v4, 0.0  ;;  %v1158_v48 = vadd.f32 %v1943_v50, %v997_v47 }
 0x184   :  { %1521 = vst.msk [vmem:[%s2840_s3 + $0x58] sm:$0xf] %vm1498_vm1, %v1722_v18  ;;  %v1723_v10 = vpack.c.bf16 %v1361_v2, %v1361_v2 }
 0x185   :  { %1519 = vst.msk [vmem:[%s2840_s3 + $0x50] sm:$0xf] %vm1498_vm1, %v1720_v37  ;;  %v1721_v60 = vpack.c.bf16 %v1359_v27, %v1359_v27  ;;  %v1944_v29 = vpop.f32.mrb[72].mxu1  ;;  %v2010_v35 = vpop.f32.mrb[72].mxu0 }
 0x186   :  { %1522 = vst.msk [vmem:[%s2840_s3 + $0x5c] sm:$0xf] %vm1498_vm1, %v1723_v10  ;;  %v1316_v31 = vadd.f32 %v2010_v35, %v1155_v36  ;;  %v1945_v61 = vpop.f32.mrb[73].mxu1  ;;  %v1307_v55 = vpop.f32.mrb[73].mxu0 }
 0x187   :  { %1520 = vst.msk [vmem:[%s2840_s3 + $0x54] sm:$0xf] %vm1498_vm1, %v1721_v60  ;;  %v1946_v17 = vadd.f32 %v1945_v61, %v1944_v29  ;;  %v1308_v39 = vadd.f32 %v1307_v55, %v1147_v63  ;;  %v1947_v30 = vpop.f32.mrb[74].mxu1  ;;  %v2011_v41 = vpop.f32.mrb[74].mxu0 }
 0x188   :  { %v1364_v23 = vmax.f32 %v1316_v31, 0.0  ;;  %v1319_v45 = vadd.f32 %v2011_v41, %v1158_v48  ;;  %v1948_v5 = vpop.f32.mrb[75].mxu1  ;;  %v1310_v7 = vpop.f32.mrb[75].mxu0 }
 0x189   :  { %v1362_v59 = vmax.f32 %v1308_v39, 0.0  ;;  %v1949_v53 = vadd.f32 %v1948_v5, %v1947_v30  ;;  %v1311_v57 = vadd.f32 %v1310_v7, %v1150_v49  ;;  %v1163_v16 = vadd.f32 %v1946_v17, %v1002_v44 }
 0x18a   :  { %v1726_v32 = vpack.c.bf16 %v1364_v23, %v1364_v23  ;;  %v1365_v25 = vmax.f32 %v1319_v45, 0.0 }
 0x18b   :  { %v1724_v51 = vpack.c.bf16 %v1362_v59, %v1362_v59  ;;  %v1363_v8 = vmax.f32 %v1311_v57, 0.0  ;;  %v1166_v52 = vadd.f32 %v1949_v53, %v1005_v42 }
 0x18c   :  { %1525 = vst.msk [vmem:[%s2840_s3 + $0x68] sm:$0xf] %vm1498_vm1, %v1726_v32  ;;  %v1727_v56 = vpack.c.bf16 %v1365_v25, %v1365_v25 }
 0x18d   :  { %1523 = vst.msk [vmem:[%s2840_s3 + $0x60] sm:$0xf] %vm1498_vm1, %v1724_v51  ;;  %v1725_v22 = vpack.c.bf16 %v1363_v8, %v1363_v8  ;;  %v1950_v43 = vpop.f32.mrb[76].mxu1  ;;  %v2014_v63 = vpop.f32.mrb[76].mxu0 }
 0x18e   :  { %1526 = vst.msk [vmem:[%s2840_s3 + $0x6c] sm:$0xf] %vm1498_vm1, %v1727_v56  ;;  %v1951_v19 = vpop.f32.mrb[77].mxu1  ;;  %v1323_v0 = vpop.f32.mrb[77].mxu0 }
 0x18f   :  { %1524 = vst.msk [vmem:[%s2840_s3 + $0x64] sm:$0xf] %vm1498_vm1, %v1725_v22  ;;  %v1952_v3 = vadd.f32 %v1951_v19, %v1950_v43  ;;  %v1324_v49 = vadd.f32 %v1323_v0, %v1163_v16  ;;  %v1953_v62 = vpop.f32.mrb[78].mxu1  ;;  %v2015_v46 = vpop.f32.mrb[78].mxu0 }
 0x190   :  { %v1954_v58 = vpop.f32.mrb[79].mxu1  ;;  %v1326_v9 = vpop.f32.mrb[79].mxu0 }
 0x191   :  { %v1171_v54 = vadd.f32 %v1952_v3, %v1010_v1  ;;  %v1366_v12 = vmax.f32 %v1324_v49, 0.0  ;;  %v1955_v13 = vadd.f32 %v1954_v58, %v1953_v62  ;;  %v1327_v26 = vadd.f32 %v1326_v9, %v1166_v52 }
 0x193   :  { %v1332_v14 = vadd.f32 %v2014_v63, %v1171_v54  ;;  %v1728_v28 = vpack.c.bf16 %v1366_v12, %v1366_v12  ;;  %v1174_v6 = vadd.f32 %v1955_v13, %v1013_v33  ;;  %v1367_v21 = vmax.f32 %v1327_v26, 0.0 }
 0x195   :  { %v1368_v47 = vmax.f32 %v1332_v14, 0.0  ;;  %1527 = vst.msk [vmem:[%s2840_s3 + $0x70] sm:$0xf] %vm1498_vm1, %v1728_v28  ;;  %v1335_v24 = vadd.f32 %v2015_v46, %v1174_v6  ;;  %v1729_v40 = vpack.c.bf16 %v1367_v21, %v1367_v21 }
 0x197   :  { %v1730_v11 = vpack.c.bf16 %v1368_v47, %v1368_v47  ;;  %v1369_v34 = vmax.f32 %v1335_v24, 0.0  ;;  %1528 = vst.msk [vmem:[%s2840_s3 + $0x74] sm:$0xf] %vm1498_vm1, %v1729_v40 }
 0x199   :  { %1529 = vst.msk [vmem:[%s2840_s3 + $0x78] sm:$0xf] %vm1498_vm1, %v1730_v11  ;;  %v1731_v38 = vpack.c.bf16 %v1369_v34, %v1369_v34 }
 0x19b   :  { %1530 = vst.msk [vmem:[%s2840_s3 + $0x7c] sm:$0xf] %vm1498_vm1, %v1731_v38 }

// kernel: forward.12
= control target key start
LH: loop header
LB: loop body
LE: loop exit
PB: predicated region body
PF: predicated region fallthrough
CT: control target
= control target key end

     0   :  { %vm434_vm0 = vcmask 523264   ;;  %vm682_vm1 = vcmask 519168   ;;  %s1174_s1 = inlined_call_operand.vmem [shape: bf16[576,64], index: 1, kind: input, shape index: {}]   ;;  %s1175_s0 = inlined_call_operand.vmem [shape: bf16[64,576], index: 0, kind: input, shape index: {}]   ;;  %s1176_s2 = inlined_call_operand.vmem [shape: f32[1,64], index: 2, kind: input, shape index: {}]   ;;  %s1177_s3 = inlined_call_operand.vmem [shape: bf16[64,64], index: 3, kind: output, shape index: {}]  }
   0x1   :  { %v884_v0 = vld [vmem:[%s1174_s1 + $0x40] sm:$0xff]   ;;  %v888_v4 = vld [vmem:[%s1174_s1 + $0x48] sm:$0xff]   ;;  %v892_v8 = vld [vmem:[%s1174_s1 + $0x50] sm:$0xff]  }
   0x2   :  { %v885_v1 = vld [vmem:[%s1174_s1 + $0xc0] sm:$0xff]   ;;  %772 = vmatprep.subr.bf16.mxu0 %v884_v0  ;;  %v889_v5 = vld [vmem:[%s1174_s1 + $0xc8] sm:$0xff]   ;;  %v893_v9 = vld [vmem:[%s1174_s1 + $0xd0] sm:$0xff]  }
   0x3   :  { %v886_v2 = vld [vmem:[%s1174_s1] sm:$0xff]   ;;  %812 = vmatprep.subr.bf16.mxu1 %v885_v1  ;;  %v890_v6 = vld [vmem:[%s1174_s1 + $0x8] sm:$0xff]   ;;  %v894_v10 = vld [vmem:[%s1174_s1 + $0x10] sm:$0xff]  }
   0x4   :  { %v887_v3 = vld [vmem:[%s1174_s1 + $0x80] sm:$0xff]   ;;  %773 = vmatpush3.bf16.msra.mxu0 %v886_v2  ;;  %v891_v7 = vld [vmem:[%s1174_s1 + $0x88] sm:$0xff]   ;;  %v895_v11 = vld [vmem:[%s1174_s1 + $0x90] sm:$0xff]  }
   0x5   :  { %813 = vmatpush3.bf16.msra.mxu1 %v887_v3  ;;  %774 = vmatprep.subr.bf16.mxu0 %v888_v4  ;;  %v896_v12 = vld [vmem:[%s1174_s1 + $0x58] sm:$0xff]   ;;  %v900_v16 = vld [vmem:[%s1174_s1 + $0x60] sm:$0xff]   ;;  %v904_v20 = vld [vmem:[%s1174_s1 + $0x68] sm:$0xff]  }
   0x6   :  { %814 = vmatprep.subr.bf16.mxu1 %v889_v5  ;;  %v897_v13 = vld [vmem:[%s1174_s1 + $0xd8] sm:$0xff]   ;;  %v901_v17 = vld [vmem:[%s1174_s1 + $0xe0] sm:$0xff]   ;;  %v905_v21 = vld [vmem:[%s1174_s1 + $0xe8] sm:$0xff]  }
   0x7   :  { %v898_v14 = vld [vmem:[%s1174_s1 + $0x18] sm:$0xff]   ;;  %v902_v18 = vld [vmem:[%s1174_s1 + $0x20] sm:$0xff]   ;;  %v906_v22 = vld [vmem:[%s1174_s1 + $0x28] sm:$0xff]  }
   0x8   :  { %775 = vmatpush3.bf16.msra.mxu0 %v890_v6  ;;  %v899_v15 = vld [vmem:[%s1174_s1 + $0x98] sm:$0xff]   ;;  %v903_v19 = vld [vmem:[%s1174_s1 + $0xa0] sm:$0xff]   ;;  %v907_v23 = vld [vmem:[%s1174_s1 + $0xa8] sm:$0xff]  }
   0x9   :  { %815 = vmatpush3.bf16.msra.mxu1 %v891_v7  ;;  %776 = vmatprep.subr.bf16.mxu0 %v892_v8  ;;  %v908_v24 = vld [vmem:[%s1174_s1 + $0x70] sm:$0xff]   ;;  %v912_v28 = vld [vmem:[%s1174_s1 + $0x78] sm:$0xff]   ;;  %v921_v35 = vld [vmem:[%s1175_s0 + $0xc] ss:$20 sps:$4 sm:$0xff]  }
   0xa   :  { %816 = vmatprep.subr.bf16.mxu1 %v893_v9  ;;  %v909_v25 = vld [vmem:[%s1174_s1 + $0xf0] sm:$0xff]   ;;  %v913_v29 = vld [vmem:[%s1174_s1 + $0xf8] sm:$0xff]   ;;  %v922_v36 = vld [vmem:[%s1174_s1 + $0x100] sm:$0xff]   ;;  %544 = vmatprep.mubr.bf16.mxu1 %v921_v35 }
   0xb   :  { %v910_v26 = vld [vmem:[%s1174_s1 + $0x30] sm:$0xff]   ;;  %v914_v30 = vld [vmem:[%s1174_s1 + $0x38] sm:$0xff]   ;;  %v923_v37 = vld [vmem:[%s1175_s0 + $0x2c] ss:$20 sps:$4 sm:$0xff]  }
   0xc   :  { %777 = vmatpush3.bf16.msra.mxu0 %v894_v10  ;;  %v911_v27 = vld [vmem:[%s1174_s1 + $0xb0] sm:$0xff]   ;;  %v915_v31 = vld [vmem:[%s1174_s1 + $0xb8] sm:$0xff]   ;;  %v929_v39 = vld [vmem:[%s1174_s1 + $0x108] sm:$0xff]  }
   0xd   :  { %817 = vmatpush3.bf16.msra.mxu1 %v895_v11  ;;  %778 = vmatprep.subr.bf16.mxu0 %v896_v12  ;;  %v916_v32 = vld [vmem:[%s1175_s0] ss:$20 sps:$4 sm:$0xff]   ;;  %v918_v33 = vld [vmem:[%s1175_s0 + $0x4] ss:$20 sps:$4 sm:$0xff]   ;;  %v919_v34 = vld [vmem:[%s1175_s0 + $0x8] ss:$20 sps:$4 sm:$0xff]  }
   0xe   :  { %818 = vmatprep.subr.bf16.mxu1 %v897_v13  ;;  %479 = vmatprep.mubr.bf16.mxu0 %v918_v33  ;;  %v925_v38 = vld [vmem:[%s1175_s0 + $0x34] ss:$20 sps:$4 sm:$0xff]   ;;  %v928_v41 = vld [vmem:[%s1175_s0 + $0x30] ss:$20 sps:$4 sm:$0xff]   ;;  %v943_v45 = vld [vmem:[%s1174_s1 + $0x118] sm:$0xff]  }
   0xf   :  { %v927_v40 = vld [vmem:[%s1175_s0 + $0x28] ss:$20 sps:$4 sm:$0xff]   ;;  %v936_v44 = vld [vmem:[%s1174_s1 + $0x110] sm:$0xff]   ;;  %v935_v47 = vld [vmem:[%s1175_s0 + $0x58] ss:$20 sps:$4 sm:$0xff]  }
  0x10   :  { %779 = vmatpush3.bf16.msra.mxu0 %v898_v14  ;;  %v930_v42 = vld [vmem:[%s1175_s0 + $0x54] ss:$20 sps:$4 sm:$0xff]   ;;  %v932_v43 = vld [vmem:[%s1175_s0 + $0x5c] ss:$20 sps:$4 sm:$0xff]   ;;  %v939_v49 = vld [vmem:[%s1175_s0 + $0x84] ss:$20 sps:$4 sm:$0xff]  }
  0x11   :  { %819 = vmatpush3.bf16.msra.mxu1 %v899_v15  ;;  %780 = vmatprep.subr.bf16.mxu0 %v900_v16  ;;  %v934_v46 = vld [vmem:[%s1175_s0 + $0x50] ss:$20 sps:$4 sm:$0xff]   ;;  %v941_v50 = vld [vmem:[%s1175_s0 + $0x78] ss:$20 sps:$4 sm:$0xff]   ;;  %v942_v51 = vld [vmem:[%s1175_s0 + $0x80] ss:$20 sps:$4 sm:$0xff]  }
  0x12   :  { %820 = vmatprep.subr.bf16.mxu1 %v901_v17  ;;  %v937_v48 = vld [vmem:[%s1175_s0 + $0x7c] ss:$20 sps:$4 sm:$0xff]   ;;  %v945_v53 = vld [vmem:[%s1175_s0 + $0x60] ss:$20 sps:$4 sm:$0xff]   ;;  %v946_v54 = vld [vmem:[%s1175_s0 + $0x38] ss:$20 sps:$4 sm:$0xff]  }
  0x13   :  { %v944_v52 = vld [vmem:[%s1175_s0 + $0x10] ss:$20 sps:$4 sm:$0xff]   ;;  %v947_v55 = vld [vmem:[%s1175_s0 + $0x88] ss:$20 sps:$4 sm:$0xff]   ;;  %v695_v58 = vld [vmem:[%s1176_s2] ss:$0 sm:$0xff] }
  0x14   :  { %781 = vmatpush3.bf16.msra.mxu0 %v902_v18 }
  0x15   :  { %821 = vmatpush3.bf16.msra.mxu1 %v903_v19  ;;  %782 = vmatprep.subr.bf16.mxu0 %v904_v20 }
  0x16   :  { %822 = vmatprep.subr.bf16.mxu1 %v905_v21 }
  0x18   :  { %783 = vmatpush3.bf16.msra.mxu0 %v906_v22 }
  0x19   :  { %823 = vmatpush3.bf16.msra.mxu1 %v907_v23  ;;  %784 = vmatprep.subr.bf16.mxu0 %v908_v24 }
  0x1a   :  { %824 = vmatprep.subr.bf16.mxu1 %v909_v25 }
  0x1c   :  { %785 = vmatpush3.bf16.msra.mxu0 %v910_v26 }
  0x1d   :  { %825 = vmatpush3.bf16.msra.mxu1 %v911_v27  ;;  %786 = vmatprep.subr.bf16.mxu0 %v912_v28 }
  0x1e   :  { %826 = vmatprep.subr.bf16.mxu1 %v913_v29 }
  0x20   :  { %787 = vmatpush3.bf16.msra.mxu0 %v914_v30 }
  0x21   :  { %827 = vmatpush3.bf16.msra.mxu1 %v915_v31  ;;  %860 = vmatprep.subr.bf16.mxu0 %v922_v36 }
  0x22   :  { %876 = vmatprep.subr.bf16.mxu1 %v922_v36 }
  0x23   :  { %480 = vmatmul.mubr.bf16.vlgmr.msra.gmra.mrb[0].mxu0 %v916_v32 }
  0x24   :  { %545 = vmatmul.mubr.bf16.vlgmr.msra.gmra.mrb[0].mxu1 %v919_v34  ;;  %861 = vmatpush3.bf16.msra.mxu0 %v922_v36 }
  0x25   :  { %880 = vmatpush3.bf16.msra.mxu1 %v922_v36  ;;  %487 = vmatprep.mubr.bf16.mxu0 %v923_v37 }
  0x26   :  { %552 = vmatprep.mubr.bf16.mxu1 %v925_v38  ;;  %862 = vmatprep.subr.bf16.mxu0 %v929_v39 }
  0x27   :  { %877 = vmatprep.subr.bf16.mxu1 %v929_v39 }
  0x28   :  { %863 = vmatpush3.bf16.msra.mxu0 %v929_v39 }
  0x29   :  { %881 = vmatpush3.bf16.msra.mxu1 %v929_v39  ;;  %864 = vmatprep.subr.bf16.mxu0 %v936_v44 }
  0x2a   :  { %878 = vmatprep.subr.bf16.mxu1 %v936_v44 }
  0x2b   :  { %488 = vmatmul.mubr.bf16.gmra.mrb[4].mxu0 %v927_v40 }
  0x2c   :  { %553 = vmatmul.mubr.bf16.gmra.mrb[4].mxu1 %v928_v41  ;;  %495 = vmatprep.mubr.bf16.mxu0 %v930_v42 }
  0x2d   :  { %560 = vmatprep.mubr.bf16.mxu1 %v932_v43  ;;  %865 = vmatpush3.bf16.msra.mxu0 %v936_v44 }
  0x2e   :  { %882 = vmatpush3.bf16.msra.mxu1 %v936_v44  ;;  %866 = vmatprep.subr.bf16.mxu0 %v943_v45 }
  0x2f   :  { %879 = vmatprep.subr.bf16.mxu1 %v943_v45 }
  0x31   :  { %867 = vmatpush3.bf16.msra.mxu0 %v943_v45 }
  0x32   :  { %883 = vmatpush3.bf16.msra.mxu1 %v943_v45 }
  0x33   :  { %496 = vmatmul.mubr.bf16.gmra.mrb[8].mxu0 %v934_v46 }
  0x34   :  { %561 = vmatmul.mubr.bf16.gmra.mrb[8].mxu1 %v935_v47  ;;  %503 = vmatprep.mubr.bf16.mxu0 %v937_v48 }
  0x35   :  { %568 = vmatprep.mubr.bf16.mxu1 %v939_v49 }
  0x3b   :  { %504 = vmatmul.mubr.bf16.gmra.mrb[12].mxu0 %v941_v50 }
  0x3c   :  { %569 = vmatmul.mubr.bf16.gmra.mrb[12].mxu1 %v942_v51  ;;  %868 = vmatprep.mubr.msk.bf16.mxu0 %vm434_vm0, %v944_v52 }
  0x3d   :  { %872 = vmatprep.mubr.msk.bf16.mxu1 %vm434_vm0, %v945_v53 }
  0x43   :  { %869 = vmatmul.mubr.msk.bf16.vlgmr.msra.gmra.mrb[16].mxu0 %vm434_vm0, %v946_v54 }
  0x44   :  { %873 = vmatmul.mubr.msk.bf16.vlgmr.msra.gmra.mrb[16].mxu1 %vm434_vm0, %v947_v55 }
  0xf6   :  { %v788_v56 = vpop.f32.mrb[0].mxu0 }
  0xf7   :  { %v828_v57 = vpop.f32.mrb[0].mxu1  ;;  %v789_v59 = vpop.f32.mrb[1].mxu0 }
  0xf8   :  { %v790_v60 = vadd.f32 %v789_v59, %v788_v56  ;;  %v829_v61 = vpop.f32.mrb[1].mxu1  ;;  %v791_v62 = vpop.f32.mrb[2].mxu0 }
  0xf9   :  { %v830_v63 = vadd.f32 %v829_v61, %v828_v57  ;;  %v831_v0 = vpop.f32.mrb[2].mxu1  ;;  %v792_v1 = vpop.f32.mrb[3].mxu0 }
  0xfa   :  { %v482_v2 = vadd.f32 %v790_v60, %v695_v58  ;;  %v793_v3 = vadd.f32 %v792_v1, %v791_v62  ;;  %v832_v4 = vpop.f32.mrb[3].mxu1 }
  0xfb   :  { %v833_v5 = vadd.f32 %v832_v4, %v831_v0 }
  0xfc   :  { %v485_v6 = vadd.f32 %v793_v3, %v695_v58  ;;  %v547_v7 = vadd.f32 %v830_v63, %v482_v2 }
  0xfe   :  { %v794_v8 = vpop.f32.mrb[4].mxu0  ;;  %v1139_v9 = vadd.f32 %v833_v5, %v485_v6 }
  0xff   :  { %v834_v10 = vpop.f32.mrb[4].mxu1  ;;  %v795_v11 = vpop.f32.mrb[5].mxu0 }
 0x100   :  { %v796_v12 = vadd.f32 %v795_v11, %v794_v8  ;;  %v835_v13 = vpop.f32.mrb[5].mxu1  ;;  %v797_v14 = vpop.f32.mrb[6].mxu0 }
 0x101   :  { %v836_v15 = vadd.f32 %v835_v13, %v834_v10  ;;  %v837_v16 = vpop.f32.mrb[6].mxu1  ;;  %v798_v17 = vpop.f32.mrb[7].mxu0 }
 0x102   :  { %v490_v18 = vadd.f32 %v796_v12, %v695_v58  ;;  %v799_v19 = vadd.f32 %v798_v17, %v797_v14  ;;  %v838_v20 = vpop.f32.mrb[7].mxu1 }
 0x103   :  { %v839_v21 = vadd.f32 %v838_v20, %v837_v16 }
 0x104   :  { %v493_v22 = vadd.f32 %v799_v19, %v695_v58  ;;  %v555_v23 = vadd.f32 %v836_v15, %v490_v18 }
 0x106   :  { %v800_v24 = vpop.f32.mrb[8].mxu0  ;;  %v558_v25 = vadd.f32 %v839_v21, %v493_v22 }
 0x107   :  { %v840_v26 = vpop.f32.mrb[8].mxu1  ;;  %v801_v27 = vpop.f32.mrb[9].mxu0 }
 0x108   :  { %v802_v28 = vadd.f32 %v801_v27, %v800_v24  ;;  %v841_v29 = vpop.f32.mrb[9].mxu1  ;;  %v803_v30 = vpop.f32.mrb[10].mxu0 }
 0x109   :  { %v842_v31 = vadd.f32 %v841_v29, %v840_v26  ;;  %v843_v32 = vpop.f32.mrb[10].mxu1  ;;  %v804_v33 = vpop.f32.mrb[11].mxu0 }
 0x10a   :  { %v498_v34 = vadd.f32 %v802_v28, %v695_v58  ;;  %v805_v35 = vadd.f32 %v804_v33, %v803_v30  ;;  %v844_v36 = vpop.f32.mrb[11].mxu1 }
 0x10b   :  { %v845_v37 = vadd.f32 %v844_v36, %v843_v32 }
 0x10c   :  { %v501_v38 = vadd.f32 %v805_v35, %v695_v58  ;;  %v563_v39 = vadd.f32 %v842_v31, %v498_v34 }
 0x10e   :  { %v806_v40 = vpop.f32.mrb[12].mxu0  ;;  %v566_v41 = vadd.f32 %v845_v37, %v501_v38 }
 0x10f   :  { %v846_v42 = vpop.f32.mrb[12].mxu1  ;;  %v807_v43 = vpop.f32.mrb[13].mxu0 }
 0x110   :  { %v808_v44 = vadd.f32 %v807_v43, %v806_v40  ;;  %v847_v45 = vpop.f32.mrb[13].mxu1  ;;  %v809_v46 = vpop.f32.mrb[14].mxu0 }
 0x111   :  { %v848_v47 = vadd.f32 %v847_v45, %v846_v42  ;;  %v849_v48 = vpop.f32.mrb[14].mxu1  ;;  %v810_v49 = vpop.f32.mrb[15].mxu0 }
 0x112   :  { %v506_v50 = vadd.f32 %v808_v44, %v695_v58  ;;  %v811_v51 = vadd.f32 %v810_v49, %v809_v46  ;;  %v850_v52 = vpop.f32.mrb[15].mxu1 }
 0x113   :  { %v851_v53 = vadd.f32 %v850_v52, %v849_v48 }
 0x114   :  { %v509_v54 = vadd.f32 %v811_v51, %v695_v58  ;;  %v571_v55 = vadd.f32 %v848_v47, %v506_v50 }
 0x116   :  { %v870_v56 = vpop.f32.mrb[16].mxu0  ;;  %v574_v57 = vadd.f32 %v851_v53, %v509_v54 }
 0x117   :  { %v620_v59 = vadd.f32 %v870_v56, %v555_v23  ;;  %v874_v60 = vpop.f32.mrb[16].mxu1  ;;  %v611_v61 = vpop.f32.mrb[17].mxu0 }
 0x118   :  { %v636_v62 = vadd.f32 %v874_v60, %v571_v55  ;;  %v612_v63 = vadd.f32 %v611_v61, %v547_v7  ;;  %v627_v0 = vpop.f32.mrb[17].mxu1  ;;  %v871_v1 = vpop.f32.mrb[18].mxu0 }
 0x119   :  { %v644_v2 = vmax.f32 %v620_v59, 0.0  ;;  %v628_v3 = vadd.f32 %v627_v0, %v563_v39  ;;  %v623_v4 = vadd.f32 %v871_v1, %v558_v25  ;;  %v875_v5 = vpop.f32.mrb[18].mxu1  ;;  %v614_v6 = vpop.f32.mrb[19].mxu0 }
 0x11a   :  { %v648_v8 = vmax.f32 %v636_v62, 0.0  ;;  %v642_v10 = vmax.f32 %v612_v63, 0.0  ;;  %v639_v11 = vadd.f32 %v875_v5, %v574_v57  ;;  %v615_v58 = vadd.f32 %v614_v6, %v1139_v9  ;;  %v630_v12 = vpop.f32.mrb[19].mxu1 }
 0x11b   :  { %v766_v13 = vpack.c.bf16 %v644_v2, %v644_v2  ;;  %v646_v14 = vmax.f32 %v628_v3, 0.0  ;;  %v645_v15 = vmax.f32 %v623_v4, 0.0  ;;  %v631_v16 = vadd.f32 %v630_v12, %v566_v41 }
 0x11c   :  { %v770_v17 = vpack.c.bf16 %v648_v8, %v648_v8  ;;  %v764_v7 = vpack.c.bf16 %v642_v10, %v642_v10  ;;  %v649_v18 = vmax.f32 %v639_v11, 0.0  ;;  %v643_v19 = vmax.f32 %v615_v58, 0.0 }
 0x11d   :  { %685 = vst.msk [vmem:[%s1177_s3 + $0x8] sm:$0xf] %vm682_vm1, %v766_v13  ;;  %v768_v20 = vpack.c.bf16 %v646_v14, %v646_v14  ;;  %v767_v21 = vpack.c.bf16 %v645_v15, %v645_v15  ;;  %v647_v22 = vmax.f32 %v631_v16, 0.0 }
 0x11e   :  { %689 = vst.msk [vmem:[%s1177_s3 + $0x18] sm:$0xf] %vm682_vm1, %v770_v17  ;;  %683 = vst.msk [vmem:[%s1177_s3] sm:$0xf] %vm682_vm1, %v764_v7  ;;  %v771_v9 = vpack.c.bf16 %v649_v18, %v649_v18  ;;  %v765_v23 = vpack.c.bf16 %v643_v19, %v643_v19 }
 0x11f   :  { %687 = vst.msk [vmem:[%s1177_s3 + $0x10] sm:$0xf] %vm682_vm1, %v768_v20  ;;  %686 = vst.msk [vmem:[%s1177_s3 + $0xc] sm:$0xf] %vm682_vm1, %v767_v21  ;;  %v769_v24 = vpack.c.bf16 %v647_v22, %v647_v22 }
 0x120   :  { %690 = vst.msk [vmem:[%s1177_s3 + $0x1c] sm:$0xf] %vm682_vm1, %v771_v9  ;;  %684 = vst.msk [vmem:[%s1177_s3 + $0x4] sm:$0xf] %vm682_vm1, %v765_v23 }
 0x121   :  { %688 = vst.msk [vmem:[%s1177_s3 + $0x14] sm:$0xf] %vm682_vm1, %v769_v24 }

// kernel: forward.13
= control target key start
LH: loop header
LB: loop body
LE: loop exit
PB: predicated region body
PF: predicated region fallthrough
CT: control target
= control target key end

     0   :  { %vm434_vm0 = vcmask 523264   ;;  %s1173_s1 = inlined_call_operand.vmem [shape: bf16[576,128], index: 1, kind: input, shape index: {}]   ;;  %s1174_s0 = inlined_call_operand.vmem [shape: bf16[64,576], index: 0, kind: input, shape index: {}]   ;;  %s1175_s2 = inlined_call_operand.vmem [shape: f32[1,128], index: 2, kind: input, shape index: {}]   ;;  %s1176_s3 = inlined_call_operand.vmem [shape: bf16[64,128], index: 3, kind: output, shape index: {}]  }
   0x1   :  { %v906_v0 = vld [vmem:[%s1173_s1 + $0x40] sm:$0xff]   ;;  %v910_v4 = vld [vmem:[%s1173_s1 + $0x48] sm:$0xff]   ;;  %v914_v8 = vld [vmem:[%s1173_s1 + $0x50] sm:$0xff]  }
   0x2   :  { %v907_v1 = vld [vmem:[%s1173_s1 + $0xc0] sm:$0xff]   ;;  %794 = vmatprep.subr.bf16.mxu0 %v906_v0  ;;  %v911_v5 = vld [vmem:[%s1173_s1 + $0xc8] sm:$0xff]   ;;  %v915_v9 = vld [vmem:[%s1173_s1 + $0xd0] sm:$0xff]  }
   0x3   :  { %v908_v2 = vld [vmem:[%s1173_s1] sm:$0xff]   ;;  %834 = vmatprep.subr.bf16.mxu1 %v907_v1  ;;  %v912_v6 = vld [vmem:[%s1173_s1 + $0x8] sm:$0xff]   ;;  %v916_v10 = vld [vmem:[%s1173_s1 + $0x10] sm:$0xff]  }
   0x4   :  { %v909_v3 = vld [vmem:[%s1173_s1 + $0x80] sm:$0xff]   ;;  %795 = vmatpush3.bf16.msra.mxu0 %v908_v2  ;;  %v913_v7 = vld [vmem:[%s1173_s1 + $0x88] sm:$0xff]   ;;  %v917_v11 = vld [vmem:[%s1173_s1 + $0x90] sm:$0xff]  }
   0x5   :  { %835 = vmatpush3.bf16.msra.mxu1 %v909_v3  ;;  %796 = vmatprep.subr.bf16.mxu0 %v910_v4  ;;  %v918_v12 = vld [vmem:[%s1173_s1 + $0x58] sm:$0xff]   ;;  %v922_v16 = vld [vmem:[%s1173_s1 + $0x60] sm:$0xff]   ;;  %v926_v20 = vld [vmem:[%s1173_s1 + $0x68] sm:$0xff]  }
   0x6   :  { %836 = vmatprep.subr.bf16.mxu1 %v911_v5  ;;  %v919_v13 = vld [vmem:[%s1173_s1 + $0xd8] sm:$0xff]   ;;  %v923_v17 = vld [vmem:[%s1173_s1 + $0xe0] sm:$0xff]   ;;  %v927_v21 = vld [vmem:[%s1173_s1 + $0xe8] sm:$0xff]  }
   0x7   :  { %v920_v14 = vld [vmem:[%s1173_s1 + $0x18] sm:$0xff]   ;;  %v924_v18 = vld [vmem:[%s1173_s1 + $0x20] sm:$0xff]   ;;  %v928_v22 = vld [vmem:[%s1173_s1 + $0x28] sm:$0xff]  }
   0x8   :  { %797 = vmatpush3.bf16.msra.mxu0 %v912_v6  ;;  %v921_v15 = vld [vmem:[%s1173_s1 + $0x98] sm:$0xff]   ;;  %v925_v19 = vld [vmem:[%s1173_s1 + $0xa0] sm:$0xff]   ;;  %v929_v23 = vld [vmem:[%s1173_s1 + $0xa8] sm:$0xff]  }
   0x9   :  { %837 = vmatpush3.bf16.msra.mxu1 %v913_v7  ;;  %798 = vmatprep.subr.bf16.mxu0 %v914_v8  ;;  %v930_v24 = vld [vmem:[%s1173_s1 + $0x70] sm:$0xff]   ;;  %v934_v28 = vld [vmem:[%s1173_s1 + $0x78] sm:$0xff]   ;;  %v943_v35 = vld [vmem:[%s1174_s0 + $0xc] ss:$20 sps:$4 sm:$0xff]  }
   0xa   :  { %838 = vmatprep.subr.bf16.mxu1 %v915_v9  ;;  %v931_v25 = vld [vmem:[%s1173_s1 + $0xf0] sm:$0xff]   ;;  %v935_v29 = vld [vmem:[%s1173_s1 + $0xf8] sm:$0xff]   ;;  %v944_v36 = vld [vmem:[%s1173_s1 + $0x100] sm:$0xff]   ;;  %544 = vmatprep.mubr.bf16.mxu1 %v943_v35 }
   0xb   :  { %v932_v26 = vld [vmem:[%s1173_s1 + $0x30] sm:$0xff]   ;;  %v936_v30 = vld [vmem:[%s1173_s1 + $0x38] sm:$0xff]   ;;  %v945_v37 = vld [vmem:[%s1174_s0 + $0x2c] ss:$20 sps:$4 sm:$0xff]  }
   0xc   :  { %799 = vmatpush3.bf16.msra.mxu0 %v916_v10  ;;  %v933_v27 = vld [vmem:[%s1173_s1 + $0xb0] sm:$0xff]   ;;  %v937_v31 = vld [vmem:[%s1173_s1 + $0xb8] sm:$0xff]   ;;  %v951_v39 = vld [vmem:[%s1173_s1 + $0x108] sm:$0xff]  }
   0xd   :  { %839 = vmatpush3.bf16.msra.mxu1 %v917_v11  ;;  %800 = vmatprep.subr.bf16.mxu0 %v918_v12  ;;  %v938_v32 = vld [vmem:[%s1174_s0] ss:$20 sps:$4 sm:$0xff]   ;;  %v940_v33 = vld [vmem:[%s1174_s0 + $0x4] ss:$20 sps:$4 sm:$0xff]   ;;  %v941_v34 = vld [vmem:[%s1174_s0 + $0x8] ss:$20 sps:$4 sm:$0xff]  }
   0xe   :  { %840 = vmatprep.subr.bf16.mxu1 %v919_v13  ;;  %479 = vmatprep.mubr.bf16.mxu0 %v940_v33  ;;  %v947_v38 = vld [vmem:[%s1174_s0 + $0x34] ss:$20 sps:$4 sm:$0xff]   ;;  %v950_v41 = vld [vmem:[%s1174_s0 + $0x30] ss:$20 sps:$4 sm:$0xff]   ;;  %v965_v45 = vld [vmem:[%s1173_s1 + $0x118] sm:$0xff]  }
   0xf   :  { %v949_v40 = vld [vmem:[%s1174_s0 + $0x28] ss:$20 sps:$4 sm:$0xff]   ;;  %v958_v44 = vld [vmem:[%s1173_s1 + $0x110] sm:$0xff]   ;;  %v957_v47 = vld [vmem:[%s1174_s0 + $0x58] ss:$20 sps:$4 sm:$0xff]  }
  0x10   :  { %801 = vmatpush3.bf16.msra.mxu0 %v920_v14  ;;  %v952_v42 = vld [vmem:[%s1174_s0 + $0x54] ss:$20 sps:$4 sm:$0xff]   ;;  %v954_v43 = vld [vmem:[%s1174_s0 + $0x5c] ss:$20 sps:$4 sm:$0xff]   ;;  %v961_v49 = vld [vmem:[%s1174_s0 + $0x84] ss:$20 sps:$4 sm:$0xff]  }
  0x11   :  { %841 = vmatpush3.bf16.msra.mxu1 %v921_v15  ;;  %802 = vmatprep.subr.bf16.mxu0 %v922_v16  ;;  %v956_v46 = vld [vmem:[%s1174_s0 + $0x50] ss:$20 sps:$4 sm:$0xff]   ;;  %v963_v50 = vld [vmem:[%s1174_s0 + $0x78] ss:$20 sps:$4 sm:$0xff]   ;;  %v964_v51 = vld [vmem:[%s1174_s0 + $0x80] ss:$20 sps:$4 sm:$0xff]  }
  0x12   :  { %842 = vmatprep.subr.bf16.mxu1 %v923_v17  ;;  %v959_v48 = vld [vmem:[%s1174_s0 + $0x7c] ss:$20 sps:$4 sm:$0xff]   ;;  %v967_v53 = vld [vmem:[%s1174_s0 + $0x60] ss:$20 sps:$4 sm:$0xff]   ;;  %v968_v54 = vld [vmem:[%s1174_s0 + $0x38] ss:$20 sps:$4 sm:$0xff]  }
  0x13   :  { %v966_v52 = vld [vmem:[%s1174_s0 + $0x10] ss:$20 sps:$4 sm:$0xff]   ;;  %v969_v55 = vld [vmem:[%s1174_s0 + $0x88] ss:$20 sps:$4 sm:$0xff]   ;;  %v694_v58 = vld [vmem:[%s1175_s2] ss:$0 sm:$0xff] }
  0x14   :  { %803 = vmatpush3.bf16.msra.mxu0 %v924_v18 }
  0x15   :  { %843 = vmatpush3.bf16.msra.mxu1 %v925_v19  ;;  %804 = vmatprep.subr.bf16.mxu0 %v926_v20 }
  0x16   :  { %844 = vmatprep.subr.bf16.mxu1 %v927_v21 }
  0x18   :  { %805 = vmatpush3.bf16.msra.mxu0 %v928_v22 }
  0x19   :  { %845 = vmatpush3.bf16.msra.mxu1 %v929_v23  ;;  %806 = vmatprep.subr.bf16.mxu0 %v930_v24 }
  0x1a   :  { %846 = vmatprep.subr.bf16.mxu1 %v931_v25 }
  0x1c   :  { %807 = vmatpush3.bf16.msra.mxu0 %v932_v26 }
  0x1d   :  { %847 = vmatpush3.bf16.msra.mxu1 %v933_v27  ;;  %808 = vmatprep.subr.bf16.mxu0 %v934_v28 }
  0x1e   :  { %848 = vmatprep.subr.bf16.mxu1 %v935_v29 }
  0x20   :  { %809 = vmatpush3.bf16.msra.mxu0 %v936_v30 }
  0x21   :  { %849 = vmatpush3.bf16.msra.mxu1 %v937_v31  ;;  %882 = vmatprep.subr.bf16.mxu0 %v944_v36 }
  0x22   :  { %898 = vmatprep.subr.bf16.mxu1 %v944_v36 }
  0x23   :  { %480 = vmatmul.mubr.bf16.vlgmr.msra.gmra.mrb[0].mxu0 %v938_v32 }
  0x24   :  { %545 = vmatmul.mubr.bf16.vlgmr.msra.gmra.mrb[0].mxu1 %v941_v34  ;;  %883 = vmatpush3.bf16.msra.mxu0 %v944_v36 }
  0x25   :  { %902 = vmatpush3.bf16.msra.mxu1 %v944_v36  ;;  %487 = vmatprep.mubr.bf16.mxu0 %v945_v37 }
  0x26   :  { %552 = vmatprep.mubr.bf16.mxu1 %v947_v38  ;;  %884 = vmatprep.subr.bf16.mxu0 %v951_v39 }
  0x27   :  { %899 = vmatprep.subr.bf16.mxu1 %v951_v39 }
  0x28   :  { %885 = vmatpush3.bf16.msra.mxu0 %v951_v39 }
  0x29   :  { %903 = vmatpush3.bf16.msra.mxu1 %v951_v39  ;;  %886 = vmatprep.subr.bf16.mxu0 %v958_v44 }
  0x2a   :  { %900 = vmatprep.subr.bf16.mxu1 %v958_v44 }
  0x2b   :  { %488 = vmatmul.mubr.bf16.gmra.mrb[4].mxu0 %v949_v40 }
  0x2c   :  { %553 = vmatmul.mubr.bf16.gmra.mrb[4].mxu1 %v950_v41  ;;  %495 = vmatprep.mubr.bf16.mxu0 %v952_v42 }
  0x2d   :  { %560 = vmatprep.mubr.bf16.mxu1 %v954_v43  ;;  %887 = vmatpush3.bf16.msra.mxu0 %v958_v44 }
  0x2e   :  { %904 = vmatpush3.bf16.msra.mxu1 %v958_v44  ;;  %888 = vmatprep.subr.bf16.mxu0 %v965_v45 }
  0x2f   :  { %901 = vmatprep.subr.bf16.mxu1 %v965_v45 }
  0x31   :  { %889 = vmatpush3.bf16.msra.mxu0 %v965_v45 }
  0x32   :  { %905 = vmatpush3.bf16.msra.mxu1 %v965_v45 }
  0x33   :  { %496 = vmatmul.mubr.bf16.gmra.mrb[8].mxu0 %v956_v46 }
  0x34   :  { %561 = vmatmul.mubr.bf16.gmra.mrb[8].mxu1 %v957_v47  ;;  %503 = vmatprep.mubr.bf16.mxu0 %v959_v48 }
  0x35   :  { %568 = vmatprep.mubr.bf16.mxu1 %v961_v49 }
  0x3b   :  { %504 = vmatmul.mubr.bf16.gmra.mrb[12].mxu0 %v963_v50 }
  0x3c   :  { %569 = vmatmul.mubr.bf16.gmra.mrb[12].mxu1 %v964_v51  ;;  %890 = vmatprep.mubr.msk.bf16.mxu0 %vm434_vm0, %v966_v52 }
  0x3d   :  { %894 = vmatprep.mubr.msk.bf16.mxu1 %vm434_vm0, %v967_v53 }
  0x43   :  { %891 = vmatmul.mubr.msk.bf16.vlgmr.msra.gmra.mrb[16].mxu0 %vm434_vm0, %v968_v54 }
  0x44   :  { %895 = vmatmul.mubr.msk.bf16.vlgmr.msra.gmra.mrb[16].mxu1 %vm434_vm0, %v969_v55 }
  0xf6   :  { %v810_v56 = vpop.f32.mrb[0].mxu0 }
  0xf7   :  { %v850_v57 = vpop.f32.mrb[0].mxu1  ;;  %v811_v59 = vpop.f32.mrb[1].mxu0 }
  0xf8   :  { %v812_v60 = vadd.f32 %v811_v59, %v810_v56  ;;  %v851_v61 = vpop.f32.mrb[1].mxu1  ;;  %v813_v62 = vpop.f32.mrb[2].mxu0 }
  0xf9   :  { %v852_v63 = vadd.f32 %v851_v61, %v850_v57  ;;  %v853_v0 = vpop.f32.mrb[2].mxu1  ;;  %v814_v1 = vpop.f32.mrb[3].mxu0 }
  0xfa   :  { %v482_v2 = vadd.f32 %v812_v60, %v694_v58  ;;  %v815_v3 = vadd.f32 %v814_v1, %v813_v62  ;;  %v854_v4 = vpop.f32.mrb[3].mxu1 }
  0xfb   :  { %v855_v5 = vadd.f32 %v854_v4, %v853_v0 }
  0xfc   :  { %v485_v6 = vadd.f32 %v815_v3, %v694_v58  ;;  %v547_v7 = vadd.f32 %v852_v63, %v482_v2 }
  0xfe   :  { %v816_v8 = vpop.f32.mrb[4].mxu0  ;;  %v550_v9 = vadd.f32 %v855_v5, %v485_v6 }
  0xff   :  { %v856_v10 = vpop.f32.mrb[4].mxu1  ;;  %v817_v11 = vpop.f32.mrb[5].mxu0 }
 0x100   :  { %v818_v12 = vadd.f32 %v817_v11, %v816_v8  ;;  %v857_v13 = vpop.f32.mrb[5].mxu1  ;;  %v819_v14 = vpop.f32.mrb[6].mxu0 }
 0x101   :  { %v858_v15 = vadd.f32 %v857_v13, %v856_v10  ;;  %v859_v16 = vpop.f32.mrb[6].mxu1  ;;  %v820_v17 = vpop.f32.mrb[7].mxu0 }
 0x102   :  { %v490_v18 = vadd.f32 %v818_v12, %v694_v58  ;;  %v821_v19 = vadd.f32 %v820_v17, %v819_v14  ;;  %v860_v20 = vpop.f32.mrb[7].mxu1 }
 0x103   :  { %v861_v21 = vadd.f32 %v860_v20, %v859_v16 }
 0x104   :  { %v493_v22 = vadd.f32 %v821_v19, %v694_v58  ;;  %v555_v23 = vadd.f32 %v858_v15, %v490_v18 }
 0x106   :  { %v822_v24 = vpop.f32.mrb[8].mxu0  ;;  %v558_v25 = vadd.f32 %v861_v21, %v493_v22 }
 0x107   :  { %v862_v26 = vpop.f32.mrb[8].mxu1  ;;  %v823_v27 = vpop.f32.mrb[9].mxu0 }
 0x108   :  { %v824_v28 = vadd.f32 %v823_v27, %v822_v24  ;;  %v863_v29 = vpop.f32.mrb[9].mxu1  ;;  %v825_v30 = vpop.f32.mrb[10].mxu0 }
 0x109   :  { %v864_v31 = vadd.f32 %v863_v29, %v862_v26  ;;  %v865_v32 = vpop.f32.mrb[10].mxu1  ;;  %v826_v33 = vpop.f32.mrb[11].mxu0 }
 0x10a   :  { %v498_v34 = vadd.f32 %v824_v28, %v694_v58  ;;  %v827_v35 = vadd.f32 %v826_v33, %v825_v30  ;;  %v866_v36 = vpop.f32.mrb[11].mxu1 }
 0x10b   :  { %v867_v37 = vadd.f32 %v866_v36, %v865_v32 }
 0x10c   :  { %v501_v38 = vadd.f32 %v827_v35, %v694_v58  ;;  %v563_v39 = vadd.f32 %v864_v31, %v498_v34 }
 0x10e   :  { %v828_v40 = vpop.f32.mrb[12].mxu0  ;;  %v566_v41 = vadd.f32 %v867_v37, %v501_v38 }
 0x10f   :  { %v868_v42 = vpop.f32.mrb[12].mxu1  ;;  %v829_v43 = vpop.f32.mrb[13].mxu0 }
 0x110   :  { %v830_v44 = vadd.f32 %v829_v43, %v828_v40  ;;  %v869_v45 = vpop.f32.mrb[13].mxu1  ;;  %v831_v46 = vpop.f32.mrb[14].mxu0 }
 0x111   :  { %v870_v47 = vadd.f32 %v869_v45, %v868_v42  ;;  %v871_v48 = vpop.f32.mrb[14].mxu1  ;;  %v832_v49 = vpop.f32.mrb[15].mxu0 }
 0x112   :  { %v506_v50 = vadd.f32 %v830_v44, %v694_v58  ;;  %v833_v51 = vadd.f32 %v832_v49, %v831_v46  ;;  %v872_v52 = vpop.f32.mrb[15].mxu1 }
 0x113   :  { %v873_v53 = vadd.f32 %v872_v52, %v871_v48 }
 0x114   :  { %v509_v54 = vadd.f32 %v833_v51, %v694_v58  ;;  %v571_v55 = vadd.f32 %v870_v47, %v506_v50 }
 0x116   :  { %v892_v56 = vpop.f32.mrb[16].mxu0  ;;  %v574_v57 = vadd.f32 %v873_v53, %v509_v54 }
 0x117   :  { %v620_v59 = vadd.f32 %v892_v56, %v555_v23  ;;  %v896_v60 = vpop.f32.mrb[16].mxu1  ;;  %v611_v61 = vpop.f32.mrb[17].mxu0 }
 0x118   :  { %v636_v62 = vadd.f32 %v896_v60, %v571_v55  ;;  %v612_v63 = vadd.f32 %v611_v61, %v547_v7  ;;  %v627_v0 = vpop.f32.mrb[17].mxu1  ;;  %v893_v1 = vpop.f32.mrb[18].mxu0 }
 0x119   :  { %v628_v2 = vadd.f32 %v627_v0, %v563_v39  ;;  %v623_v3 = vadd.f32 %v893_v1, %v558_v25  ;;  %v897_v4 = vpop.f32.mrb[18].mxu1  ;;  %v614_v5 = vpop.f32.mrb[19].mxu0  ;;  %v644_v11 = vmax.f32 %v620_v59, 0.0 }
 0x11a   :  { %v639_v6 = vadd.f32 %v897_v4, %v574_v57  ;;  %v615_v8 = vadd.f32 %v614_v5, %v550_v9  ;;  %v630_v10 = vpop.f32.mrb[19].mxu1  ;;  %v648_v13 = vmax.f32 %v636_v62, 0.0  ;;  %v642_v14 = vmax.f32 %v612_v63, 0.0 }
 0x11b   :  { %v645_v12 = vmax.f32 %v623_v3, 0.0  ;;  %v631_v58 = vadd.f32 %v630_v10, %v566_v41  ;;  %v646_v17 = vmax.f32 %v628_v2, 0.0 }
 0x11c   :  { %v649_v15 = vmax.f32 %v639_v6, 0.0  ;;  %v643_v16 = vmax.f32 %v615_v8, 0.0 }
 0x11d   :  { %v779_v18 = vpack.c.bf16 %v645_v12, %v644_v11  ;;  %v647_v19 = vmax.f32 %v631_v58, 0.0 }
 0x11e   :  { %v789_v7 = vpack.c.bf16 %v649_v15, %v648_v13  ;;  %v774_v20 = vpack.c.bf16 %v643_v16, %v642_v14 }
 0x11f   :  { %791 = vst [vmem:[%s1176_s3 + $0x8] sm:$0xff] %v779_v18   ;;  %v784_v21 = vpack.c.bf16 %v647_v19, %v646_v17 }
 0x120   :  { %793 = vst [vmem:[%s1176_s3 + $0x18] sm:$0xff] %v789_v7   ;;  %775 = vst [vmem:[%s1176_s3] sm:$0xff] %v774_v20  }
 0x121   :  { %792 = vst [vmem:[%s1176_s3 + $0x10] sm:$0xff] %v784_v21  }

// kernel: forward.14
= control target key start
LH: loop header
LB: loop body
LE: loop exit
PB: predicated region body
PF: predicated region fallthrough
CT: control target
= control target key end

     0   :  { %vm1171_vm0 = vmmov 0   ;;  %s1441_s1 = inlined_call_operand.vmem [shape: bf16[1152,128], index: 1, kind: input, shape index: {}]   ;;  %s1442_s0 = inlined_call_operand.vmem [shape: bf16[16,1152], index: 0, kind: input, shape index: {}]   ;;  %s1443_s2 = inlined_call_operand.vmem [shape: f32[1,128], index: 2, kind: input, shape index: {}]   ;;  %s1444_s3 = inlined_call_operand.vmem [shape: bf16[16,128], index: 3, kind: output, shape index: {}]  }
   0x1   :  { %v1085_v0 = vld [vmem:[%s1441_s1 + $0x40] sm:$0xff]   ;;  %v1089_v4 = vld [vmem:[%s1441_s1 + $0x48] sm:$0xff]   ;;  %v1093_v8 = vld [vmem:[%s1441_s1 + $0x50] sm:$0xff]  }
   0x2   :  { %v1086_v1 = vld [vmem:[%s1441_s1] sm:$0xff]   ;;  %966 = vmatprep.subr.bf16.mxu0 %v1085_v0  ;;  %v1090_v5 = vld [vmem:[%s1441_s1 + $0x8] sm:$0xff]   ;;  %v1094_v9 = vld [vmem:[%s1441_s1 + $0x10] sm:$0xff]  }
   0x3   :  { %v1087_v2 = vld [vmem:[%s1441_s1 + $0xc0] sm:$0xff]   ;;  %967 = vmatpush3.bf16.msra.mxu0 %v1086_v1  ;;  %v1091_v6 = vld [vmem:[%s1441_s1 + $0xc8] sm:$0xff]   ;;  %v1095_v10 = vld [vmem:[%s1441_s1 + $0xd0] sm:$0xff]  }
   0x4   :  { %v1088_v3 = vld [vmem:[%s1441_s1 + $0x80] sm:$0xff]   ;;  %988 = vmatprep.subr.bf16.mxu1 %v1087_v2  ;;  %968 = vmatprep.subr.bf16.mxu0 %v1089_v4  ;;  %v1092_v7 = vld [vmem:[%s1441_s1 + $0x88] sm:$0xff]   ;;  %v1096_v11 = vld [vmem:[%s1441_s1 + $0x90] sm:$0xff]  }
   0x5   :  { %989 = vmatpush3.bf16.msra.mxu1 %v1088_v3  ;;  %v1097_v12 = vld [vmem:[%s1441_s1 + $0x58] sm:$0xff]   ;;  %v1101_v16 = vld [vmem:[%s1441_s1 + $0x60] sm:$0xff]   ;;  %v1105_v20 = vld [vmem:[%s1441_s1 + $0x68] sm:$0xff]  }
   0x6   :  { %990 = vmatprep.subr.bf16.mxu1 %v1091_v6  ;;  %v1098_v13 = vld [vmem:[%s1441_s1 + $0x18] sm:$0xff]   ;;  %v1102_v17 = vld [vmem:[%s1441_s1 + $0x20] sm:$0xff]   ;;  %v1106_v21 = vld [vmem:[%s1441_s1 + $0x28] sm:$0xff]   ;;  %v1170_v6 = vmov 0.0  }
   0x7   :  { %969 = vmatpush3.bf16.msra.mxu0 %v1090_v5  ;;  %v1099_v14 = vld [vmem:[%s1441_s1 + $0xd8] sm:$0xff]   ;;  %v1103_v18 = vld [vmem:[%s1441_s1 + $0xe0] sm:$0xff]   ;;  %v1107_v22 = vld [vmem:[%s1441_s1 + $0xe8] sm:$0xff]  }
   0x8   :  { %970 = vmatprep.subr.bf16.mxu0 %v1093_v8  ;;  %v1100_v15 = vld [vmem:[%s1441_s1 + $0x98] sm:$0xff]   ;;  %v1104_v19 = vld [vmem:[%s1441_s1 + $0xa0] sm:$0xff]   ;;  %v1108_v23 = vld [vmem:[%s1441_s1 + $0xa8] sm:$0xff]  }
   0x9   :  { %991 = vmatpush3.bf16.msra.mxu1 %v1092_v7  ;;  %v1109_v24 = vld [vmem:[%s1441_s1 + $0x70] sm:$0xff]   ;;  %v1113_v28 = vld [vmem:[%s1441_s1 + $0x78] sm:$0xff]   ;;  %v1116_v31 = vld [vmem:[%s1442_s0] ss:$36 sps:$4 sm:$0xff]  }
   0xa   :  { %992 = vmatprep.subr.bf16.mxu1 %v1095_v10  ;;  %v1110_v25 = vld [vmem:[%s1441_s1 + $0x30] sm:$0xff]   ;;  %v1114_v29 = vld [vmem:[%s1441_s1 + $0x38] sm:$0xff]   ;;  %v1118_v32 = vld [vmem:[%s1442_s0 + $0x4] ss:$36 sps:$4 sm:$0xff]  }
   0xb   :  { %971 = vmatpush3.bf16.msra.mxu0 %v1094_v9  ;;  %v1111_v26 = vld [vmem:[%s1441_s1 + $0xf0] sm:$0xff]   ;;  %v1115_v30 = vld [vmem:[%s1441_s1 + $0xf8] sm:$0xff]   ;;  %686 = vmatprep.mubr.bf16.mxu0 %v1118_v32  ;;  %v1120_v34 = vld [vmem:[%s1441_s1 + $0x140] sm:$0xff]  }
   0xc   :  { %972 = vmatprep.subr.bf16.mxu0 %v1097_v12  ;;  %v1112_v27 = vld [vmem:[%s1441_s1 + $0xb0] sm:$0xff]   ;;  %v1119_v33 = vld [vmem:[%s1441_s1 + $0xb8] sm:$0xff]   ;;  %v1121_v35 = vld [vmem:[%s1442_s0 + $0x8] ss:$36 sps:$4 sm:$0xff]  }
   0xd   :  { %993 = vmatpush3.bf16.msra.mxu1 %v1096_v11  ;;  %v1123_v36 = vld [vmem:[%s1442_s0 + $0xc] ss:$36 sps:$4 sm:$0xff]   ;;  %v1124_v37 = vld [vmem:[%s1441_s1 + $0x100] sm:$0xff]   ;;  %v1135_v48 = vld [vmem:[%s1441_s1 + $0x158] sm:$0xff]  }
   0xe   :  { %994 = vmatprep.subr.bf16.mxu1 %v1099_v14  ;;  %727 = vmatprep.mubr.bf16.mxu1 %v1123_v36  ;;  %v1125_v38 = vld [vmem:[%s1441_s1 + $0x1c0] sm:$0xff]   ;;  %v1127_v40 = vld [vmem:[%s1441_s1 + $0x148] sm:$0xff]   ;;  %v1131_v44 = vld [vmem:[%s1441_s1 + $0x150] sm:$0xff]  }
   0xf   :  { %973 = vmatpush3.bf16.msra.mxu0 %v1098_v13  ;;  %v1126_v39 = vld [vmem:[%s1441_s1 + $0x180] sm:$0xff]   ;;  %v1128_v41 = vld [vmem:[%s1441_s1 + $0x108] sm:$0xff]   ;;  %v1132_v45 = vld [vmem:[%s1441_s1 + $0x110] sm:$0xff]  }
  0x10   :  { %974 = vmatprep.subr.bf16.mxu0 %v1101_v16  ;;  %v1129_v42 = vld [vmem:[%s1441_s1 + $0x1c8] sm:$0xff]   ;;  %v1133_v46 = vld [vmem:[%s1441_s1 + $0x1d0] sm:$0xff]   ;;  %v1136_v49 = vld [vmem:[%s1441_s1 + $0x118] sm:$0xff]  }
  0x11   :  { %995 = vmatpush3.bf16.msra.mxu1 %v1100_v15  ;;  %v1130_v43 = vld [vmem:[%s1441_s1 + $0x188] sm:$0xff]   ;;  %v1134_v47 = vld [vmem:[%s1441_s1 + $0x190] sm:$0xff]   ;;  %v1137_v50 = vld [vmem:[%s1441_s1 + $0x1d8] sm:$0xff]  }
  0x12   :  { %996 = vmatprep.subr.bf16.mxu1 %v1103_v18  ;;  %v1138_v51 = vld [vmem:[%s1441_s1 + $0x198] sm:$0xff]   ;;  %v1139_v52 = vld [vmem:[%s1441_s1 + $0x160] sm:$0xff]   ;;  %v1143_v56 = vld [vmem:[%s1441_s1 + $0x168] sm:$0xff]  }
  0x13   :  { %975 = vmatpush3.bf16.msra.mxu0 %v1102_v17  ;;  %v1140_v53 = vld [vmem:[%s1441_s1 + $0x120] sm:$0xff]   ;;  %v1144_v57 = vld [vmem:[%s1441_s1 + $0x128] sm:$0xff]   ;;  %v1147_v60 = vld [vmem:[%s1441_s1 + $0x170] sm:$0xff]  }
  0x14   :  { %976 = vmatprep.subr.bf16.mxu0 %v1105_v20  ;;  %v1141_v54 = vld [vmem:[%s1441_s1 + $0x1e0] sm:$0xff]   ;;  %v1145_v58 = vld [vmem:[%s1441_s1 + $0x1e8] sm:$0xff]   ;;  %v1148_v61 = vld [vmem:[%s1441_s1 + $0x130] sm:$0xff]  }
  0x15   :  { %997 = vmatpush3.bf16.msra.mxu1 %v1104_v19  ;;  %v1142_v55 = vld [vmem:[%s1441_s1 + $0x1a0] sm:$0xff]   ;;  %v1146_v59 = vld [vmem:[%s1441_s1 + $0x1a8] sm:$0xff]   ;;  %v1149_v62 = vld [vmem:[%s1441_s1 + $0x1f0] sm:$0xff]  }
  0x16   :  { %998 = vmatprep.subr.bf16.mxu1 %v1107_v22  ;;  %v1150_v63 = vld [vmem:[%s1441_s1 + $0x1b0] sm:$0xff]   ;;  %v1151_v0 = vld [vmem:[%s1441_s1 + $0x178] sm:$0xff]   ;;  %v1161_v9 = vld [vmem:[%s1441_s1 + $0x200] sm:$0xff]  }
  0x17   :  { %977 = vmatpush3.bf16.msra.mxu0 %v1106_v21  ;;  %v1152_v1 = vld [vmem:[%s1441_s1 + $0x138] sm:$0xff]   ;;  %v1154_v3 = vld [vmem:[%s1442_s0 + $0x10] ss:$36 sps:$4 sm:$0xff]   ;;  %v1162_v10 = vld [vmem:[%s1441_s1 + $0x208] sm:$0xff]  }
  0x18   :  { %978 = vmatprep.subr.bf16.mxu0 %v1109_v24  ;;  %v1153_v2 = vld [vmem:[%s1441_s1 + $0x1f8] sm:$0xff]   ;;  %v1163_v11 = vld [vmem:[%s1441_s1 + $0x210] sm:$0xff]   ;;  %v1165_v13 = vld [vmem:[%s1441_s1 + $0x220] sm:$0xff]  }
  0x19   :  { %999 = vmatpush3.bf16.msra.mxu1 %v1108_v23  ;;  %v1156_v4 = vld [vmem:[%s1442_s0 + $0x14] ss:$36 sps:$4 sm:$0xff]   ;;  %v1160_v8 = vld [vmem:[%s1442_s0 + $0x1c] ss:$36 sps:$4 sm:$0xff]   ;;  %v1166_v14 = vld [vmem:[%s1441_s1 + $0x228] sm:$0xff]  }
  0x1a   :  { %1000 = vmatprep.subr.bf16.mxu1 %v1111_v26  ;;  %v1157_v5 = vld [vmem:[%s1441_s1 + $0x1b8] sm:$0xff]   ;;  %v1167_v15 = vld [vmem:[%s1441_s1 + $0x230] sm:$0xff]   ;;  %v1169_v17 = vld [vmem:[%s1442_s0 + $0x20] ss:$36 sps:$4 sm:$0xff]  }
  0x1b   :  { %979 = vmatpush3.bf16.msra.mxu0 %v1110_v25  ;;  %v1158_v7 = vld [vmem:[%s1442_s0 + $0x18] ss:$36 sps:$4 sm:$0xff]   ;;  %v875_v19 = vld [vmem:[%s1443_s2] ss:$0 sm:$0xff] }
  0x1c   :  { %980 = vmatprep.subr.bf16.mxu0 %v1113_v28  ;;  %v1164_v12 = vld [vmem:[%s1441_s1 + $0x218] sm:$0xff]  }
  0x1d   :  { %1001 = vmatpush3.bf16.msra.mxu1 %v1112_v27  ;;  %v1168_v16 = vld [vmem:[%s1441_s1 + $0x238] sm:$0xff]  }
  0x1e   :  { %1002 = vmatprep.subr.bf16.mxu1 %v1115_v30 }
  0x1f   :  { %981 = vmatpush3.bf16.msra.mxu0 %v1114_v29 }
  0x20   :  { %1010 = vmatprep.subr.bf16.mxu0 %v1120_v34 }
  0x21   :  { %1003 = vmatpush3.bf16.msra.mxu1 %v1119_v33 }
  0x22   :  { %687 = vmatmul.mubr.bf16.vlgmr.msra.gmra.mrb[0].mxu0 %v1116_v31  ;;  %1032 = vmatprep.subr.bf16.mxu1 %v1125_v38 }
  0x23   :  { %1011 = vmatpush3.bf16.msra.mxu0 %v1124_v37  ;;  %768 = vmatprep.mubr.bf16.mxu0 %v1156_v4 }
  0x24   :  { %728 = vmatmul.mubr.bf16.vlgmr.msra.gmra.mrb[0].mxu1 %v1121_v35  ;;  %1012 = vmatprep.subr.bf16.mxu0 %v1127_v40 }
  0x25   :  { %1033 = vmatpush3.bf16.msra.mxu1 %v1126_v39  ;;  %809 = vmatprep.mubr.bf16.mxu1 %v1160_v8 }
  0x26   :  { %1034 = vmatprep.subr.bf16.mxu1 %v1129_v42 }
  0x27   :  { %1013 = vmatpush3.bf16.msra.mxu0 %v1128_v41 }
  0x28   :  { %1014 = vmatprep.subr.bf16.mxu0 %v1131_v44 }
  0x29   :  { %1035 = vmatpush3.bf16.msra.mxu1 %v1130_v43 }
  0x2a   :  { %1036 = vmatprep.subr.bf16.mxu1 %v1133_v46 }
  0x2b   :  { %1015 = vmatpush3.bf16.msra.mxu0 %v1132_v45 }
  0x2c   :  { %1016 = vmatprep.subr.bf16.mxu0 %v1135_v48 }
  0x2d   :  { %1037 = vmatpush3.bf16.msra.mxu1 %v1134_v47 }
  0x2e   :  { %1038 = vmatprep.subr.bf16.mxu1 %v1137_v50 }
  0x2f   :  { %1017 = vmatpush3.bf16.msra.mxu0 %v1136_v49 }
  0x30   :  { %1018 = vmatprep.subr.bf16.mxu0 %v1139_v52 }
  0x31   :  { %1039 = vmatpush3.bf16.msra.mxu1 %v1138_v51 }
  0x32   :  { %1040 = vmatprep.subr.bf16.mxu1 %v1141_v54 }
  0x33   :  { %1019 = vmatpush3.bf16.msra.mxu0 %v1140_v53 }
  0x34   :  { %1020 = vmatprep.subr.bf16.mxu0 %v1143_v56 }
  0x35   :  { %1041 = vmatpush3.bf16.msra.mxu1 %v1142_v55 }
  0x36   :  { %1042 = vmatprep.subr.bf16.mxu1 %v1145_v58 }
  0x37   :  { %1021 = vmatpush3.bf16.msra.mxu0 %v1144_v57 }
  0x38   :  { %1022 = vmatprep.subr.bf16.mxu0 %v1147_v60 }
  0x39   :  { %1043 = vmatpush3.bf16.msra.mxu1 %v1146_v59 }
  0x3a   :  { %1044 = vmatprep.subr.bf16.mxu1 %v1149_v62 }
  0x3b   :  { %1023 = vmatpush3.bf16.msra.mxu0 %v1148_v61 }
  0x3c   :  { %1024 = vmatprep.subr.bf16.mxu0 %v1151_v0 }
  0x3d   :  { %1045 = vmatpush3.bf16.msra.mxu1 %v1150_v63 }
  0x3e   :  { %1046 = vmatprep.subr.bf16.mxu1 %v1153_v2 }
  0x3f   :  { %1025 = vmatpush3.bf16.msra.mxu0 %v1152_v1 }
  0x40   :  { %1063 = vmatprep.subr.bf16.mxu0 %v1170_v6 }
  0x41   :  { %1047 = vmatpush3.bf16.msra.mxu1 %v1157_v5 }
  0x42   :  { %769 = vmatmul.mubr.bf16.vlgmr.msra.gmra.mrb[4].mxu0 %v1154_v3 }
  0x43   :  { %1079 = vmatprep.mubr.msk.bf16.mxu0 %vm1171_vm0, %v1170_v6  ;;  %1064 = vmatpush3.bf16.msra.mxu0 %v1161_v9 }
  0x44   :  { %810 = vmatmul.mubr.bf16.vlgmr.msra.gmra.mrb[4].mxu1 %v1158_v7  ;;  %1065 = vmatprep.subr.bf16.mxu0 %v1170_v6 }
  0x47   :  { %1066 = vmatpush3.bf16.msra.mxu0 %v1162_v10 }
  0x48   :  { %1067 = vmatprep.subr.bf16.mxu0 %v1170_v6 }
  0x4b   :  { %1068 = vmatpush3.bf16.msra.mxu0 %v1163_v11 }
  0x4c   :  { %1069 = vmatprep.subr.bf16.mxu0 %v1170_v6 }
  0x4f   :  { %1070 = vmatpush3.bf16.msra.mxu0 %v1164_v12 }
  0x50   :  { %1071 = vmatprep.subr.bf16.mxu0 %v1170_v6 }
  0x53   :  { %1072 = vmatpush3.bf16.msra.mxu0 %v1165_v13 }
  0x54   :  { %1073 = vmatprep.subr.bf16.mxu0 %v1170_v6 }
  0x57   :  { %1074 = vmatpush3.bf16.msra.mxu0 %v1166_v14 }
  0x58   :  { %1075 = vmatprep.subr.bf16.mxu0 %v1170_v6 }
  0x5b   :  { %1076 = vmatpush3.bf16.msra.mxu0 %v1167_v15 }
  0x5c   :  { %1077 = vmatprep.subr.bf16.mxu0 %v1170_v6 }
  0x5f   :  { %1078 = vmatpush3.bf16.msra.mxu0 %v1168_v16 }
  0x62   :  { %1080 = vmatmul.mubr.bf16.vlgmr.msra.gmra.mrb[8].mxu0 %v1169_v17 }
  0xf5   :  { %v982_v18 = vpop.f32.mrb[0].mxu0 }
  0xf6   :  { %v983_v20 = vpop.f32.mrb[1].mxu0 }
  0xf7   :  { %v984_v21 = vadd.f32 %v983_v20, %v982_v18  ;;  %v985_v22 = vpop.f32.mrb[2].mxu0  ;;  %v1004_v23 = vpop.f32.mrb[0].mxu1 }
  0xf8   :  { %v986_v24 = vpop.f32.mrb[3].mxu0  ;;  %v1005_v27 = vpop.f32.mrb[1].mxu1 }
  0xf9   :  { %v689_v25 = vadd.f32 %v984_v21, %v875_v19  ;;  %v987_v26 = vadd.f32 %v986_v24, %v985_v22  ;;  %v1006_v28 = vadd.f32 %v1005_v27, %v1004_v23  ;;  %v1007_v29 = vpop.f32.mrb[2].mxu1 }
  0xfa   :  { %v1008_v31 = vpop.f32.mrb[3].mxu1 }
  0xfb   :  { %v692_v30 = vadd.f32 %v987_v26, %v875_v19  ;;  %v730_v32 = vadd.f32 %v1006_v28, %v689_v25  ;;  %v1009_v33 = vadd.f32 %v1008_v31, %v1007_v29 }
  0xfd   :  { %v733_v34 = vadd.f32 %v1009_v33, %v692_v30 }
 0x115   :  { %v1026_v35 = vpop.f32.mrb[4].mxu0 }
 0x116   :  { %v1027_v36 = vpop.f32.mrb[5].mxu0 }
 0x117   :  { %v1028_v37 = vadd.f32 %v1027_v36, %v1026_v35  ;;  %v1029_v38 = vpop.f32.mrb[6].mxu0  ;;  %v1048_v39 = vpop.f32.mrb[4].mxu1 }
 0x118   :  { %v1030_v40 = vpop.f32.mrb[7].mxu0  ;;  %v1049_v43 = vpop.f32.mrb[5].mxu1 }
 0x119   :  { %v771_v41 = vadd.f32 %v1028_v37, %v730_v32  ;;  %v1031_v42 = vadd.f32 %v1030_v40, %v1029_v38  ;;  %v1050_v44 = vadd.f32 %v1049_v43, %v1048_v39  ;;  %v1051_v45 = vpop.f32.mrb[6].mxu1 }
 0x11a   :  { %v1052_v47 = vpop.f32.mrb[7].mxu1 }
 0x11b   :  { %v774_v46 = vadd.f32 %v1031_v42, %v733_v34  ;;  %v1053_v48 = vadd.f32 %v1052_v47, %v1051_v45  ;;  %v812_v49 = vadd.f32 %v1050_v44, %v771_v41 }
 0x11d   :  { %v815_v50 = vadd.f32 %v1053_v48, %v774_v46 }
 0x135   :  { %v852_v51 = vpop.f32.mrb[8].mxu0 }
 0x136   :  { %v853_v52 = vadd.f32 %v852_v51, %v812_v49  ;;  %v1081_v53 = vpop.f32.mrb[9].mxu0 }
 0x137   :  { %v855_v54 = vpop.f32.mrb[10].mxu0 }
 0x138   :  { %v856_v55 = vadd.f32 %v855_v54, %v815_v50  ;;  %v1082_v56 = vpop.f32.mrb[11].mxu0  ;;  %v859_v57 = vmax.f32 %v853_v52, 0.0 }
 0x13a   :  { %v860_v58 = vmax.f32 %v856_v55, 0.0 }
 0x13c   :  { %v964_v59 = vpack.c.bf16 %v860_v58, %v859_v57 }
 0x13e   :  { %965 = vst [vmem:[%s1444_s3] sm:$0xff] %v964_v59  }

// kernel: forward.16
= control target key start
LH: loop header
LB: loop body
LE: loop exit
PB: predicated region body
PF: predicated region fallthrough
CT: control target
= control target key end

     0   :  { %v1129_v21 = vmov 1983009808   ;;  %v176_v23 = vlaneseq  ;;  %vm1131_vm0 = vmmov 0   ;;  %s1389_s1 = inlined_call_operand.vmem [shape: bf16[1152,128], index: 1, kind: input, shape index: {}]   ;;  %s1390_s0 = inlined_call_operand.vmem [shape: bf16[4,1152], index: 0, kind: input, shape index: {}]   ;;  %s1391_s2 = inlined_call_operand.vmem [shape: f32[1,128], index: 2, kind: input, shape index: {}]   ;;  %s1392_s3 = inlined_call_operand.vmem [shape: bf16[4,128], index: 3, kind: output, shape index: {}]  }
   0x1   :  { %v1055_v0 = vld [vmem:[%s1389_s1 + $0x40] sm:$0xff]   ;;  %v1059_v4 = vld [vmem:[%s1389_s1 + $0x48] sm:$0xff]   ;;  %v1063_v8 = vld [vmem:[%s1389_s1 + $0x50] sm:$0xff]   ;;  %v174_v22 = vunpack.c.l.s4 %v1129_v21 }
   0x2   :  { %v1056_v1 = vld [vmem:[%s1389_s1] sm:$0xff]   ;;  %935 = vmatprep.subr.bf16.mxu0 %v1055_v0  ;;  %v1060_v5 = vld [vmem:[%s1389_s1 + $0x8] sm:$0xff]   ;;  %v1064_v9 = vld [vmem:[%s1389_s1 + $0x10] sm:$0xff]   ;;  %v177_v29 = vshrl.u32 %v176_v23, 7 }
   0x3   :  { %v1057_v2 = vld [vmem:[%s1389_s1 + $0xc0] sm:$0xff]   ;;  %936 = vmatpush3.bf16.msra.mxu0 %v1056_v1  ;;  %v1061_v6 = vld [vmem:[%s1389_s1 + $0xc8] sm:$0xff]   ;;  %v1065_v10 = vld [vmem:[%s1389_s1 + $0xd0] sm:$0xff]   ;;  %v175_v28 = vunpack.c.0.s8 %v174_v22 }
   0x4   :  { %v1058_v3 = vld [vmem:[%s1389_s1 + $0x80] sm:$0xff]   ;;  %957 = vmatprep.subr.bf16.mxu1 %v1057_v2  ;;  %937 = vmatprep.subr.bf16.mxu0 %v1059_v4  ;;  %v1062_v7 = vld [vmem:[%s1389_s1 + $0x88] sm:$0xff]   ;;  %v1066_v11 = vld [vmem:[%s1389_s1 + $0x90] sm:$0xff]  }
   0x5   :  { %958 = vmatpush3.bf16.msra.mxu1 %v1058_v3  ;;  %v1067_v12 = vld [vmem:[%s1389_s1 + $0x58] sm:$0xff]   ;;  %v1071_v16 = vld [vmem:[%s1389_s1 + $0x60] sm:$0xff]   ;;  %v1075_v20 = vld [vmem:[%s1389_s1 + $0x68] sm:$0xff]   ;;  %v1239_v34 = vsub.s32 %v175_v28, %v177_v29 }
   0x6   :  { %959 = vmatprep.subr.bf16.mxu1 %v1061_v6  ;;  %v1068_v13 = vld [vmem:[%s1389_s1 + $0x18] sm:$0xff]   ;;  %v1072_v17 = vld [vmem:[%s1389_s1 + $0x20] sm:$0xff]   ;;  %v1076_v24 = vld [vmem:[%s1389_s1 + $0x28] sm:$0xff]  }
   0x7   :  { %938 = vmatpush3.bf16.msra.mxu0 %v1060_v5  ;;  %v1069_v14 = vld [vmem:[%s1389_s1 + $0xd8] sm:$0xff]   ;;  %v1073_v18 = vld [vmem:[%s1389_s1 + $0xe0] sm:$0xff]   ;;  %v1077_v25 = vld [vmem:[%s1389_s1 + $0xe8] sm:$0xff]  }
   0x8   :  { %939 = vmatprep.subr.bf16.mxu0 %v1063_v8  ;;  %v1070_v15 = vld [vmem:[%s1389_s1 + $0x98] sm:$0xff]   ;;  %v1074_v19 = vld [vmem:[%s1389_s1 + $0xa0] sm:$0xff]   ;;  %v1078_v26 = vld [vmem:[%s1389_s1 + $0xa8] sm:$0xff]  }
   0x9   :  { %960 = vmatpush3.bf16.msra.mxu1 %v1062_v7  ;;  %v1079_v27 = vld [vmem:[%s1389_s1 + $0x70] sm:$0xff]   ;;  %v1083_v33 = vld [vmem:[%s1389_s1 + $0x78] sm:$0xff]   ;;  %v15_v37 = vld [vmem:[%s1390_s0] sm:$0xff] }
   0xa   :  { %961 = vmatprep.subr.bf16.mxu1 %v1065_v10  ;;  %v1080_v30 = vld [vmem:[%s1389_s1 + $0x30] sm:$0xff]   ;;  %v1084_v35 = vld [vmem:[%s1389_s1 + $0x38] sm:$0xff]   ;;  %v179_v38 = vrot.slane %v15_v37, %v1239_v34  ;;  %v172_v40 = vcombine.high %v15_v37, %v15_v37  ;;  %v1087_v41 = vld [vmem:[%s1389_s1 + $0x140] sm:$0xff]  }
   0xb   :  { %940 = vmatpush3.bf16.msra.mxu0 %v1064_v9  ;;  %v1081_v31 = vld [vmem:[%s1389_s1 + $0xf0] sm:$0xff]   ;;  %v1085_v36 = vld [vmem:[%s1389_s1 + $0xf8] sm:$0xff]   ;;  %v1089_v44 = vld [vmem:[%s1389_s1 + $0x100] sm:$0xff]  }
   0xc   :  { %941 = vmatprep.subr.bf16.mxu0 %v1067_v12  ;;  %v1082_v32 = vld [vmem:[%s1389_s1 + $0xb0] sm:$0xff]   ;;  %v1086_v39 = vld [vmem:[%s1389_s1 + $0xb8] sm:$0xff]   ;;  %v187_v42 = vcombine.high %v179_v38, %v179_v38  ;;  %v186_v43 = vrot.slane %v172_v40, %v1239_v34  ;;  %v1090_v45 = vld [vmem:[%s1389_s1 + $0x1c0] sm:$0xff]  }
   0xd   :  { %962 = vmatpush3.bf16.msra.mxu1 %v1066_v11  ;;  %v1091_v47 = vld [vmem:[%s1389_s1 + $0x180] sm:$0xff]   ;;  %v1092_v48 = vld [vmem:[%s1389_s1 + $0x148] sm:$0xff]   ;;  %v1096_v52 = vld [vmem:[%s1389_s1 + $0x150] sm:$0xff]  }
   0xe   :  { %963 = vmatprep.subr.bf16.mxu1 %v1069_v14  ;;  %686 = vmatprep.mubr.bf16.mxu0 %v187_v42  ;;  %v188_v46 = vcombine.high %v186_v43, %v186_v43  ;;  %v1093_v49 = vld [vmem:[%s1389_s1 + $0x108] sm:$0xff]   ;;  %v1097_v53 = vld [vmem:[%s1389_s1 + $0x110] sm:$0xff]   ;;  %v1100_v56 = vld [vmem:[%s1389_s1 + $0x158] sm:$0xff]  }
   0xf   :  { %942 = vmatpush3.bf16.msra.mxu0 %v1068_v13  ;;  %v1094_v50 = vld [vmem:[%s1389_s1 + $0x1c8] sm:$0xff]   ;;  %v1098_v54 = vld [vmem:[%s1389_s1 + $0x1d0] sm:$0xff]   ;;  %v1101_v57 = vld [vmem:[%s1389_s1 + $0x118] sm:$0xff]  }
  0x10   :  { %943 = vmatprep.subr.bf16.mxu0 %v1071_v16  ;;  %726 = vmatprep.mubr.bf16.mxu1 %v188_v46  ;;  %v1095_v51 = vld [vmem:[%s1389_s1 + $0x188] sm:$0xff]   ;;  %v1099_v55 = vld [vmem:[%s1389_s1 + $0x190] sm:$0xff]   ;;  %v1102_v58 = vld [vmem:[%s1389_s1 + $0x1d8] sm:$0xff]  }
  0x11   :  { %964 = vmatpush3.bf16.msra.mxu1 %v1070_v15  ;;  %v1103_v59 = vld [vmem:[%s1389_s1 + $0x198] sm:$0xff]   ;;  %v1104_v60 = vld [vmem:[%s1389_s1 + $0x160] sm:$0xff]   ;;  %v1108_v0 = vld [vmem:[%s1389_s1 + $0x168] sm:$0xff]  }
  0x12   :  { %965 = vmatprep.subr.bf16.mxu1 %v1073_v18  ;;  %v1105_v61 = vld [vmem:[%s1389_s1 + $0x120] sm:$0xff]   ;;  %v1109_v1 = vld [vmem:[%s1389_s1 + $0x128] sm:$0xff]   ;;  %v1112_v4 = vld [vmem:[%s1389_s1 + $0x170] sm:$0xff]   ;;  %v1130_v18 = vmov 0.0  }
  0x13   :  { %944 = vmatpush3.bf16.msra.mxu0 %v1072_v17  ;;  %v1106_v62 = vld [vmem:[%s1389_s1 + $0x1e0] sm:$0xff]   ;;  %v1110_v2 = vld [vmem:[%s1389_s1 + $0x1e8] sm:$0xff]   ;;  %v1113_v5 = vld [vmem:[%s1389_s1 + $0x130] sm:$0xff]  }
  0x14   :  { %945 = vmatprep.subr.bf16.mxu0 %v1075_v20  ;;  %v1107_v63 = vld [vmem:[%s1389_s1 + $0x1a0] sm:$0xff]   ;;  %v1111_v3 = vld [vmem:[%s1389_s1 + $0x1a8] sm:$0xff]   ;;  %v1114_v6 = vld [vmem:[%s1389_s1 + $0x1f0] sm:$0xff]  }
  0x15   :  { %966 = vmatpush3.bf16.msra.mxu1 %v1074_v19  ;;  %v1115_v7 = vld [vmem:[%s1389_s1 + $0x1b0] sm:$0xff]   ;;  %v1116_v8 = vld [vmem:[%s1389_s1 + $0x178] sm:$0xff]   ;;  %v16_v11 = vld [vmem:[%s1390_s0 + $0x8] sm:$0xff] }
  0x16   :  { %967 = vmatprep.subr.bf16.mxu1 %v1077_v25  ;;  %v1117_v9 = vld [vmem:[%s1389_s1 + $0x138] sm:$0xff]   ;;  %v196_v12 = vrot.slane %v16_v11, %v1239_v34  ;;  %v189_v14 = vcombine.high %v16_v11, %v16_v11  ;;  %v1121_v17 = vld [vmem:[%s1389_s1 + $0x200] sm:$0xff]   ;;  %v1122_v20 = vld [vmem:[%s1389_s1 + $0x208] sm:$0xff]  }
  0x17   :  { %946 = vmatpush3.bf16.msra.mxu0 %v1076_v24  ;;  %v1118_v10 = vld [vmem:[%s1389_s1 + $0x1f8] sm:$0xff]   ;;  %v1123_v21 = vld [vmem:[%s1389_s1 + $0x210] sm:$0xff]   ;;  %v1125_v23 = vld [vmem:[%s1389_s1 + $0x220] sm:$0xff]  }
  0x18   :  { %947 = vmatprep.subr.bf16.mxu0 %v1079_v27  ;;  %v1119_v13 = vld [vmem:[%s1389_s1 + $0x1b8] sm:$0xff]   ;;  %v204_v15 = vcombine.high %v196_v12, %v196_v12  ;;  %v203_v16 = vrot.slane %v189_v14, %v1239_v34  ;;  %v1126_v24 = vld [vmem:[%s1389_s1 + $0x228] sm:$0xff]   ;;  %v1127_v25 = vld [vmem:[%s1389_s1 + $0x230] sm:$0xff]  }
  0x19   :  { %968 = vmatpush3.bf16.msra.mxu1 %v1078_v26  ;;  %v1124_v22 = vld [vmem:[%s1389_s1 + $0x218] sm:$0xff]   ;;  %v862_v27 = vld.sshfl [vmem:[%s1390_s0 + $0x10] sm:$0x3 pattern:$0x76325410] }
  0x1a   :  { %969 = vmatprep.subr.bf16.mxu1 %v1081_v31  ;;  %v205_v19 = vcombine.high %v203_v16, %v203_v16  ;;  %v1128_v26 = vld [vmem:[%s1389_s1 + $0x238] sm:$0xff]   ;;  %v861_v29 = vld [vmem:[%s1391_s2] ss:$0 sm:$0xff] }
  0x1b   :  { %948 = vmatpush3.bf16.msra.mxu0 %v1080_v30 }
  0x1c   :  { %949 = vmatprep.subr.bf16.mxu0 %v1083_v33 }
  0x1d   :  { %970 = vmatpush3.bf16.msra.mxu1 %v1082_v32 }
  0x1e   :  { %971 = vmatprep.subr.bf16.mxu1 %v1085_v36 }
  0x1f   :  { %950 = vmatpush3.bf16.msra.mxu0 %v1084_v35 }
  0x20   :  { %979 = vmatprep.subr.bf16.mxu0 %v1087_v41 }
  0x21   :  { %972 = vmatpush3.bf16.msra.mxu1 %v1086_v39 }
  0x22   :  { %687 = vmatmul.mubr.bf16.vlgmr.msra.gmra.mrb[0].mxu0 %v179_v38  ;;  %1001 = vmatprep.subr.bf16.mxu1 %v1090_v45 }
  0x23   :  { %980 = vmatpush3.bf16.msra.mxu0 %v1089_v44  ;;  %766 = vmatprep.mubr.bf16.mxu0 %v204_v15 }
  0x24   :  { %727 = vmatmul.mubr.bf16.vlgmr.msra.gmra.mrb[0].mxu1 %v186_v43  ;;  %981 = vmatprep.subr.bf16.mxu0 %v1092_v48 }
  0x25   :  { %1002 = vmatpush3.bf16.msra.mxu1 %v1091_v47  ;;  %806 = vmatprep.mubr.bf16.mxu1 %v205_v19 }
  0x26   :  { %1003 = vmatprep.subr.bf16.mxu1 %v1094_v50 }
  0x27   :  { %982 = vmatpush3.bf16.msra.mxu0 %v1093_v49 }
  0x28   :  { %983 = vmatprep.subr.bf16.mxu0 %v1096_v52 }
  0x29   :  { %1004 = vmatpush3.bf16.msra.mxu1 %v1095_v51 }
  0x2a   :  { %1005 = vmatprep.subr.bf16.mxu1 %v1098_v54 }
  0x2b   :  { %984 = vmatpush3.bf16.msra.mxu0 %v1097_v53 }
  0x2c   :  { %985 = vmatprep.subr.bf16.mxu0 %v1100_v56 }
  0x2d   :  { %1006 = vmatpush3.bf16.msra.mxu1 %v1099_v55 }
  0x2e   :  { %1007 = vmatprep.subr.bf16.mxu1 %v1102_v58 }
  0x2f   :  { %986 = vmatpush3.bf16.msra.mxu0 %v1101_v57 }
  0x30   :  { %987 = vmatprep.subr.bf16.mxu0 %v1104_v60 }
  0x31   :  { %1008 = vmatpush3.bf16.msra.mxu1 %v1103_v59 }
  0x32   :  { %1009 = vmatprep.subr.bf16.mxu1 %v1106_v62 }
  0x33   :  { %988 = vmatpush3.bf16.msra.mxu0 %v1105_v61 }
  0x34   :  { %989 = vmatprep.subr.bf16.mxu0 %v1108_v0 }
  0x35   :  { %1010 = vmatpush3.bf16.msra.mxu1 %v1107_v63 }
  0x36   :  { %1011 = vmatprep.subr.bf16.mxu1 %v1110_v2 }
  0x37   :  { %990 = vmatpush3.bf16.msra.mxu0 %v1109_v1 }
  0x38   :  { %991 = vmatprep.subr.bf16.mxu0 %v1112_v4 }
  0x39   :  { %1012 = vmatpush3.bf16.msra.mxu1 %v1111_v3 }
  0x3a   :  { %1013 = vmatprep.subr.bf16.mxu1 %v1114_v6 }
  0x3b   :  { %992 = vmatpush3.bf16.msra.mxu0 %v1113_v5 }
  0x3c   :  { %993 = vmatprep.subr.bf16.mxu0 %v1116_v8 }
  0x3d   :  { %1014 = vmatpush3.bf16.msra.mxu1 %v1115_v7 }
  0x3e   :  { %1015 = vmatprep.subr.bf16.mxu1 %v1118_v10 }
  0x3f   :  { %994 = vmatpush3.bf16.msra.mxu0 %v1117_v9 }
  0x40   :  { %1032 = vmatprep.subr.bf16.mxu0 %v1130_v18 }
  0x41   :  { %1016 = vmatpush3.bf16.msra.mxu1 %v1119_v13 }
  0x42   :  { %767 = vmatmul.mubr.bf16.vlgmr.msra.gmra.mrb[4].mxu0 %v196_v12 }
  0x43   :  { %1033 = vmatpush3.bf16.msra.mxu0 %v1121_v17  ;;  %1048 = vmatprep.mubr.msk.bf16.mxu0 %vm1131_vm0, %v1130_v18 }
  0x44   :  { %807 = vmatmul.mubr.bf16.vlgmr.msra.gmra.mrb[4].mxu1 %v203_v16  ;;  %1034 = vmatprep.subr.bf16.mxu0 %v1130_v18 }
  0x47   :  { %1035 = vmatpush3.bf16.msra.mxu0 %v1122_v20 }
  0x48   :  { %1036 = vmatprep.subr.bf16.mxu0 %v1130_v18 }
  0x4b   :  { %1037 = vmatpush3.bf16.msra.mxu0 %v1123_v21 }
  0x4c   :  { %1038 = vmatprep.subr.bf16.mxu0 %v1130_v18 }
  0x4f   :  { %1039 = vmatpush3.bf16.msra.mxu0 %v1124_v22 }
  0x50   :  { %1040 = vmatprep.subr.bf16.mxu0 %v1130_v18 }
  0x53   :  { %1041 = vmatpush3.bf16.msra.mxu0 %v1125_v23 }
  0x54   :  { %1042 = vmatprep.subr.bf16.mxu0 %v1130_v18 }
  0x57   :  { %1043 = vmatpush3.bf16.msra.mxu0 %v1126_v24 }
  0x58   :  { %1044 = vmatprep.subr.bf16.mxu0 %v1130_v18 }
  0x5b   :  { %1045 = vmatpush3.bf16.msra.mxu0 %v1127_v25 }
  0x5c   :  { %1046 = vmatprep.subr.bf16.mxu0 %v1130_v18 }
  0x5f   :  { %1047 = vmatpush3.bf16.msra.mxu0 %v1128_v26 }
  0x62   :  { %1049 = vmatmul.mubr.bf16.vlgmr.msra.gmra.mrb[8].mxu0 %v862_v27 }
  0xf5   :  { %v951_v28 = vpop.f32.mrb[0].mxu0 }
  0xf6   :  { %v952_v30 = vpop.f32.mrb[1].mxu0 }
  0xf7   :  { %v953_v31 = vadd.f32 %v952_v30, %v951_v28  ;;  %v954_v32 = vpop.f32.mrb[2].mxu0  ;;  %v973_v33 = vpop.f32.mrb[0].mxu1 }
  0xf8   :  { %v955_v34 = vpop.f32.mrb[3].mxu0  ;;  %v974_v35 = vpop.f32.mrb[1].mxu1 }
  0xf9   :  { %v689_v36 = vadd.f32 %v953_v31, %v861_v29  ;;  %v975_v37 = vadd.f32 %v974_v35, %v973_v33  ;;  %v976_v38 = vpop.f32.mrb[2].mxu1 }
  0xfa   :  { %v977_v39 = vpop.f32.mrb[3].mxu1 }
  0xfb   :  { %v729_v40 = vadd.f32 %v975_v37, %v689_v36 }
 0x115   :  { %v995_v41 = vpop.f32.mrb[4].mxu0 }
 0x116   :  { %v996_v42 = vpop.f32.mrb[5].mxu0 }
 0x117   :  { %v997_v43 = vadd.f32 %v996_v42, %v995_v41  ;;  %v998_v44 = vpop.f32.mrb[6].mxu0  ;;  %v1017_v45 = vpop.f32.mrb[4].mxu1 }
 0x118   :  { %v999_v46 = vpop.f32.mrb[7].mxu0  ;;  %v1018_v47 = vpop.f32.mrb[5].mxu1 }
 0x119   :  { %v769_v48 = vadd.f32 %v997_v43, %v729_v40  ;;  %v1019_v49 = vadd.f32 %v1018_v47, %v1017_v45  ;;  %v1020_v50 = vpop.f32.mrb[6].mxu1 }
 0x11a   :  { %v1021_v51 = vpop.f32.mrb[7].mxu1 }
 0x11b   :  { %v809_v52 = vadd.f32 %v1019_v49, %v769_v48 }
 0x135   :  { %v848_v53 = vpop.f32.mrb[8].mxu0 }
 0x136   :  { %v849_v54 = vadd.f32 %v848_v53, %v809_v52  ;;  %v1050_v55 = vpop.f32.mrb[9].mxu0 }
 0x137   :  { %v851_v56 = vpop.f32.mrb[10].mxu0 }
 0x138   :  { %v854_v57 = vmax.f32 %v849_v54, 0.0  ;;  %v1051_v58 = vpop.f32.mrb[11].mxu0 }
 0x13a   :  { %v855_v59 = vpack.c.bf16 %v854_v57, %v854_v57 }
 0x13c   :  { %856 = vst [vmem:[%s1392_s3] sm:$0x3] %v855_v59 }

// kernel: forward.17
= control target key start
LH: loop header
LB: loop body
LE: loop exit
PB: predicated region body
PF: predicated region fallthrough
CT: control target
= control target key end

     0   :  { %v1190_v2 = vmov 0   ;;  %s1561_s0 = inlined_call_operand.vmem [shape: bf16[2,128], index: 0, kind: input, shape index: {}]   ;;  %s1562_s1 = inlined_call_operand.vmem [shape: bf16[2,128], index: 1, kind: input, shape index: {}]   ;;  %s1563_s2 = inlined_call_operand.vmem [shape: bf16[128,256], index: 2, kind: input, shape index: {}]   ;;  %s1564_s3 = inlined_call_operand.vmem [shape: f32[1,256], index: 3, kind: input, shape index: {}]   ;;  %s1565_s4 = inlined_call_operand.vmem [shape: bf16[256,256], index: 4, kind: input, shape index: {}]   ;;  %s1566_s5 = inlined_call_operand.vmem [shape: bf16[256,256], index: 5, kind: input, shape index: {}]   ;;  %s1567_s6 = inlined_call_operand.vmem [shape: f32[1,256], index: 6, kind: input, shape index: {}]   ;;  %s1568_s7 = inlined_call_operand.vmem [shape: bf16[256,10], index: 7, kind: input, shape index: {}]   ;;  %s1569_s8 = inlined_call_operand.vmem [shape: f32[1,10], index: 8, kind: input, shape index: {}]   ;;  %s1570_s9 = inlined_call_operand.hbm [shape: f32[2,10], index: 9, kind: output, shape index: {}]  }
   0x1   :  { %v1030_v0 = vld [vmem:[%s1563_s2 + $0x4] ss:$8 sps:$4 sm:$0xff]   ;;  %v1032_v1 = vld [vmem:[%s1563_s2] ss:$8 sps:$4 sm:$0xff]   ;;  %175 = vmatprep.mubr.bf16.mxu0 %v1190_v2  ;;  %219 = vmatprep.mubr.bf16.mxu1 %v1190_v2  ;;  %v1033_v3 = vld [vmem:[%s1563_s2 + $0x14] ss:$8 sps:$4 sm:$0xff]  }
   0x2   :  { %143 = vmatprep.subr.bf16.mxu0 %v1030_v0  ;;  %187 = vmatprep.subr.bf16.mxu1 %v1030_v0  ;;  %v1035_v4 = vld [vmem:[%s1563_s2 + $0x10] ss:$8 sps:$4 sm:$0xff]   ;;  %v1036_v5 = vld [vmem:[%s1563_s2 + $0x24] ss:$8 sps:$4 sm:$0xff]   ;;  %v1038_v6 = vld [vmem:[%s1563_s2 + $0x20] ss:$8 sps:$4 sm:$0xff]  }
   0x3   :  { %144 = vmatpush1.bf16.msra.mxu0 %v1032_v1  ;;  %188 = vmatpush1.bf16.msra.mxu1 %v1032_v1  ;;  %v1039_v7 = vld [vmem:[%s1563_s2 + $0x34] ss:$8 sps:$4 sm:$0xff]   ;;  %v1041_v8 = vld [vmem:[%s1563_s2 + $0x30] ss:$8 sps:$4 sm:$0xff]   ;;  %v1042_v9 = vld [vmem:[%s1563_s2 + $0x44] ss:$8 sps:$4 sm:$0xff]  }
   0x4   :  { %145 = vmatprep.subr.bf16.mxu0 %v1033_v3  ;;  %189 = vmatprep.subr.bf16.mxu1 %v1033_v3  ;;  %v1044_v10 = vld [vmem:[%s1563_s2 + $0x40] ss:$8 sps:$4 sm:$0xff]   ;;  %v1045_v11 = vld [vmem:[%s1563_s2 + $0x54] ss:$8 sps:$4 sm:$0xff]   ;;  %v1047_v12 = vld [vmem:[%s1563_s2 + $0x50] ss:$8 sps:$4 sm:$0xff]  }
   0x5   :  { %v1048_v13 = vld [vmem:[%s1563_s2 + $0x64] ss:$8 sps:$4 sm:$0xff]   ;;  %v1050_v14 = vld [vmem:[%s1563_s2 + $0x60] ss:$8 sps:$4 sm:$0xff]   ;;  %v1051_v15 = vld [vmem:[%s1563_s2 + $0x74] ss:$8 sps:$4 sm:$0xff]  }
   0x6   :  { %v1053_v16 = vld [vmem:[%s1563_s2 + $0x70] ss:$8 sps:$4 sm:$0xff]   ;;  %v1056_v17 = vld [vmem:[%s1566_s5 + $0x4] ss:$8 sps:$4 sm:$0xff]   ;;  %v34_v19 = vld [vmem:[%s1561_s0] sm:$0x1] }
   0x7   :  { %146 = vmatpush1.bf16.msra.mxu0 %v1035_v4  ;;  %190 = vmatpush1.bf16.msra.mxu1 %v1035_v4  ;;  %v1059_v18 = vld [vmem:[%s1565_s4 + $0x4] ss:$8 sps:$4 sm:$0xff]   ;;  %v186_v20 = vld [vmem:[%s1562_s1] sm:$0x1]  ;;  %v1062_v23 = vld [vmem:[%s1566_s5 + $0x14] ss:$8 sps:$4 sm:$0xff]  }
   0x8   :  { %147 = vmatprep.subr.bf16.mxu0 %v1036_v5  ;;  %191 = vmatprep.subr.bf16.mxu1 %v1036_v5  ;;  %v1054_v21 = vld [vmem:[%s1566_s5] ss:$8 sps:$4 sm:$0xff]   ;;  %v1065_v24 = vld [vmem:[%s1565_s4 + $0x14] ss:$8 sps:$4 sm:$0xff]   ;;  %v1060_v25 = vld [vmem:[%s1566_s5 + $0x10] ss:$8 sps:$4 sm:$0xff]  }
   0x9   :  { %v1057_v22 = vld [vmem:[%s1565_s4] ss:$8 sps:$4 sm:$0xff]   ;;  %v1063_v26 = vld [vmem:[%s1565_s4 + $0x10] ss:$8 sps:$4 sm:$0xff]   ;;  %v1068_v27 = vld [vmem:[%s1566_s5 + $0x24] ss:$8 sps:$4 sm:$0xff]  }
   0xa   :  { %v1071_v28 = vld [vmem:[%s1565_s4 + $0x24] ss:$8 sps:$4 sm:$0xff]   ;;  %v1066_v29 = vld [vmem:[%s1566_s5 + $0x20] ss:$8 sps:$4 sm:$0xff]   ;;  %v1074_v31 = vld [vmem:[%s1566_s5 + $0x34] ss:$8 sps:$4 sm:$0xff]  }
   0xb   :  { %148 = vmatpush1.bf16.msra.mxu0 %v1038_v6  ;;  %192 = vmatpush1.bf16.msra.mxu1 %v1038_v6  ;;  %v1069_v30 = vld [vmem:[%s1565_s4 + $0x20] ss:$8 sps:$4 sm:$0xff]   ;;  %v1077_v32 = vld [vmem:[%s1565_s4 + $0x34] ss:$8 sps:$4 sm:$0xff]   ;;  %v1072_v33 = vld [vmem:[%s1566_s5 + $0x30] ss:$8 sps:$4 sm:$0xff]  }
   0xc   :  { %149 = vmatprep.subr.bf16.mxu0 %v1039_v7  ;;  %193 = vmatprep.subr.bf16.mxu1 %v1039_v7  ;;  %v1075_v34 = vld [vmem:[%s1565_s4 + $0x30] ss:$8 sps:$4 sm:$0xff]   ;;  %v1080_v35 = vld [vmem:[%s1566_s5 + $0x44] ss:$8 sps:$4 sm:$0xff]   ;;  %v1078_v37 = vld [vmem:[%s1566_s5 + $0x40] ss:$8 sps:$4 sm:$0xff]  }
   0xd   :  { %v1083_v36 = vld [vmem:[%s1565_s4 + $0x44] ss:$8 sps:$4 sm:$0xff]   ;;  %v1081_v38 = vld [vmem:[%s1565_s4 + $0x40] ss:$8 sps:$4 sm:$0xff]   ;;  %v1086_v39 = vld [vmem:[%s1566_s5 + $0x54] ss:$8 sps:$4 sm:$0xff]  }
   0xe   :  { %v1089_v40 = vld [vmem:[%s1565_s4 + $0x54] ss:$8 sps:$4 sm:$0xff]   ;;  %v1084_v41 = vld [vmem:[%s1566_s5 + $0x50] ss:$8 sps:$4 sm:$0xff]   ;;  %v1092_v43 = vld [vmem:[%s1566_s5 + $0x64] ss:$8 sps:$4 sm:$0xff]  }
   0xf   :  { %150 = vmatpush1.bf16.msra.mxu0 %v1041_v8  ;;  %194 = vmatpush1.bf16.msra.mxu1 %v1041_v8  ;;  %v1087_v42 = vld [vmem:[%s1565_s4 + $0x50] ss:$8 sps:$4 sm:$0xff]   ;;  %v1095_v44 = vld [vmem:[%s1565_s4 + $0x64] ss:$8 sps:$4 sm:$0xff]   ;;  %v1090_v45 = vld [vmem:[%s1566_s5 + $0x60] ss:$8 sps:$4 sm:$0xff]  }
  0x10   :  { %151 = vmatprep.subr.bf16.mxu0 %v1042_v9  ;;  %195 = vmatprep.subr.bf16.mxu1 %v1042_v9  ;;  %v1093_v46 = vld [vmem:[%s1565_s4 + $0x60] ss:$8 sps:$4 sm:$0xff]   ;;  %v1098_v47 = vld [vmem:[%s1566_s5 + $0x74] ss:$8 sps:$4 sm:$0xff]   ;;  %v1096_v49 = vld [vmem:[%s1566_s5 + $0x70] ss:$8 sps:$4 sm:$0xff]  }
  0x11   :  { %v1101_v48 = vld [vmem:[%s1565_s4 + $0x74] ss:$8 sps:$4 sm:$0xff]   ;;  %v1099_v50 = vld [vmem:[%s1565_s4 + $0x70] ss:$8 sps:$4 sm:$0xff]   ;;  %v1104_v51 = vld [vmem:[%s1566_s5 + $0x84] ss:$8 sps:$4 sm:$0xff]  }
  0x12   :  { %v1107_v52 = vld [vmem:[%s1565_s4 + $0x84] ss:$8 sps:$4 sm:$0xff]  }
  0x13   :  { %152 = vmatpush1.bf16.msra.mxu0 %v1044_v10  ;;  %196 = vmatpush1.bf16.msra.mxu1 %v1044_v10 }
  0x14   :  { %153 = vmatprep.subr.bf16.mxu0 %v1045_v11  ;;  %197 = vmatprep.subr.bf16.mxu1 %v1045_v11 }
  0x17   :  { %154 = vmatpush1.bf16.msra.mxu0 %v1047_v12  ;;  %198 = vmatpush1.bf16.msra.mxu1 %v1047_v12 }
  0x18   :  { %155 = vmatprep.subr.bf16.mxu0 %v1048_v13  ;;  %199 = vmatprep.subr.bf16.mxu1 %v1048_v13 }
  0x1b   :  { %156 = vmatpush1.bf16.msra.mxu0 %v1050_v14  ;;  %200 = vmatpush1.bf16.msra.mxu1 %v1050_v14 }
  0x1c   :  { %157 = vmatprep.subr.bf16.mxu0 %v1051_v15  ;;  %201 = vmatprep.subr.bf16.mxu1 %v1051_v15 }
  0x1f   :  { %158 = vmatpush1.bf16.msra.mxu0 %v1053_v16  ;;  %202 = vmatpush1.bf16.msra.mxu1 %v1053_v16 }
  0x20   :  { %458 = vmatprep.subr.bf16.mxu0 %v1056_v17  ;;  %659 = vmatprep.subr.bf16.mxu1 %v1059_v18 }
  0x22   :  { %176 = vmatmul.mubr.bf16.vlgmr.msra.gmra.mrb[0].mxu0 %v34_v19  ;;  %220 = vmatmul.mubr.bf16.vlgmr.msra.gmra.mrb[0].mxu1 %v186_v20 }
  0x23   :  { %459 = vmatpush1.bf16.msra.mxu0 %v1054_v21  ;;  %660 = vmatpush1.bf16.msra.mxu1 %v1057_v22 }
  0x24   :  { %460 = vmatprep.subr.bf16.mxu0 %v1062_v23  ;;  %661 = vmatprep.subr.bf16.mxu1 %v1065_v24 }
  0x27   :  { %461 = vmatpush1.bf16.msra.mxu0 %v1060_v25  ;;  %662 = vmatpush1.bf16.msra.mxu1 %v1063_v26 }
  0x28   :  { %462 = vmatprep.subr.bf16.mxu0 %v1068_v27  ;;  %663 = vmatprep.subr.bf16.mxu1 %v1071_v28 }
  0x2b   :  { %463 = vmatpush1.bf16.msra.mxu0 %v1066_v29  ;;  %664 = vmatpush1.bf16.msra.mxu1 %v1069_v30 }
  0x2c   :  { %464 = vmatprep.subr.bf16.mxu0 %v1074_v31  ;;  %665 = vmatprep.subr.bf16.mxu1 %v1077_v32 }
  0x2f   :  { %465 = vmatpush1.bf16.msra.mxu0 %v1072_v33  ;;  %666 = vmatpush1.bf16.msra.mxu1 %v1075_v34 }
  0x30   :  { %466 = vmatprep.subr.bf16.mxu0 %v1080_v35  ;;  %667 = vmatprep.subr.bf16.mxu1 %v1083_v36 }
  0x33   :  { %467 = vmatpush1.bf16.msra.mxu0 %v1078_v37  ;;  %668 = vmatpush1.bf16.msra.mxu1 %v1081_v38 }
  0x34   :  { %468 = vmatprep.subr.bf16.mxu0 %v1086_v39  ;;  %669 = vmatprep.subr.bf16.mxu1 %v1089_v40 }
  0x37   :  { %469 = vmatpush1.bf16.msra.mxu0 %v1084_v41  ;;  %670 = vmatpush1.bf16.msra.mxu1 %v1087_v42 }
  0x38   :  { %470 = vmatprep.subr.bf16.mxu0 %v1092_v43  ;;  %671 = vmatprep.subr.bf16.mxu1 %v1095_v44 }
  0x3b   :  { %471 = vmatpush1.bf16.msra.mxu0 %v1090_v45  ;;  %672 = vmatpush1.bf16.msra.mxu1 %v1093_v46 }
  0x3c   :  { %472 = vmatprep.subr.bf16.mxu0 %v1098_v47  ;;  %673 = vmatprep.subr.bf16.mxu1 %v1101_v48 }
  0x3d   :  { %14 = vsyncpa [#allocation3], 0  ;;  %v1102_v53 = vld [vmem:[%s1566_s5 + $0x80] ss:$8 sps:$4 sm:$0xff]   ;;  %v1110_v55 = vld [vmem:[%s1566_s5 + $0x94] ss:$8 sps:$4 sm:$0xff]   ;;  %v53_v20 = vlaneseq }
  0x3e   :  { %v1105_v54 = vld [vmem:[%s1565_s4 + $0x80] ss:$8 sps:$4 sm:$0xff]   ;;  %v1113_v56 = vld [vmem:[%s1565_s4 + $0x94] ss:$8 sps:$4 sm:$0xff]   ;;  %v1108_v57 = vld [vmem:[%s1566_s5 + $0x90] ss:$8 sps:$4 sm:$0xff]  }
  0x3f   :  { %473 = vmatpush1.bf16.msra.mxu0 %v1096_v49  ;;  %674 = vmatpush1.bf16.msra.mxu1 %v1099_v50  ;;  %v1111_v58 = vld [vmem:[%s1565_s4 + $0x90] ss:$8 sps:$4 sm:$0xff]   ;;  %v1116_v59 = vld [vmem:[%s1566_s5 + $0xa4] ss:$8 sps:$4 sm:$0xff]   ;;  %v1114_v61 = vld [vmem:[%s1566_s5 + $0xa0] ss:$8 sps:$4 sm:$0xff]  }
  0x40   :  { %474 = vmatprep.subr.bf16.mxu0 %v1104_v51  ;;  %675 = vmatprep.subr.bf16.mxu1 %v1107_v52  ;;  %v1119_v60 = vld [vmem:[%s1565_s4 + $0xa4] ss:$8 sps:$4 sm:$0xff]   ;;  %v1117_v62 = vld [vmem:[%s1565_s4 + $0xa0] ss:$8 sps:$4 sm:$0xff]   ;;  %v1122_v63 = vld [vmem:[%s1566_s5 + $0xb4] ss:$8 sps:$4 sm:$0xff]  }
  0x41   :  { %v1125_v0 = vld [vmem:[%s1565_s4 + $0xb4] ss:$8 sps:$4 sm:$0xff]   ;;  %v1120_v1 = vld [vmem:[%s1566_s5 + $0xb0] ss:$8 sps:$4 sm:$0xff]   ;;  %v1128_v3 = vld [vmem:[%s1566_s5 + $0xc4] ss:$8 sps:$4 sm:$0xff]  }
  0x42   :  { %v1123_v2 = vld [vmem:[%s1565_s4 + $0xb0] ss:$8 sps:$4 sm:$0xff]   ;;  %v1131_v4 = vld [vmem:[%s1565_s4 + $0xc4] ss:$8 sps:$4 sm:$0xff]   ;;  %v1126_v5 = vld [vmem:[%s1566_s5 + $0xc0] ss:$8 sps:$4 sm:$0xff]  }
  0x43   :  { %475 = vmatpush1.bf16.msra.mxu0 %v1102_v53  ;;  %676 = vmatpush1.bf16.msra.mxu1 %v1105_v54  ;;  %v1129_v6 = vld [vmem:[%s1565_s4 + $0xc0] ss:$8 sps:$4 sm:$0xff]   ;;  %v1134_v7 = vld [vmem:[%s1566_s5 + $0xd4] ss:$8 sps:$4 sm:$0xff]   ;;  %v1132_v9 = vld [vmem:[%s1566_s5 + $0xd0] ss:$8 sps:$4 sm:$0xff]  }
  0x44   :  { %476 = vmatprep.subr.bf16.mxu0 %v1110_v55  ;;  %677 = vmatprep.subr.bf16.mxu1 %v1113_v56  ;;  %v1137_v8 = vld [vmem:[%s1565_s4 + $0xd4] ss:$8 sps:$4 sm:$0xff]   ;;  %v1135_v10 = vld [vmem:[%s1565_s4 + $0xd0] ss:$8 sps:$4 sm:$0xff]   ;;  %v1140_v11 = vld [vmem:[%s1566_s5 + $0xe4] ss:$8 sps:$4 sm:$0xff]  }
  0x45   :  { %v1143_v12 = vld [vmem:[%s1565_s4 + $0xe4] ss:$8 sps:$4 sm:$0xff]   ;;  %v1138_v13 = vld [vmem:[%s1566_s5 + $0xe0] ss:$8 sps:$4 sm:$0xff]   ;;  %v1146_v15 = vld [vmem:[%s1566_s5 + $0xf4] ss:$8 sps:$4 sm:$0xff]  }
  0x46   :  { %v1141_v14 = vld [vmem:[%s1565_s4 + $0xe0] ss:$8 sps:$4 sm:$0xff]   ;;  %v1149_v16 = vld [vmem:[%s1565_s4 + $0xf4] ss:$8 sps:$4 sm:$0xff]   ;;  %v1144_v17 = vld [vmem:[%s1566_s5 + $0xf0] ss:$8 sps:$4 sm:$0xff]  }
  0x47   :  { %477 = vmatpush1.bf16.msra.mxu0 %v1108_v57  ;;  %678 = vmatpush1.bf16.msra.mxu1 %v1111_v58  ;;  %v1147_v18 = vld [vmem:[%s1565_s4 + $0xf0] ss:$8 sps:$4 sm:$0xff]   ;;  %v1150_v19 = vld [vmem:[%s1568_s7 + $0x40] sm:$0xff]   ;;  %v1491_v21 = vshrl.u32 %v53_v20, 7  ;;  %v1152_v48 = vld [vmem:[%s1568_s7 + $0x48] sm:$0xff]   ;;  %s1191_s14 = smov [#allocation2]  }
  0x48   :  { %478 = vmatprep.subr.bf16.mxu0 %v1116_v59  ;;  %679 = vmatprep.subr.bf16.mxu1 %v1119_v60  ;;  %v51_v23 = vld [vmem:[%s1564_s3] sm:$0x3]  ;;  %v1153_v49 = vld [vmem:[%s1568_s7 + $0x8] sm:$0xff]   ;;  %v1154_v50 = vld [vmem:[%s1568_s7 + $0x50] sm:$0xff]   ;;  %s901_s15 = sshll.u32 %s1191_s14, 4  ;;  %vm893_vm0 = vcmask 74752   ;;  %s902_s15 = int_to_ptr.vmem [resolvable:$true] %s901_s15 }
  0x49   :  { %v55_v22 = vsub.s32 0, %v1491_v21  ;;  %v59_v24 = vsub.s32 1, %v1491_v21  ;;  %v1151_v45 = vld [vmem:[%s1568_s7] sm:$0xff]   ;;  %v1155_v51 = vld [vmem:[%s1568_s7 + $0x10] sm:$0xff]   ;;  %v1156_v52 = vld [vmem:[%s1568_s7 + $0x58] sm:$0xff]   ;;  %s1166_s16 = scalar_lea.vmem %s902_s15, 32  ;;  %p1171_p1 = scmp.lt.s32.totalorder %s902_s15, %s902_s15 }
  0x4a   :  { %v1157_v53 = vld [vmem:[%s1568_s7 + $0x18] sm:$0xff]   ;;  %v1158_v54 = vld [vmem:[%s1568_s7 + $0x60] sm:$0xff]   ;;  %v1160_v56 = vld [vmem:[%s1568_s7 + $0x68] sm:$0xff]   ;;  %p1167_p0 = scmp.ne.s32.totalorder %s902_s15, %s1166_s16  ;;  %p1172_p2 = scmp.lt.s32.totalorder %s1166_s16, %s1166_s16 }
  0x4b   :  { %479 = vmatpush1.bf16.msra.mxu0 %v1114_v61  ;;  %680 = vmatpush1.bf16.msra.mxu1 %v1117_v62  ;;  %v56_v25 = vrot.slane %v51_v23, %v55_v22  ;;  %v60_v26 = vrot.slane %v51_v23, %v59_v24  ;;  %v1159_v55 = vld [vmem:[%s1568_s7 + $0x20] sm:$0xff]   ;;  %v1161_v57 = vld [vmem:[%s1568_s7 + $0x28] sm:$0xff]   ;;  %v1162_v58 = vld [vmem:[%s1568_s7 + $0x70] sm:$0xff]  }
  0x4c   :  { %480 = vmatprep.subr.bf16.mxu0 %v1122_v63  ;;  %681 = vmatprep.subr.bf16.mxu1 %v1125_v0  ;;  %v1163_v59 = vld [vmem:[%s1568_s7 + $0x30] sm:$0xff]   ;;  %v1164_v60 = vld [vmem:[%s1568_s7 + $0x78] sm:$0xff]   ;;  %v700_v62 = vld [vmem:[%s1567_s6] sm:$0x3]  ;;  %p1173_p3 = por %p1172_p2, %p1171_p1 }
  0x4d   :  { %v1165_v61 = vld [vmem:[%s1568_s7 + $0x38] sm:$0xff]   ;;  %v705_v63 = vrot.slane %v700_v62, %v55_v22 }
  0x4e   :  { %p1174_p4 = pnand %p1173_p3, %p1167_p0 }
  0x4f   :  { %481 = vmatpush1.bf16.msra.mxu0 %v1120_v1  ;;  %682 = vmatpush1.bf16.msra.mxu1 %v1123_v2  ;;  %v709_v2 = vrot.slane %v700_v62, %v59_v24 }
  0x50   :  { %482 = vmatprep.subr.bf16.mxu0 %v1128_v3  ;;  %683 = vmatprep.subr.bf16.mxu1 %v1131_v4 }
  0x53   :  { %483 = vmatpush1.bf16.msra.mxu0 %v1126_v5  ;;  %684 = vmatpush1.bf16.msra.mxu1 %v1129_v6 }
  0x54   :  { %484 = vmatprep.subr.bf16.mxu0 %v1134_v7  ;;  %685 = vmatprep.subr.bf16.mxu1 %v1137_v8 }
  0x57   :  { %485 = vmatpush1.bf16.msra.mxu0 %v1132_v9  ;;  %686 = vmatpush1.bf16.msra.mxu1 %v1135_v10 }
  0x58   :  { %486 = vmatprep.subr.bf16.mxu0 %v1140_v11  ;;  %687 = vmatprep.subr.bf16.mxu1 %v1143_v12 }
  0x5b   :  { %487 = vmatpush1.bf16.msra.mxu0 %v1138_v13  ;;  %688 = vmatpush1.bf16.msra.mxu1 %v1141_v14 }
  0x5c   :  { %488 = vmatprep.subr.bf16.mxu0 %v1146_v15  ;;  %689 = vmatprep.subr.bf16.mxu1 %v1149_v16 }
  0x5f   :  { %489 = vmatpush1.bf16.msra.mxu0 %v1144_v17  ;;  %690 = vmatpush1.bf16.msra.mxu1 %v1147_v18  ;;  %v989_v18 = vld [vmem:[%s1569_s8] ss:$0 sm:$0xff] }
  0x60   :  { %1006 = vmatprep.subr.bf16.mxu0 %v1150_v19 }
  0xf5   :  { %v177_v27 = vpop.f32.mrb[0].mxu0  ;;  %v221_v28 = vpop.f32.mrb[0].mxu1 }
  0xf6   :  { %v178_v29 = vadd.f32 %v177_v27, %v56_v25  ;;  %v222_v30 = vadd.f32 %v221_v28, %v56_v25  ;;  %v179_v31 = vpop.f32.mrb[1].mxu0  ;;  %v223_v32 = vpop.f32.mrb[1].mxu1 }
  0xf7   :  { %v180_v33 = vadd.f32 %v179_v31, %v60_v26  ;;  %v224_v34 = vadd.f32 %v223_v32, %v60_v26  ;;  %v181_v35 = vpop.f32.mrb[2].mxu0  ;;  %v225_v36 = vpop.f32.mrb[2].mxu1 }
  0xf8   :  { %v184_v37 = vmax.f32 %v178_v29, 0.0  ;;  %v228_v38 = vmax.f32 %v222_v30, 0.0  ;;  %v182_v39 = vpop.f32.mrb[3].mxu0  ;;  %v226_v40 = vpop.f32.mrb[3].mxu1 }
  0xf9   :  { %v185_v41 = vmax.f32 %v180_v33, 0.0  ;;  %v229_v42 = vmax.f32 %v224_v34, 0.0 }
  0xfa   :  { %v230_v46 = vpack.c.bf16 %v184_v37, %v184_v37  ;;  %v264_v47 = vpack.c.bf16 %v228_v38, %v228_v38 }
  0xfb   :  { %v231_v43 = vpack.c.bf16 %v185_v41, %v185_v41  ;;  %v265_v44 = vpack.c.bf16 %v229_v42, %v229_v42 }
  0xfd   :  { %490 = vmatprep.mubr.bf16.mxu0 %v265_v44  ;;  %691 = vmatprep.mubr.bf16.mxu1 %v231_v43 }
  0xfe   :  { %491 = vmatmul.mubr.bf16.vlgmr.msra.gmra.mrb[4].mxu0 %v264_v47  ;;  %692 = vmatmul.mubr.bf16.vlgmr.msra.gmra.mrb[4].mxu1 %v230_v46 }
  0xff   :  { %1007 = vmatpush3.bf16.msra.mxu0 %v1151_v45 }
 0x100   :  { %1008 = vmatprep.subr.bf16.mxu0 %v1152_v48 }
 0x103   :  { %1009 = vmatpush3.bf16.msra.mxu0 %v1153_v49 }
 0x104   :  { %1010 = vmatprep.subr.bf16.mxu0 %v1154_v50 }
 0x107   :  { %1011 = vmatpush3.bf16.msra.mxu0 %v1155_v51 }
 0x108   :  { %1012 = vmatprep.subr.bf16.mxu0 %v1156_v52 }
 0x10b   :  { %1013 = vmatpush3.bf16.msra.mxu0 %v1157_v53 }
 0x10c   :  { %1014 = vmatprep.subr.bf16.mxu0 %v1158_v54 }
 0x10f   :  { %1015 = vmatpush3.bf16.msra.mxu0 %v1159_v55 }
 0x110   :  { %1016 = vmatprep.subr.bf16.mxu0 %v1160_v56 }
 0x113   :  { %1017 = vmatpush3.bf16.msra.mxu0 %v1161_v57 }
 0x114   :  { %1018 = vmatprep.subr.bf16.mxu0 %v1162_v58 }
 0x117   :  { %1019 = vmatpush3.bf16.msra.mxu0 %v1163_v59 }
 0x118   :  { %1020 = vmatprep.subr.bf16.mxu0 %v1164_v60 }
 0x11b   :  { %1021 = vmatpush3.bf16.msra.mxu0 %v1165_v61 }
 0x1d1   :  { %v492_v0 = vpop.f32.mrb[4].mxu0  ;;  %v693_v1 = vpop.f32.mrb[4].mxu1 }
 0x1d2   :  { %v694_v3 = vadd.f32 %v693_v1, %v492_v0  ;;  %v494_v4 = vpop.f32.mrb[5].mxu0  ;;  %v695_v5 = vpop.f32.mrb[5].mxu1 }
 0x1d3   :  { %v696_v6 = vadd.f32 %v695_v5, %v494_v4  ;;  %v496_v7 = vpop.f32.mrb[6].mxu0  ;;  %v697_v8 = vpop.f32.mrb[6].mxu1 }
 0x1d4   :  { %v712_v9 = vadd.f32 %v705_v63, %v694_v3  ;;  %v497_v10 = vpop.f32.mrb[7].mxu0  ;;  %v698_v11 = vpop.f32.mrb[7].mxu1 }
 0x1d5   :  { %v713_v12 = vadd.f32 %v709_v2, %v696_v6 }
 0x1d6   :  { %v714_v13 = vmax.f32 %v712_v9, 0.0 }
 0x1d7   :  { %v715_v14 = vmax.f32 %v713_v12, 0.0 }
 0x1d8   :  { %v716_v16 = vpack.c.bf16 %v714_v13, %v714_v13 }
 0x1d9   :  { %v717_v15 = vpack.c.bf16 %v715_v14, %v715_v14 }
 0x1db   :  { %885 = vmatprep.mubr.bf16.mxu0 %v717_v15 }
 0x1dc   :  { %886 = vmatmul.mubr.bf16.vlgmr.msra.gmra.mrb[8].mxu0 %v716_v16 }
 0x2af   :  { %v1022_v17 = vpop.f32.mrb[8].mxu0 }
 0x2b0   :  { %v1023_v19 = vpop.f32.mrb[9].mxu0 }
 0x2b1   :  { %v1024_v20 = vadd.f32 %v1023_v19, %v1022_v17  ;;  %v1025_v21 = vpop.f32.mrb[10].mxu0 }
 0x2b2   :  { %v1026_v22 = vpop.f32.mrb[11].mxu0 }
 0x2b3   :  { %v888_v23 = vadd.f32 %v1024_v20, %v989_v18 }
 0x2b5   :  { %894 = vst.msk [vmem:[#allocation2] sm:$0x3] %vm893_vm0, %v888_v23 }
 0x2b6   :  { %1177 = shalt.err (!%p1174_p4)
}
 0x2b7   :  { %s1178_s8 = scalar_lea.hbm %s1570_s9, 32 }
 0x2b8   :  { %p1179_p5 = scmp.ne.s32.totalorder %s1570_s9, %s1178_s8  ;;  %p1182_p6 = scmp.lt.u32.totalorder %s1178_s8, %s1570_s9 }
 0x2ba   :  { %p1184_p7 = pnand %p1182_p6, %p1179_p5 }
 0x2bc   :  { %1187 = shalt.err (!%p1184_p7)
}
 0x2bd   :  { %904 = dma.vmem_to_hbm [thread:$0]  %s902_s15, 32, %s1570_s9, [#allocation3]  }
 0x2be   :  { %1188 = dma.done.wait [#allocation3], 32  }
 0x2bf   :  { %1189 = vsyncadd [#allocation3], 4294967264 }
 0x2c0   :  { %908 = vsyncpa [#allocation3], 1 }

</bundles_post_ra>
